<compile_context>
chip_gen: v6e
topology: v6e:2x2x1
jax: 0.10.0
libtpu: 0.0.40
codegen_flags: <defaults>
</compile_context>

<pallas_src>
import math

import numpy as np
import jax
import jax.numpy as jnp
from jax import lax
from jax.experimental import pallas as pl
from jax.experimental.pallas import tpu as pltpu

# ---------------- model hyper-parameters (small, deterministic) ----------------
B = 2            # batch
S_SRC = 8        # source sequence length
S_TGT = 8        # target sequence length
D_MODEL = 32     # model width
N_HEADS = 4
D_HEAD = D_MODEL // N_HEADS
D_FF = 64
VOCAB = 16
N_LAYERS = 2
LN_EPS = 1e-6

SLAB_LANES = 128   # lane width of the packed parameter slab

# ----------------------------- parameter slab layout ---------------------------
# Every parameter lives in one [SLAB_ROWS, 128] f32 slab: a matrix [din, dout]
# occupies `din` rows (row offset 8-aligned) and lanes [0, dout); vectors take
# one (8-aligned) row.  Offsets are static Python ints baked into the kernel.

_PER_LAYER_ENTRIES = [
    ("enc_qkv_w", D_MODEL, 3 * D_MODEL), ("enc_qkv_b", 1, 3 * D_MODEL),
    ("enc_wo_w", D_MODEL, D_MODEL),      ("enc_wo_b", 1, D_MODEL),
    ("enc_ff1_w", D_MODEL, D_FF),        ("enc_ff1_b", 1, D_FF),
    ("enc_ff2_w", D_FF, D_MODEL),        ("enc_ff2_b", 1, D_MODEL),
    ("enc_ln1_g", 1, D_MODEL), ("enc_ln1_b", 1, D_MODEL),
    ("enc_ln2_g", 1, D_MODEL), ("enc_ln2_b", 1, D_MODEL),
    ("dec_sa_qkv_w", D_MODEL, 3 * D_MODEL), ("dec_sa_qkv_b", 1, 3 * D_MODEL),
    ("dec_sa_wo_w", D_MODEL, D_MODEL),      ("dec_sa_wo_b", 1, D_MODEL),
    ("dec_ca_q_w", D_MODEL, D_MODEL),       ("dec_ca_q_b", 1, D_MODEL),
    ("dec_ca_kv_w", D_MODEL, 2 * D_MODEL),  ("dec_ca_kv_b", 1, 2 * D_MODEL),
    ("dec_ca_wo_w", D_MODEL, D_MODEL),      ("dec_ca_wo_b", 1, D_MODEL),
    ("dec_ff1_w", D_MODEL, D_FF),           ("dec_ff1_b", 1, D_FF),
    ("dec_ff2_w", D_FF, D_MODEL),           ("dec_ff2_b", 1, D_MODEL),
    ("dec_ln1_g", 1, D_MODEL), ("dec_ln1_b", 1, D_MODEL),
    ("dec_ln2_g", 1, D_MODEL), ("dec_ln2_b", 1, D_MODEL),
    ("dec_ln3_g", 1, D_MODEL), ("dec_ln3_b", 1, D_MODEL),
]
_GLOBAL_ENTRIES = [
    ("enc_norm_g", 1, D_MODEL), ("enc_norm_b", 1, D_MODEL),
    ("dec_norm_g", 1, D_MODEL), ("dec_norm_b", 1, D_MODEL),
    ("src_lut", VOCAB, D_MODEL), ("tgt_lut", VOCAB, D_MODEL),
    ("pe", max(S_SRC, S_TGT), D_MODEL),
]


def _build_layout():
    layout, row = {}, 0

    def add(name, r, c):
        nonlocal row
        layout[name] = (row, r, c)
        row += ((r + 7) // 8) * 8          # keep every entry 8-sublane aligned

    for l in range(N_LAYERS):
        for base, r, c in _PER_LAYER_ENTRIES:
            add(f"{base}_{l}", r, c)
    for name, r, c in _GLOBAL_ENTRIES:
        add(name, r, c)
    return layout, row


LAYOUT, SLAB_ROWS = _build_layout()


def pack_params(params):
    """Pack the parameter dict into one lane-dense f32 slab [SLAB_ROWS, 128]."""
    slab = np.zeros((SLAB_ROWS, SLAB_LANES), np.float32)

    def put(name, arr):
        r0, r, c = LAYOUT[name]
        slab[r0:r0 + r, :c] = np.asarray(arr, np.float32).reshape(r, c)

    for l in range(N_LAYERS):
        for base, _, _ in _PER_LAYER_ENTRIES:
            put(f"{base}_{l}", params[base][l])
    for name, _, _ in _GLOBAL_ENTRIES:
        put(name, params[name])
    return jnp.asarray(slab)


# ========================= fused whole-model Pallas kernel =====================
# One grid step == full encoder + decoder for ONE batch element (batches are
# independent), so the batch grid axis can be marked "parallel" (2 TCs on v7x).

def _encdec_kernel(src_ids_ref, tgt_ids_ref, src_bias_ref, tgt_bias_ref,
                   slab_ref, o_ref):
    scale = 1.0 / math.sqrt(D_HEAD)

    # ---------------- static slab accessors ----------------
    def W(name):                       # matrix [din, dout]
        r0, r, c = LAYOUT[name]
        return slab_ref[r0:r0 + r, :c]

    def V(name):                       # vector as [1, dout] (broadcasts)
        r0, _, c = LAYOUT[name]
        return slab_ref[r0:r0 + 1, :c]

    # ---------------- traced helpers ----------------
    def layernorm(x, gname, bname):
        # annotated-transformer LayerNorm: unbiased (N-1) var, eps added to std
        mean = jnp.mean(x, axis=-1, keepdims=True)
        var = jnp.sum((x - mean) ** 2, axis=-1, keepdims=True) / float(x.shape[-1] - 1)
        return V(gname) * (x - mean) / (jnp.sqrt(var) + LN_EPS) + V(bname)

    def linear(x, wname, bname):
        return jnp.dot(x, W(wname), preferred_element_type=jnp.float32) + V(bname)

    def attention(q, k, v, bias, wo_name, wob_name):
        # q: [sq, D], k/v: [sk, D], bias: additive [1 or sq, sk] (0 keep / -1e9 drop)
        wo = W(wo_name)
        out = None
        for h in range(N_HEADS):
            sl = slice(h * D_HEAD, (h + 1) * D_HEAD)
            # scores = Q_h K_h^T without an explicit transpose (contract last dims)
            s = lax.dot_general(q[:, sl], k[:, sl],
                                dimension_numbers=(((1,), (1,)), ((), ())),
                                preferred_element_type=jnp.float32) * scale
            s = s + bias
            s = s - jnp.max(s, axis=-1, keepdims=True)
            e = jnp.exp(s)
            p = e / jnp.sum(e, axis=-1, keepdims=True)          # exact divide
            oh = jnp.dot(p, v[:, sl], preferred_element_type=jnp.float32)   # [sq, Dh]
            # fuse the output projection per head -> no head/batch concatenates
            contrib = jnp.dot(oh, wo[sl, :], preferred_element_type=jnp.float32)
            out = contrib if out is None else out + contrib
        return out + V(wob_name)

    def embed(ids_ref, lut_name, seq_len):
        ids = ids_ref[...]                                       # [seq, 1] int32
        onehot = (ids == lax.broadcasted_iota(jnp.int32, (seq_len, VOCAB), 1)
                  ).astype(jnp.float32)                          # [seq, VOCAB]
        x = jnp.dot(onehot, W(lut_name), preferred_element_type=jnp.float32)
        return x * math.sqrt(D_MODEL) + W("pe")[:seq_len, :]

    src_bias = src_bias_ref[0]     # [1, S_SRC]   additive pad-mask bias
    tgt_bias = tgt_bias_ref[0]     # [S_TGT, S_TGT] additive pad+causal bias

    # ------------------------------- encoder -------------------------------
    x = embed(src_ids_ref, "src_lut", S_SRC)                     # [S_SRC, D]
    for l in range(N_LAYERS):
        y = layernorm(x, f"enc_ln1_g_{l}", f"enc_ln1_b_{l}")
        qkv = linear(y, f"enc_qkv_w_{l}", f"enc_qkv_b_{l}")      # [S, 3D]
        q = qkv[:, 0 * D_MODEL:1 * D_MODEL]
        k = qkv[:, 1 * D_MODEL:2 * D_MODEL]
        v = qkv[:, 2 * D_MODEL:3 * D_MODEL]
        x = x + attention(q, k, v, src_bias, f"enc_wo_w_{l}", f"enc_wo_b_{l}")

        y = layernorm(x, f"enc_ln2_g_{l}", f"enc_ln2_b_{l}")
        h = jnp.maximum(linear(y, f"enc_ff1_w_{l}", f"enc_ff1_b_{l}"), 0.0)
        x = x + linear(h, f"enc_ff2_w_{l}", f"enc_ff2_b_{l}")
    memory = layernorm(x, "enc_norm_g", "enc_norm_b")            # [S_SRC, D]

    # ------------------------------- decoder -------------------------------
    z = embed(tgt_ids_ref, "tgt_lut", S_TGT)                     # [S_TGT, D]
    for l in range(N_LAYERS):
        # masked self-attention
        y = layernorm(z, f"dec_ln1_g_{l}", f"dec_ln1_b_{l}")
        qkv = linear(y, f"dec_sa_qkv_w_{l}", f"dec_sa_qkv_b_{l}")
        q = qkv[:, 0 * D_MODEL:1 * D_MODEL]
        k = qkv[:, 1 * D_MODEL:2 * D_MODEL]
        v = qkv[:, 2 * D_MODEL:3 * D_MODEL]
        z = z + attention(q, k, v, tgt_bias, f"dec_sa_wo_w_{l}", f"dec_sa_wo_b_{l}")

        # encoder-decoder (cross) attention
        y = layernorm(z, f"dec_ln2_g_{l}", f"dec_ln2_b_{l}")
        q = linear(y, f"dec_ca_q_w_{l}", f"dec_ca_q_b_{l}")
        kv = linear(memory, f"dec_ca_kv_w_{l}", f"dec_ca_kv_b_{l}")   # [S_SRC, 2D]
        k = kv[:, 0 * D_MODEL:1 * D_MODEL]
        v = kv[:, 1 * D_MODEL:2 * D_MODEL]
        z = z + attention(q, k, v, src_bias, f"dec_ca_wo_w_{l}", f"dec_ca_wo_b_{l}")

        # feed-forward
        y = layernorm(z, f"dec_ln3_g_{l}", f"dec_ln3_b_{l}")
        h = jnp.maximum(linear(y, f"dec_ff1_w_{l}", f"dec_ff1_b_{l}"), 0.0)
        z = z + linear(h, f"dec_ff2_w_{l}", f"dec_ff2_b_{l}")

    o_ref[...] = layernorm(z, "dec_norm_g", "dec_norm_b")

# =========================== parameter initialization ==========================

def make_positional_encoding(max_len, d_model):
    pos = jnp.arange(max_len, dtype=jnp.float32)[:, None]
    div = jnp.exp(jnp.arange(0, d_model, 2, dtype=jnp.float32)
                  * (-math.log(10000.0) / d_model))
    pe = jnp.zeros((max_len, d_model), jnp.float32)
    pe = pe.at[:, 0::2].set(jnp.sin(pos * div))
    pe = pe.at[:, 1::2].set(jnp.cos(pos * div))
    return pe


def init_params(key):
    keys = iter(jax.random.split(key, 256))

    def linear_wb(din, dout):
        w = jax.random.normal(next(keys), (din, dout), jnp.float32) * (1.0 / math.sqrt(din))
        b = jax.random.normal(next(keys), (dout,), jnp.float32) * 0.01
        return w, b.reshape(1, dout)

    def stacked_linear(din, dout):
        ws, bs = zip(*[linear_wb(din, dout) for _ in range(N_LAYERS)])
        return jnp.stack(ws), jnp.stack(bs)

    def stacked_ln():
        return (jnp.ones((N_LAYERS, 1, D_MODEL), jnp.float32),
                jnp.zeros((N_LAYERS, 1, D_MODEL), jnp.float32))

    p = {}
    p["src_lut"] = jax.random.normal(next(keys), (VOCAB, D_MODEL), jnp.float32) * 0.1
    p["tgt_lut"] = jax.random.normal(next(keys), (VOCAB, D_MODEL), jnp.float32) * 0.1
    p["pe"] = make_positional_encoding(max(S_SRC, S_TGT), D_MODEL)

    # encoder layers (fused QKV projection)
    p["enc_qkv_w"], p["enc_qkv_b"] = stacked_linear(D_MODEL, 3 * D_MODEL)
    p["enc_wo_w"], p["enc_wo_b"] = stacked_linear(D_MODEL, D_MODEL)
    p["enc_ff1_w"], p["enc_ff1_b"] = stacked_linear(D_MODEL, D_FF)
    p["enc_ff2_w"], p["enc_ff2_b"] = stacked_linear(D_FF, D_MODEL)
    p["enc_ln1_g"], p["enc_ln1_b"] = stacked_ln()
    p["enc_ln2_g"], p["enc_ln2_b"] = stacked_ln()

    # decoder layers (fused self-QKV, fused cross-KV)
    p["dec_sa_qkv_w"], p["dec_sa_qkv_b"] = stacked_linear(D_MODEL, 3 * D_MODEL)
    p["dec_sa_wo_w"], p["dec_sa_wo_b"] = stacked_linear(D_MODEL, D_MODEL)
    p["dec_ca_q_w"], p["dec_ca_q_b"] = stacked_linear(D_MODEL, D_MODEL)
    p["dec_ca_kv_w"], p["dec_ca_kv_b"] = stacked_linear(D_MODEL, 2 * D_MODEL)
    p["dec_ca_wo_w"], p["dec_ca_wo_b"] = stacked_linear(D_MODEL, D_MODEL)
    p["dec_ff1_w"], p["dec_ff1_b"] = stacked_linear(D_MODEL, D_FF)
    p["dec_ff2_w"], p["dec_ff2_b"] = stacked_linear(D_FF, D_MODEL)
    p["dec_ln1_g"], p["dec_ln1_b"] = stacked_ln()
    p["dec_ln2_g"], p["dec_ln2_b"] = stacked_ln()
    p["dec_ln3_g"], p["dec_ln3_b"] = stacked_ln()

    p["enc_norm_g"] = jnp.ones((1, D_MODEL), jnp.float32)
    p["enc_norm_b"] = jnp.zeros((1, D_MODEL), jnp.float32)
    p["dec_norm_g"] = jnp.ones((1, D_MODEL), jnp.float32)
    p["dec_norm_b"] = jnp.zeros((1, D_MODEL), jnp.float32)
    return p

# ================================ forward pass =================================

@jax.jit
def encoder_decoder_forward(slab, src, tgt, src_mask, tgt_mask):
    """Mirror of EncoderDecoder.forward: decode(encode(src, src_mask), ...)."""
    src_ids = src.reshape(B * S_SRC, 1).astype(jnp.int32)
    tgt_ids = tgt.reshape(B * S_TGT, 1).astype(jnp.int32)
    # additive attention biases precomputed once (0 = keep, -1e9 = masked)
    src_bias = (src_mask.astype(jnp.float32) - 1.0) * 1e9      # [B, 1, S_SRC]
    tgt_bias = (tgt_mask.astype(jnp.float32) - 1.0) * 1e9      # [B, S_TGT, S_TGT]

    out = pl.pallas_call(
        _encdec_kernel,
        out_shape=jax.ShapeDtypeStruct((B * S_TGT, D_MODEL), jnp.float32),
        grid=(B,),
        in_specs=[
            pl.BlockSpec((S_SRC, 1), lambda i: (i, 0)),              # src ids
            pl.BlockSpec((S_TGT, 1), lambda i: (i, 0)),              # tgt ids
            pl.BlockSpec((1, 1, S_SRC), lambda i: (i, 0, 0)),        # src bias
            pl.BlockSpec((1, S_TGT, S_TGT), lambda i: (i, 0, 0)),    # tgt bias
            pl.BlockSpec((SLAB_ROWS, SLAB_LANES), lambda i: (0, 0)), # param slab (resident)
        ],
        out_specs=pl.BlockSpec((S_TGT, D_MODEL), lambda i: (i, 0)),
        compiler_params=pltpu.CompilerParams(
            dimension_semantics=("parallel",)),
        cost_estimate=pl.CostEstimate(
            flops=2_000_000, transcendentals=4_000,
            bytes_accessed=SLAB_ROWS * SLAB_LANES * 4 + 8_192),
    )(src_ids, tgt_ids, src_bias, tgt_bias, slab)
    return out.reshape(B, S_TGT, D_MODEL)

# ========================= pure-JAX reference (sanity) =========================

def _embed_ref(tokens, lut, pe, seq_len):
    x = lut[tokens] * math.sqrt(D_MODEL)
    return x + pe[:seq_len][None, :, :]


def _reference_forward(params, src, tgt, src_mask, tgt_mask):
    def ln(x, g, b):
        mean = jnp.mean(x, -1, keepdims=True)
        var = jnp.sum((x - mean) ** 2, -1, keepdims=True) / float(x.shape[-1] - 1)
        return g * (x - mean) / (jnp.sqrt(var) + LN_EPS) + b

    def lin(x, w, b):
        return x @ w + b

    def attn(q, k, v, mask):
        Bq, Sq, _ = q.shape
        Sk = k.shape[1]
        qh = q.reshape(Bq, Sq, N_HEADS, D_HEAD).transpose(0, 2, 1, 3)
        kh = k.reshape(Bq, Sk, N_HEADS, D_HEAD).transpose(0, 2, 1, 3)
        vh = v.reshape(Bq, Sk, N_HEADS, D_HEAD).transpose(0, 2, 1, 3)
        s = jnp.einsum("bhqd,bhkd->bhqk", qh, kh) / math.sqrt(D_HEAD)
        s = jnp.where(mask[:, None] > 0.5, s, -1e9)
        pr = jax.nn.softmax(s, axis=-1)
        o = jnp.einsum("bhqk,bhkd->bhqd", pr, vh)
        return o.transpose(0, 2, 1, 3).reshape(Bq, Sq, D_MODEL)

    x = _embed_ref(src, params["src_lut"], params["pe"], S_SRC)
    for l in range(N_LAYERS):
        y = ln(x, params["enc_ln1_g"][l], params["enc_ln1_b"][l])
        q, k, v = jnp.split(lin(y, params["enc_qkv_w"][l], params["enc_qkv_b"][l]), 3, -1)
        x = x + lin(attn(q, k, v, src_mask), params["enc_wo_w"][l], params["enc_wo_b"][l])
        y = ln(x, params["enc_ln2_g"][l], params["enc_ln2_b"][l])
        h = jnp.maximum(lin(y, params["enc_ff1_w"][l], params["enc_ff1_b"][l]), 0.0)
        x = x + lin(h, params["enc_ff2_w"][l], params["enc_ff2_b"][l])
    memory = ln(x, params["enc_norm_g"], params["enc_norm_b"])

    z = _embed_ref(tgt, params["tgt_lut"], params["pe"], S_TGT)
    for l in range(N_LAYERS):
        y = ln(z, params["dec_ln1_g"][l], params["dec_ln1_b"][l])
        q, k, v = jnp.split(lin(y, params["dec_sa_qkv_w"][l], params["dec_sa_qkv_b"][l]), 3, -1)
        z = z + lin(attn(q, k, v, tgt_mask), params["dec_sa_wo_w"][l], params["dec_sa_wo_b"][l])
        y = ln(z, params["dec_ln2_g"][l], params["dec_ln2_b"][l])
        q = lin(y, params["dec_ca_q_w"][l], params["dec_ca_q_b"][l])
        k, v = jnp.split(lin(memory, params["dec_ca_kv_w"][l], params["dec_ca_kv_b"][l]), 2, -1)
        z = z + lin(attn(q, k, v, src_mask), params["dec_ca_wo_w"][l], params["dec_ca_wo_b"][l])
        y = ln(z, params["dec_ln3_g"][l], params["dec_ln3_b"][l])
        h = jnp.maximum(lin(y, params["dec_ff1_w"][l], params["dec_ff1_b"][l]), 0.0)
        z = z + lin(h, params["dec_ff2_w"][l], params["dec_ff2_b"][l])
    return ln(z, params["dec_norm_g"], params["dec_norm_b"])

# ==================================== main =====================================

if __name__ == "__main__":
    key = jax.random.PRNGKey(0)
    kp, ks, kt = jax.random.split(key, 3)
    params = init_params(kp)
    slab = pack_params(params)          # one lane-dense [SLAB_ROWS, 128] f32 slab

    src = jax.random.randint(ks, (B, S_SRC), 1, VOCAB)
    tgt = jax.random.randint(kt, (B, S_TGT), 1, VOCAB)

    # src_mask masks padding (all-ones here), shape [B, 1, S_src]
    src_mask = jnp.ones((B, 1, S_SRC), jnp.float32)
    # tgt_mask = pad mask & subsequent (causal) mask, shape [B, S_tgt, S_tgt]
    subsequent = jnp.tril(jnp.ones((S_TGT, S_TGT), jnp.float32))
    tgt_mask = jnp.broadcast_to(subsequent[None, :, :], (B, S_TGT, S_TGT))

    out = encoder_decoder_forward(slab, src, tgt, src_mask, tgt_mask)
    out = jax.block_until_ready(out)

    assert out.shape == (B, S_TGT, D_MODEL), out.shape
    assert bool(jnp.all(jnp.isfinite(out)))

    # sanity check against a pure-JAX reference (exact softmax divide in-kernel
    # -> tight tolerance now)
    ref = _reference_forward(params, src, tgt, src_mask, tgt_mask)
    err = float(jnp.max(jnp.abs(out - ref)))
    assert err < 2e-3, err

    print("KERNEL_OK")
</pallas_src>

<mosaic_0001>
module attributes {stable_mosaic.version = 11 : i64} {
  func.func @_encdec_kernel(%arg0: i32, %arg1: memref<8x1xi32, #tpu.memory_space<vmem>>, %arg2: memref<8x1xi32, #tpu.memory_space<vmem>>, %arg3: memref<1x1x8xf32, #tpu.memory_space<vmem>>, %arg4: memref<1x8x8xf32, #tpu.memory_space<vmem>>, %arg5: memref<1240x128xf32, #tpu.memory_space<vmem>>, %arg6: memref<8x32xf32, #tpu.memory_space<vmem>>) attributes {dimension_semantics = [#tpu.dimension_semantics<parallel>], iteration_bounds = array<i64: 2>, scalar_prefetch = 0 : i64, scratch_operands = 0 : i64, tpu.core_type = #tpu.core_type<tc>, window_params = [{transform_indices = @transform_0, window_bounds = array<i64: 8, 1>}, {transform_indices = @transform_1, window_bounds = array<i64: 8, 1>}, {transform_indices = @transform_2, window_bounds = array<i64: 1, 1, 8>}, {transform_indices = @transform_3, window_bounds = array<i64: 1, 8, 8>}, {pipeline_mode = #tpu.pipeline_mode<synchronous>, transform_indices = @transform_4, window_bounds = array<i64: 1240, 128>}, {transform_indices = @transform_5, window_bounds = array<i64: 8, 32>}]} {
    %c0 = arith.constant 0 : index
    %c0_0 = arith.constant 0 : index
    %c0_1 = arith.constant 0 : index
    %0 = vector.load %arg3[%c0, %c0_0, %c0_1] : memref<1x1x8xf32, #tpu.memory_space<vmem>>, vector<1x1x8xf32>
    %1 = vector.shape_cast %0 : vector<1x1x8xf32> to vector<1x8xf32>
    %c0_2 = arith.constant 0 : index
    %c0_3 = arith.constant 0 : index
    %c0_4 = arith.constant 0 : index
    %2 = vector.load %arg4[%c0_2, %c0_3, %c0_4] : memref<1x8x8xf32, #tpu.memory_space<vmem>>, vector<1x8x8xf32>
    %3 = vector.shape_cast %2 : vector<1x8x8xf32> to vector<8x8xf32>
    %c0_5 = arith.constant 0 : index
    %c0_6 = arith.constant 0 : index
    %4 = vector.load %arg1[%c0_5, %c0_6] : memref<8x1xi32, #tpu.memory_space<vmem>>, vector<8x1xi32>
    %5 = tpu.iota {dimensions = array<i32: 1>} : vector<8x16xi32>
    %6 = vector.broadcast %4 : vector<8x1xi32> to vector<8x16xi32>
    %7 = arith.cmpi eq, %6, %5 : vector<8x16xi32>
    %8 = arith.extui %7 : vector<8x16xi1> to vector<8x16xi32>
    %9 = arith.sitofp %8 : vector<8x16xi32> to vector<8x16xf32>
    %c1200 = arith.constant 1200 : index
    %c0_7 = arith.constant 0 : index
    %10 = vector.load %arg5[%c1200, %c0_7] : memref<1240x128xf32, #tpu.memory_space<vmem>>, vector<16x32xf32>
    %cst = arith.constant dense<0.000000e+00> : vector<8x32xf32>
    %11 = tpu.matmul %9, %10, %cst {dimension_numbers = #tpu.dot_dimension_numbers<[1], [0], [0], [1], [0, 0, 1, 1], [], []>} : vector<8x16xf32>, vector<16x32xf32>, vector<8x32xf32> -> vector<8x32xf32>
    %cst_8 = arith.constant 5.65685415 : f32
    %12 = vector.broadcast %cst_8 : f32 to vector<8x32xf32>
    %13 = arith.mulf %11, %12 : vector<8x32xf32>
    %c1232 = arith.constant 1232 : index
    %c0_9 = arith.constant 0 : index
    %14 = vector.load %arg5[%c1232, %c0_9] : memref<1240x128xf32, #tpu.memory_space<vmem>>, vector<8x32xf32>
    %15 = arith.addf %13, %14 : vector<8x32xf32>
    %cst_10 = arith.constant dense<0.000000e+00> : vector<8xf32>
    %16 = vector.multi_reduction <add>, %15, %cst_10 [1] : vector<8x32xf32> to vector<8xf32>
    %17 = vector.shape_cast %16 : vector<8xf32> to vector<8x1xf32>
    %cst_11 = arith.constant 3.200000e+01 : f32
    %18 = vector.broadcast %cst_11 : f32 to vector<8x1xf32>
    %19 = arith.divf %17, %18 : vector<8x1xf32>
    %20 = vector.broadcast %19 : vector<8x1xf32> to vector<8x32xf32>
    %21 = arith.subf %15, %20 : vector<8x32xf32>
    %22 = arith.mulf %21, %21 : vector<8x32xf32>
    %cst_12 = arith.constant dense<0.000000e+00> : vector<8xf32>
    %23 = vector.multi_reduction <add>, %22, %cst_12 [1] : vector<8x32xf32> to vector<8xf32>
    %24 = vector.shape_cast %23 : vector<8xf32> to vector<8x1xf32>
    %cst_13 = arith.constant 3.100000e+01 : f32
    %25 = vector.broadcast %cst_13 : f32 to vector<8x1xf32>
    %26 = arith.divf %24, %25 : vector<8x1xf32>
    %c192 = arith.constant 192 : index
    %c0_14 = arith.constant 0 : index
    %27 = vector.load %arg5[%c192, %c0_14] : memref<1240x128xf32, #tpu.memory_space<vmem>>, vector<1x32xf32>
    %28 = vector.broadcast %19 : vector<8x1xf32> to vector<8x32xf32>
    %29 = arith.subf %15, %28 : vector<8x32xf32>
    %30 = vector.broadcast %27 : vector<1x32xf32> to vector<8x32xf32>
    %31 = arith.mulf %30, %29 : vector<8x32xf32>
    %32 = math.sqrt %26 : vector<8x1xf32>
    %cst_15 = arith.constant 9.99999997E-7 : f32
    %33 = vector.broadcast %cst_15 : f32 to vector<8x1xf32>
    %34 = arith.addf %32, %33 : vector<8x1xf32>
    %35 = vector.broadcast %34 : vector<8x1xf32> to vector<8x32xf32>
    %36 = arith.divf %31, %35 : vector<8x32xf32>
    %c200 = arith.constant 200 : index
    %c0_16 = arith.constant 0 : index
    %37 = vector.load %arg5[%c200, %c0_16] : memref<1240x128xf32, #tpu.memory_space<vmem>>, vector<1x32xf32>
    %38 = vector.broadcast %37 : vector<1x32xf32> to vector<8x32xf32>
    %39 = arith.addf %36, %38 : vector<8x32xf32>
    %c0_17 = arith.constant 0 : index
    %c0_18 = arith.constant 0 : index
    %40 = vector.load %arg5[%c0_17, %c0_18] : memref<1240x128xf32, #tpu.memory_space<vmem>>, vector<32x96xf32>
    %cst_19 = arith.constant dense<0.000000e+00> : vector<8x96xf32>
    %41 = tpu.matmul %39, %40, %cst_19 {dimension_numbers = #tpu.dot_dimension_numbers<[1], [0], [0], [1], [0, 0, 1, 1], [], []>} : vector<8x32xf32>, vector<32x96xf32>, vector<8x96xf32> -> vector<8x96xf32>
    %c32 = arith.constant 32 : index
    %c0_20 = arith.constant 0 : index
    %42 = vector.load %arg5[%c32, %c0_20] : memref<1240x128xf32, #tpu.memory_space<vmem>>, vector<1x96xf32>
    %43 = vector.broadcast %42 : vector<1x96xf32> to vector<8x96xf32>
    %44 = arith.addf %41, %43 : vector<8x96xf32>
    %45 = vector.extract_strided_slice %44 {offsets = [0, 0], sizes = [8, 32], strides = [1, 1]} : vector<8x96xf32> to vector<8x32xf32>
    %46 = vector.extract_strided_slice %44 {offsets = [0, 32], sizes = [8, 32], strides = [1, 1]} : vector<8x96xf32> to vector<8x32xf32>
    %47 = vector.extract_strided_slice %44 {offsets = [0, 64], sizes = [8, 32], strides = [1, 1]} : vector<8x96xf32> to vector<8x32xf32>
    %c40 = arith.constant 40 : index
    %c0_21 = arith.constant 0 : index
    %48 = vector.load %arg5[%c40, %c0_21] : memref<1240x128xf32, #tpu.memory_space<vmem>>, vector<32x32xf32>
    %49 = vector.extract_strided_slice %45 {offsets = [0, 0], sizes = [8, 8], strides = [1, 1]} : vector<8x32xf32> to vector<8x8xf32>
    %50 = vector.extract_strided_slice %46 {offsets = [0, 0], sizes = [8, 8], strides = [1, 1]} : vector<8x32xf32> to vector<8x8xf32>
    %cst_22 = arith.constant dense<0.000000e+00> : vector<8x8xf32>
    %51 = tpu.matmul %49, %50, %cst_22 {dimension_numbers = #tpu.dot_dimension_numbers<[1], [1], [0], [0], [0, 0, 1, 0], [], []>} : vector<8x8xf32>, vector<8x8xf32>, vector<8x8xf32> -> vector<8x8xf32>
    %cst_23 = arith.constant 0.353553385 : f32
    %52 = vector.broadcast %cst_23 : f32 to vector<8x8xf32>
    %53 = arith.mulf %51, %52 : vector<8x8xf32>
    %54 = vector.broadcast %1 : vector<1x8xf32> to vector<8x8xf32>
    %55 = arith.addf %53, %54 : vector<8x8xf32>
    %cst_24 = arith.constant dense<0xFF800000> : vector<8xf32>
    %56 = vector.multi_reduction <maximumf>, %55, %cst_24 [1] : vector<8x8xf32> to vector<8xf32>
    %57 = vector.shape_cast %56 : vector<8xf32> to vector<8x1xf32>
    %58 = vector.broadcast %57 : vector<8x1xf32> to vector<8x8xf32>
    %59 = arith.subf %55, %58 : vector<8x8xf32>
    %60 = math.exp %59 : vector<8x8xf32>
    %cst_25 = arith.constant dense<0.000000e+00> : vector<8xf32>
    %61 = vector.multi_reduction <add>, %60, %cst_25 [1] : vector<8x8xf32> to vector<8xf32>
    %62 = vector.shape_cast %61 : vector<8xf32> to vector<8x1xf32>
    %63 = vector.broadcast %62 : vector<8x1xf32> to vector<8x8xf32>
    %64 = arith.divf %60, %63 : vector<8x8xf32>
    %65 = vector.extract_strided_slice %47 {offsets = [0, 0], sizes = [8, 8], strides = [1, 1]} : vector<8x32xf32> to vector<8x8xf32>
    %cst_26 = arith.constant dense<0.000000e+00> : vector<8x8xf32>
    %66 = tpu.matmul %64, %65, %cst_26 {dimension_numbers = #tpu.dot_dimension_numbers<[1], [0], [0], [1], [0, 0, 1, 1], [], []>} : vector<8x8xf32>, vector<8x8xf32>, vector<8x8xf32> -> vector<8x8xf32>
    %67 = vector.extract_strided_slice %48 {offsets = [0, 0], sizes = [8, 32], strides = [1, 1]} : vector<32x32xf32> to vector<8x32xf32>
    %cst_27 = arith.constant dense<0.000000e+00> : vector<8x32xf32>
    %68 = tpu.matmul %66, %67, %cst_27 {dimension_numbers = #tpu.dot_dimension_numbers<[1], [0], [0], [1], [0, 0, 1, 1], [], []>} : vector<8x8xf32>, vector<8x32xf32>, vector<8x32xf32> -> vector<8x32xf32>
    %69 = vector.extract_strided_slice %45 {offsets = [0, 8], sizes = [8, 8], strides = [1, 1]} : vector<8x32xf32> to vector<8x8xf32>
    %70 = vector.extract_strided_slice %46 {offsets = [0, 8], sizes = [8, 8], strides = [1, 1]} : vector<8x32xf32> to vector<8x8xf32>
    %cst_28 = arith.constant dense<0.000000e+00> : vector<8x8xf32>
    %71 = tpu.matmul %69, %70, %cst_28 {dimension_numbers = #tpu.dot_dimension_numbers<[1], [1], [0], [0], [0, 0, 1, 0], [], []>} : vector<8x8xf32>, vector<8x8xf32>, vector<8x8xf32> -> vector<8x8xf32>
    %cst_29 = arith.constant 0.353553385 : f32
    %72 = vector.broadcast %cst_29 : f32 to vector<8x8xf32>
    %73 = arith.mulf %71, %72 : vector<8x8xf32>
    %74 = vector.broadcast %1 : vector<1x8xf32> to vector<8x8xf32>
    %75 = arith.addf %73, %74 : vector<8x8xf32>
    %cst_30 = arith.constant dense<0xFF800000> : vector<8xf32>
    %76 = vector.multi_reduction <maximumf>, %75, %cst_30 [1] : vector<8x8xf32> to vector<8xf32>
    %77 = vector.shape_cast %76 : vector<8xf32> to vector<8x1xf32>
    %78 = vector.broadcast %77 : vector<8x1xf32> to vector<8x8xf32>
    %79 = arith.subf %75, %78 : vector<8x8xf32>
    %80 = math.exp %79 : vector<8x8xf32>
    %cst_31 = arith.constant dense<0.000000e+00> : vector<8xf32>
    %81 = vector.multi_reduction <add>, %80, %cst_31 [1] : vector<8x8xf32> to vector<8xf32>
    %82 = vector.shape_cast %81 : vector<8xf32> to vector<8x1xf32>
    %83 = vector.broadcast %82 : vector<8x1xf32> to vector<8x8xf32>
    %84 = arith.divf %80, %83 : vector<8x8xf32>
    %85 = vector.extract_strided_slice %47 {offsets = [0, 8], sizes = [8, 8], strides = [1, 1]} : vector<8x32xf32> to vector<8x8xf32>
    %cst_32 = arith.constant dense<0.000000e+00> : vector<8x8xf32>
    %86 = tpu.matmul %84, %85, %cst_32 {dimension_numbers = #tpu.dot_dimension_numbers<[1], [0], [0], [1], [0, 0, 1, 1], [], []>} : vector<8x8xf32>, vector<8x8xf32>, vector<8x8xf32> -> vector<8x8xf32>
    %87 = vector.extract_strided_slice %48 {offsets = [8, 0], sizes = [8, 32], strides = [1, 1]} : vector<32x32xf32> to vector<8x32xf32>
    %cst_33 = arith.constant dense<0.000000e+00> : vector<8x32xf32>
    %88 = tpu.matmul %86, %87, %cst_33 {dimension_numbers = #tpu.dot_dimension_numbers<[1], [0], [0], [1], [0, 0, 1, 1], [], []>} : vector<8x8xf32>, vector<8x32xf32>, vector<8x32xf32> -> vector<8x32xf32>
    %89 = arith.addf %68, %88 : vector<8x32xf32>
    %90 = vector.extract_strided_slice %45 {offsets = [0, 16], sizes = [8, 8], strides = [1, 1]} : vector<8x32xf32> to vector<8x8xf32>
    %91 = vector.extract_strided_slice %46 {offsets = [0, 16], sizes = [8, 8], strides = [1, 1]} : vector<8x32xf32> to vector<8x8xf32>
    %cst_34 = arith.constant dense<0.000000e+00> : vector<8x8xf32>
    %92 = tpu.matmul %90, %91, %cst_34 {dimension_numbers = #tpu.dot_dimension_numbers<[1], [1], [0], [0], [0, 0, 1, 0], [], []>} : vector<8x8xf32>, vector<8x8xf32>, vector<8x8xf32> -> vector<8x8xf32>
    %cst_35 = arith.constant 0.353553385 : f32
    %93 = vector.broadcast %cst_35 : f32 to vector<8x8xf32>
    %94 = arith.mulf %92, %93 : vector<8x8xf32>
    %95 = vector.broadcast %1 : vector<1x8xf32> to vector<8x8xf32>
    %96 = arith.addf %94, %95 : vector<8x8xf32>
    %cst_36 = arith.constant dense<0xFF800000> : vector<8xf32>
    %97 = vector.multi_reduction <maximumf>, %96, %cst_36 [1] : vector<8x8xf32> to vector<8xf32>
    %98 = vector.shape_cast %97 : vector<8xf32> to vector<8x1xf32>
    %99 = vector.broadcast %98 : vector<8x1xf32> to vector<8x8xf32>
    %100 = arith.subf %96, %99 : vector<8x8xf32>
    %101 = math.exp %100 : vector<8x8xf32>
    %cst_37 = arith.constant dense<0.000000e+00> : vector<8xf32>
    %102 = vector.multi_reduction <add>, %101, %cst_37 [1] : vector<8x8xf32> to vector<8xf32>
    %103 = vector.shape_cast %102 : vector<8xf32> to vector<8x1xf32>
    %104 = vector.broadcast %103 : vector<8x1xf32> to vector<8x8xf32>
    %105 = arith.divf %101, %104 : vector<8x8xf32>
    %106 = vector.extract_strided_slice %47 {offsets = [0, 16], sizes = [8, 8], strides = [1, 1]} : vector<8x32xf32> to vector<8x8xf32>
    %cst_38 = arith.constant dense<0.000000e+00> : vector<8x8xf32>
    %107 = tpu.matmul %105, %106, %cst_38 {dimension_numbers = #tpu.dot_dimension_numbers<[1], [0], [0], [1], [0, 0, 1, 1], [], []>} : vector<8x8xf32>, vector<8x8xf32>, vector<8x8xf32> -> vector<8x8xf32>
    %108 = vector.extract_strided_slice %48 {offsets = [16, 0], sizes = [8, 32], strides = [1, 1]} : vector<32x32xf32> to vector<8x32xf32>
    %cst_39 = arith.constant dense<0.000000e+00> : vector<8x32xf32>
    %109 = tpu.matmul %107, %108, %cst_39 {dimension_numbers = #tpu.dot_dimension_numbers<[1], [0], [0], [1], [0, 0, 1, 1], [], []>} : vector<8x8xf32>, vector<8x32xf32>, vector<8x32xf32> -> vector<8x32xf32>
    %110 = arith.addf %89, %109 : vector<8x32xf32>
    %111 = vector.extract_strided_slice %45 {offsets = [0, 24], sizes = [8, 8], strides = [1, 1]} : vector<8x32xf32> to vector<8x8xf32>
    %112 = vector.extract_strided_slice %46 {offsets = [0, 24], sizes = [8, 8], strides = [1, 1]} : vector<8x32xf32> to vector<8x8xf32>
    %cst_40 = arith.constant dense<0.000000e+00> : vector<8x8xf32>
    %113 = tpu.matmul %111, %112, %cst_40 {dimension_numbers = #tpu.dot_dimension_numbers<[1], [1], [0], [0], [0, 0, 1, 0], [], []>} : vector<8x8xf32>, vector<8x8xf32>, vector<8x8xf32> -> vector<8x8xf32>
    %cst_41 = arith.constant 0.353553385 : f32
    %114 = vector.broadcast %cst_41 : f32 to vector<8x8xf32>
    %115 = arith.mulf %113, %114 : vector<8x8xf32>
    %116 = vector.broadcast %1 : vector<1x8xf32> to vector<8x8xf32>
    %117 = arith.addf %115, %116 : vector<8x8xf32>
    %cst_42 = arith.constant dense<0xFF800000> : vector<8xf32>
    %118 = vector.multi_reduction <maximumf>, %117, %cst_42 [1] : vector<8x8xf32> to vector<8xf32>
    %119 = vector.shape_cast %118 : vector<8xf32> to vector<8x1xf32>
    %120 = vector.broadcast %119 : vector<8x1xf32> to vector<8x8xf32>
    %121 = arith.subf %117, %120 : vector<8x8xf32>
    %122 = math.exp %121 : vector<8x8xf32>
    %cst_43 = arith.constant dense<0.000000e+00> : vector<8xf32>
    %123 = vector.multi_reduction <add>, %122, %cst_43 [1] : vector<8x8xf32> to vector<8xf32>
    %124 = vector.shape_cast %123 : vector<8xf32> to vector<8x1xf32>
    %125 = vector.broadcast %124 : vector<8x1xf32> to vector<8x8xf32>
    %126 = arith.divf %122, %125 : vector<8x8xf32>
    %127 = vector.extract_strided_slice %47 {offsets = [0, 24], sizes = [8, 8], strides = [1, 1]} : vector<8x32xf32> to vector<8x8xf32>
    %cst_44 = arith.constant dense<0.000000e+00> : vector<8x8xf32>
    %128 = tpu.matmul %126, %127, %cst_44 {dimension_numbers = #tpu.dot_dimension_numbers<[1], [0], [0], [1], [0, 0, 1, 1], [], []>} : vector<8x8xf32>, vector<8x8xf32>, vector<8x8xf32> -> vector<8x8xf32>
    %129 = vector.extract_strided_slice %48 {offsets = [24, 0], sizes = [8, 32], strides = [1, 1]} : vector<32x32xf32> to vector<8x32xf32>
    %cst_45 = arith.constant dense<0.000000e+00> : vector<8x32xf32>
    %130 = tpu.matmul %128, %129, %cst_45 {dimension_numbers = #tpu.dot_dimension_numbers<[1], [0], [0], [1], [0, 0, 1, 1], [], []>} : vector<8x8xf32>, vector<8x32xf32>, vector<8x32xf32> -> vector<8x32xf32>
    %131 = arith.addf %110, %130 : vector<8x32xf32>
    %c72 = arith.constant 72 : index
    %c0_46 = arith.constant 0 : index
    %132 = vector.load %arg5[%c72, %c0_46] : memref<1240x128xf32, #tpu.memory_space<vmem>>, vector<1x32xf32>
    %133 = vector.broadcast %132 : vector<1x32xf32> to vector<8x32xf32>
    %134 = arith.addf %131, %133 : vector<8x32xf32>
    %135 = arith.addf %15, %134 : vector<8x32xf32>
    %cst_47 = arith.constant dense<0.000000e+00> : vector<8xf32>
    %136 = vector.multi_reduction <add>, %135, %cst_47 [1] : vector<8x32xf32> to vector<8xf32>
    %137 = vector.shape_cast %136 : vector<8xf32> to vector<8x1xf32>
    %cst_48 = arith.constant 3.200000e+01 : f32
    %138 = vector.broadcast %cst_48 : f32 to vector<8x1xf32>
    %139 = arith.divf %137, %138 : vector<8x1xf32>
    %140 = vector.broadcast %139 : vector<8x1xf32> to vector<8x32xf32>
    %141 = arith.subf %135, %140 : vector<8x32xf32>
    %142 = arith.mulf %141, %141 : vector<8x32xf32>
    %cst_49 = arith.constant dense<0.000000e+00> : vector<8xf32>
    %143 = vector.multi_reduction <add>, %142, %cst_49 [1] : vector<8x32xf32> to vector<8xf32>
    %144 = vector.shape_cast %143 : vector<8xf32> to vector<8x1xf32>
    %cst_50 = arith.constant 3.100000e+01 : f32
    %145 = vector.broadcast %cst_50 : f32 to vector<8x1xf32>
    %146 = arith.divf %144, %145 : vector<8x1xf32>
    %c208 = arith.constant 208 : index
    %c0_51 = arith.constant 0 : index
    %147 = vector.load %arg5[%c208, %c0_51] : memref<1240x128xf32, #tpu.memory_space<vmem>>, vector<1x32xf32>
    %148 = vector.broadcast %139 : vector<8x1xf32> to vector<8x32xf32>
    %149 = arith.subf %135, %148 : vector<8x32xf32>
    %150 = vector.broadcast %147 : vector<1x32xf32> to vector<8x32xf32>
    %151 = arith.mulf %150, %149 : vector<8x32xf32>
    %152 = math.sqrt %146 : vector<8x1xf32>
    %cst_52 = arith.constant 9.99999997E-7 : f32
    %153 = vector.broadcast %cst_52 : f32 to vector<8x1xf32>
    %154 = arith.addf %152, %153 : vector<8x1xf32>
    %155 = vector.broadcast %154 : vector<8x1xf32> to vector<8x32xf32>
    %156 = arith.divf %151, %155 : vector<8x32xf32>
    %c216 = arith.constant 216 : index
    %c0_53 = arith.constant 0 : index
    %157 = vector.load %arg5[%c216, %c0_53] : memref<1240x128xf32, #tpu.memory_space<vmem>>, vector<1x32xf32>
    %158 = vector.broadcast %157 : vector<1x32xf32> to vector<8x32xf32>
    %159 = arith.addf %156, %158 : vector<8x32xf32>
    %c80 = arith.constant 80 : index
    %c0_54 = arith.constant 0 : index
    %160 = vector.load %arg5[%c80, %c0_54] : memref<1240x128xf32, #tpu.memory_space<vmem>>, vector<32x64xf32>
    %cst_55 = arith.constant dense<0.000000e+00> : vector<8x64xf32>
    %161 = tpu.matmul %159, %160, %cst_55 {dimension_numbers = #tpu.dot_dimension_numbers<[1], [0], [0], [1], [0, 0, 1, 1], [], []>} : vector<8x32xf32>, vector<32x64xf32>, vector<8x64xf32> -> vector<8x64xf32>
    %c112 = arith.constant 112 : index
    %c0_56 = arith.constant 0 : index
    %162 = vector.load %arg5[%c112, %c0_56] : memref<1240x128xf32, #tpu.memory_space<vmem>>, vector<1x64xf32>
    %163 = vector.broadcast %162 : vector<1x64xf32> to vector<8x64xf32>
    %164 = arith.addf %161, %163 : vector<8x64xf32>
    %cst_57 = arith.constant 0.000000e+00 : f32
    %165 = vector.broadcast %cst_57 : f32 to vector<8x64xf32>
    %166 = arith.maximumf %164, %165 : vector<8x64xf32>
    %c120 = arith.constant 120 : index
    %c0_58 = arith.constant 0 : index
    %167 = vector.load %arg5[%c120, %c0_58] : memref<1240x128xf32, #tpu.memory_space<vmem>>, vector<64x32xf32>
    %cst_59 = arith.constant dense<0.000000e+00> : vector<8x32xf32>
    %168 = tpu.matmul %166, %167, %cst_59 {dimension_numbers = #tpu.dot_dimension_numbers<[1], [0], [0], [1], [0, 0, 1, 1], [], []>} : vector<8x64xf32>, vector<64x32xf32>, vector<8x32xf32> -> vector<8x32xf32>
    %c184 = arith.constant 184 : index
    %c0_60 = arith.constant 0 : index
    %169 = vector.load %arg5[%c184, %c0_60] : memref<1240x128xf32, #tpu.memory_space<vmem>>, vector<1x32xf32>
    %170 = vector.broadcast %169 : vector<1x32xf32> to vector<8x32xf32>
    %171 = arith.addf %168, %170 : vector<8x32xf32>
    %172 = arith.addf %135, %171 : vector<8x32xf32>
    %cst_61 = arith.constant dense<0.000000e+00> : vector<8xf32>
    %173 = vector.multi_reduction <add>, %172, %cst_61 [1] : vector<8x32xf32> to vector<8xf32>
    %174 = vector.shape_cast %173 : vector<8xf32> to vector<8x1xf32>
    %cst_62 = arith.constant 3.200000e+01 : f32
    %175 = vector.broadcast %cst_62 : f32 to vector<8x1xf32>
    %176 = arith.divf %174, %175 : vector<8x1xf32>
    %177 = vector.broadcast %176 : vector<8x1xf32> to vector<8x32xf32>
    %178 = arith.subf %172, %177 : vector<8x32xf32>
    %179 = arith.mulf %178, %178 : vector<8x32xf32>
    %cst_63 = arith.constant dense<0.000000e+00> : vector<8xf32>
    %180 = vector.multi_reduction <add>, %179, %cst_63 [1] : vector<8x32xf32> to vector<8xf32>
    %181 = vector.shape_cast %180 : vector<8xf32> to vector<8x1xf32>
    %cst_64 = arith.constant 3.100000e+01 : f32
    %182 = vector.broadcast %cst_64 : f32 to vector<8x1xf32>
    %183 = arith.divf %181, %182 : vector<8x1xf32>
    %c776 = arith.constant 776 : index
    %c0_65 = arith.constant 0 : index
    %184 = vector.load %arg5[%c776, %c0_65] : memref<1240x128xf32, #tpu.memory_space<vmem>>, vector<1x32xf32>
    %185 = vector.broadcast %176 : vector<8x1xf32> to vector<8x32xf32>
    %186 = arith.subf %172, %185 : vector<8x32xf32>
    %187 = vector.broadcast %184 : vector<1x32xf32> to vector<8x32xf32>
    %188 = arith.mulf %187, %186 : vector<8x32xf32>
    %189 = math.sqrt %183 : vector<8x1xf32>
    %cst_66 = arith.constant 9.99999997E-7 : f32
    %190 = vector.broadcast %cst_66 : f32 to vector<8x1xf32>
    %191 = arith.addf %189, %190 : vector<8x1xf32>
    %192 = vector.broadcast %191 : vector<8x1xf32> to vector<8x32xf32>
    %193 = arith.divf %188, %192 : vector<8x32xf32>
    %c784 = arith.constant 784 : index
    %c0_67 = arith.constant 0 : index
    %194 = vector.load %arg5[%c784, %c0_67] : memref<1240x128xf32, #tpu.memory_space<vmem>>, vector<1x32xf32>
    %195 = vector.broadcast %194 : vector<1x32xf32> to vector<8x32xf32>
    %196 = arith.addf %193, %195 : vector<8x32xf32>
    %c584 = arith.constant 584 : index
    %c0_68 = arith.constant 0 : index
    %197 = vector.load %arg5[%c584, %c0_68] : memref<1240x128xf32, #tpu.memory_space<vmem>>, vector<32x96xf32>
    %cst_69 = arith.constant dense<0.000000e+00> : vector<8x96xf32>
    %198 = tpu.matmul %196, %197, %cst_69 {dimension_numbers = #tpu.dot_dimension_numbers<[1], [0], [0], [1], [0, 0, 1, 1], [], []>} : vector<8x32xf32>, vector<32x96xf32>, vector<8x96xf32> -> vector<8x96xf32>
    %c616 = arith.constant 616 : index
    %c0_70 = arith.constant 0 : index
    %199 = vector.load %arg5[%c616, %c0_70] : memref<1240x128xf32, #tpu.memory_space<vmem>>, vector<1x96xf32>
    %200 = vector.broadcast %199 : vector<1x96xf32> to vector<8x96xf32>
    %201 = arith.addf %198, %200 : vector<8x96xf32>
    %202 = vector.extract_strided_slice %201 {offsets = [0, 0], sizes = [8, 32], strides = [1, 1]} : vector<8x96xf32> to vector<8x32xf32>
    %203 = vector.extract_strided_slice %201 {offsets = [0, 32], sizes = [8, 32], strides = [1, 1]} : vector<8x96xf32> to vector<8x32xf32>
    %204 = vector.extract_strided_slice %201 {offsets = [0, 64], sizes = [8, 32], strides = [1, 1]} : vector<8x96xf32> to vector<8x32xf32>
    %c624 = arith.constant 624 : index
    %c0_71 = arith.constant 0 : index
    %205 = vector.load %arg5[%c624, %c0_71] : memref<1240x128xf32, #tpu.memory_space<vmem>>, vector<32x32xf32>
    %206 = vector.extract_strided_slice %202 {offsets = [0, 0], sizes = [8, 8], strides = [1, 1]} : vector<8x32xf32> to vector<8x8xf32>
    %207 = vector.extract_strided_slice %203 {offsets = [0, 0], sizes = [8, 8], strides = [1, 1]} : vector<8x32xf32> to vector<8x8xf32>
    %cst_72 = arith.constant dense<0.000000e+00> : vector<8x8xf32>
    %208 = tpu.matmul %206, %207, %cst_72 {dimension_numbers = #tpu.dot_dimension_numbers<[1], [1], [0], [0], [0, 0, 1, 0], [], []>} : vector<8x8xf32>, vector<8x8xf32>, vector<8x8xf32> -> vector<8x8xf32>
    %cst_73 = arith.constant 0.353553385 : f32
    %209 = vector.broadcast %cst_73 : f32 to vector<8x8xf32>
    %210 = arith.mulf %208, %209 : vector<8x8xf32>
    %211 = vector.broadcast %1 : vector<1x8xf32> to vector<8x8xf32>
    %212 = arith.addf %210, %211 : vector<8x8xf32>
    %cst_74 = arith.constant dense<0xFF800000> : vector<8xf32>
    %213 = vector.multi_reduction <maximumf>, %212, %cst_74 [1] : vector<8x8xf32> to vector<8xf32>
    %214 = vector.shape_cast %213 : vector<8xf32> to vector<8x1xf32>
    %215 = vector.broadcast %214 : vector<8x1xf32> to vector<8x8xf32>
    %216 = arith.subf %212, %215 : vector<8x8xf32>
    %217 = math.exp %216 : vector<8x8xf32>
    %cst_75 = arith.constant dense<0.000000e+00> : vector<8xf32>
    %218 = vector.multi_reduction <add>, %217, %cst_75 [1] : vector<8x8xf32> to vector<8xf32>
    %219 = vector.shape_cast %218 : vector<8xf32> to vector<8x1xf32>
    %220 = vector.broadcast %219 : vector<8x1xf32> to vector<8x8xf32>
    %221 = arith.divf %217, %220 : vector<8x8xf32>
    %222 = vector.extract_strided_slice %204 {offsets = [0, 0], sizes = [8, 8], strides = [1, 1]} : vector<8x32xf32> to vector<8x8xf32>
    %cst_76 = arith.constant dense<0.000000e+00> : vector<8x8xf32>
    %223 = tpu.matmul %221, %222, %cst_76 {dimension_numbers = #tpu.dot_dimension_numbers<[1], [0], [0], [1], [0, 0, 1, 1], [], []>} : vector<8x8xf32>, vector<8x8xf32>, vector<8x8xf32> -> vector<8x8xf32>
    %224 = vector.extract_strided_slice %205 {offsets = [0, 0], sizes = [8, 32], strides = [1, 1]} : vector<32x32xf32> to vector<8x32xf32>
    %cst_77 = arith.constant dense<0.000000e+00> : vector<8x32xf32>
    %225 = tpu.matmul %223, %224, %cst_77 {dimension_numbers = #tpu.dot_dimension_numbers<[1], [0], [0], [1], [0, 0, 1, 1], [], []>} : vector<8x8xf32>, vector<8x32xf32>, vector<8x32xf32> -> vector<8x32xf32>
    %226 = vector.extract_strided_slice %202 {offsets = [0, 8], sizes = [8, 8], strides = [1, 1]} : vector<8x32xf32> to vector<8x8xf32>
    %227 = vector.extract_strided_slice %203 {offsets = [0, 8], sizes = [8, 8], strides = [1, 1]} : vector<8x32xf32> to vector<8x8xf32>
    %cst_78 = arith.constant dense<0.000000e+00> : vector<8x8xf32>
    %228 = tpu.matmul %226, %227, %cst_78 {dimension_numbers = #tpu.dot_dimension_numbers<[1], [1], [0], [0], [0, 0, 1, 0], [], []>} : vector<8x8xf32>, vector<8x8xf32>, vector<8x8xf32> -> vector<8x8xf32>
    %cst_79 = arith.constant 0.353553385 : f32
    %229 = vector.broadcast %cst_79 : f32 to vector<8x8xf32>
    %230 = arith.mulf %228, %229 : vector<8x8xf32>
    %231 = vector.broadcast %1 : vector<1x8xf32> to vector<8x8xf32>
    %232 = arith.addf %230, %231 : vector<8x8xf32>
    %cst_80 = arith.constant dense<0xFF800000> : vector<8xf32>
    %233 = vector.multi_reduction <maximumf>, %232, %cst_80 [1] : vector<8x8xf32> to vector<8xf32>
    %234 = vector.shape_cast %233 : vector<8xf32> to vector<8x1xf32>
    %235 = vector.broadcast %234 : vector<8x1xf32> to vector<8x8xf32>
    %236 = arith.subf %232, %235 : vector<8x8xf32>
    %237 = math.exp %236 : vector<8x8xf32>
    %cst_81 = arith.constant dense<0.000000e+00> : vector<8xf32>
    %238 = vector.multi_reduction <add>, %237, %cst_81 [1] : vector<8x8xf32> to vector<8xf32>
    %239 = vector.shape_cast %238 : vector<8xf32> to vector<8x1xf32>
    %240 = vector.broadcast %239 : vector<8x1xf32> to vector<8x8xf32>
    %241 = arith.divf %237, %240 : vector<8x8xf32>
    %242 = vector.extract_strided_slice %204 {offsets = [0, 8], sizes = [8, 8], strides = [1, 1]} : vector<8x32xf32> to vector<8x8xf32>
    %cst_82 = arith.constant dense<0.000000e+00> : vector<8x8xf32>
    %243 = tpu.matmul %241, %242, %cst_82 {dimension_numbers = #tpu.dot_dimension_numbers<[1], [0], [0], [1], [0, 0, 1, 1], [], []>} : vector<8x8xf32>, vector<8x8xf32>, vector<8x8xf32> -> vector<8x8xf32>
    %244 = vector.extract_strided_slice %205 {offsets = [8, 0], sizes = [8, 32], strides = [1, 1]} : vector<32x32xf32> to vector<8x32xf32>
    %cst_83 = arith.constant dense<0.000000e+00> : vector<8x32xf32>
    %245 = tpu.matmul %243, %244, %cst_83 {dimension_numbers = #tpu.dot_dimension_numbers<[1], [0], [0], [1], [0, 0, 1, 1], [], []>} : vector<8x8xf32>, vector<8x32xf32>, vector<8x32xf32> -> vector<8x32xf32>
    %246 = arith.addf %225, %245 : vector<8x32xf32>
    %247 = vector.extract_strided_slice %202 {offsets = [0, 16], sizes = [8, 8], strides = [1, 1]} : vector<8x32xf32> to vector<8x8xf32>
    %248 = vector.extract_strided_slice %203 {offsets = [0, 16], sizes = [8, 8], strides = [1, 1]} : vector<8x32xf32> to vector<8x8xf32>
    %cst_84 = arith.constant dense<0.000000e+00> : vector<8x8xf32>
    %249 = tpu.matmul %247, %248, %cst_84 {dimension_numbers = #tpu.dot_dimension_numbers<[1], [1], [0], [0], [0, 0, 1, 0], [], []>} : vector<8x8xf32>, vector<8x8xf32>, vector<8x8xf32> -> vector<8x8xf32>
    %cst_85 = arith.constant 0.353553385 : f32
    %250 = vector.broadcast %cst_85 : f32 to vector<8x8xf32>
    %251 = arith.mulf %249, %250 : vector<8x8xf32>
    %252 = vector.broadcast %1 : vector<1x8xf32> to vector<8x8xf32>
    %253 = arith.addf %251, %252 : vector<8x8xf32>
    %cst_86 = arith.constant dense<0xFF800000> : vector<8xf32>
    %254 = vector.multi_reduction <maximumf>, %253, %cst_86 [1] : vector<8x8xf32> to vector<8xf32>
    %255 = vector.shape_cast %254 : vector<8xf32> to vector<8x1xf32>
    %256 = vector.broadcast %255 : vector<8x1xf32> to vector<8x8xf32>
    %257 = arith.subf %253, %256 : vector<8x8xf32>
    %258 = math.exp %257 : vector<8x8xf32>
    %cst_87 = arith.constant dense<0.000000e+00> : vector<8xf32>
    %259 = vector.multi_reduction <add>, %258, %cst_87 [1] : vector<8x8xf32> to vector<8xf32>
    %260 = vector.shape_cast %259 : vector<8xf32> to vector<8x1xf32>
    %261 = vector.broadcast %260 : vector<8x1xf32> to vector<8x8xf32>
    %262 = arith.divf %258, %261 : vector<8x8xf32>
    %263 = vector.extract_strided_slice %204 {offsets = [0, 16], sizes = [8, 8], strides = [1, 1]} : vector<8x32xf32> to vector<8x8xf32>
    %cst_88 = arith.constant dense<0.000000e+00> : vector<8x8xf32>
    %264 = tpu.matmul %262, %263, %cst_88 {dimension_numbers = #tpu.dot_dimension_numbers<[1], [0], [0], [1], [0, 0, 1, 1], [], []>} : vector<8x8xf32>, vector<8x8xf32>, vector<8x8xf32> -> vector<8x8xf32>
    %265 = vector.extract_strided_slice %205 {offsets = [16, 0], sizes = [8, 32], strides = [1, 1]} : vector<32x32xf32> to vector<8x32xf32>
    %cst_89 = arith.constant dense<0.000000e+00> : vector<8x32xf32>
    %266 = tpu.matmul %264, %265, %cst_89 {dimension_numbers = #tpu.dot_dimension_numbers<[1], [0], [0], [1], [0, 0, 1, 1], [], []>} : vector<8x8xf32>, vector<8x32xf32>, vector<8x32xf32> -> vector<8x32xf32>
    %267 = arith.addf %246, %266 : vector<8x32xf32>
    %268 = vector.extract_strided_slice %202 {offsets = [0, 24], sizes = [8, 8], strides = [1, 1]} : vector<8x32xf32> to vector<8x8xf32>
    %269 = vector.extract_strided_slice %203 {offsets = [0, 24], sizes = [8, 8], strides = [1, 1]} : vector<8x32xf32> to vector<8x8xf32>
    %cst_90 = arith.constant dense<0.000000e+00> : vector<8x8xf32>
    %270 = tpu.matmul %268, %269, %cst_90 {dimension_numbers = #tpu.dot_dimension_numbers<[1], [1], [0], [0], [0, 0, 1, 0], [], []>} : vector<8x8xf32>, vector<8x8xf32>, vector<8x8xf32> -> vector<8x8xf32>
    %cst_91 = arith.constant 0.353553385 : f32
    %271 = vector.broadcast %cst_91 : f32 to vector<8x8xf32>
    %272 = arith.mulf %270, %271 : vector<8x8xf32>
    %273 = vector.broadcast %1 : vector<1x8xf32> to vector<8x8xf32>
    %274 = arith.addf %272, %273 : vector<8x8xf32>
    %cst_92 = arith.constant dense<0xFF800000> : vector<8xf32>
    %275 = vector.multi_reduction <maximumf>, %274, %cst_92 [1] : vector<8x8xf32> to vector<8xf32>
    %276 = vector.shape_cast %275 : vector<8xf32> to vector<8x1xf32>
    %277 = vector.broadcast %276 : vector<8x1xf32> to vector<8x8xf32>
    %278 = arith.subf %274, %277 : vector<8x8xf32>
    %279 = math.exp %278 : vector<8x8xf32>
    %cst_93 = arith.constant dense<0.000000e+00> : vector<8xf32>
    %280 = vector.multi_reduction <add>, %279, %cst_93 [1] : vector<8x8xf32> to vector<8xf32>
    %281 = vector.shape_cast %280 : vector<8xf32> to vector<8x1xf32>
    %282 = vector.broadcast %281 : vector<8x1xf32> to vector<8x8xf32>
    %283 = arith.divf %279, %282 : vector<8x8xf32>
    %284 = vector.extract_strided_slice %204 {offsets = [0, 24], sizes = [8, 8], strides = [1, 1]} : vector<8x32xf32> to vector<8x8xf32>
    %cst_94 = arith.constant dense<0.000000e+00> : vector<8x8xf32>
    %285 = tpu.matmul %283, %284, %cst_94 {dimension_numbers = #tpu.dot_dimension_numbers<[1], [0], [0], [1], [0, 0, 1, 1], [], []>} : vector<8x8xf32>, vector<8x8xf32>, vector<8x8xf32> -> vector<8x8xf32>
    %286 = vector.extract_strided_slice %205 {offsets = [24, 0], sizes = [8, 32], strides = [1, 1]} : vector<32x32xf32> to vector<8x32xf32>
    %cst_95 = arith.constant dense<0.000000e+00> : vector<8x32xf32>
    %287 = tpu.matmul %285, %286, %cst_95 {dimension_numbers = #tpu.dot_dimension_numbers<[1], [0], [0], [1], [0, 0, 1, 1], [], []>} : vector<8x8xf32>, vector<8x32xf32>, vector<8x32xf32> -> vector<8x32xf32>
    %288 = arith.addf %267, %287 : vector<8x32xf32>
    %c656 = arith.constant 656 : index
    %c0_96 = arith.constant 0 : index
    %289 = vector.load %arg5[%c656, %c0_96] : memref<1240x128xf32, #tpu.memory_space<vmem>>, vector<1x32xf32>
    %290 = vector.broadcast %289 : vector<1x32xf32> to vector<8x32xf32>
    %291 = arith.addf %288, %290 : vector<8x32xf32>
    %292 = arith.addf %172, %291 : vector<8x32xf32>
    %cst_97 = arith.constant dense<0.000000e+00> : vector<8xf32>
    %293 = vector.multi_reduction <add>, %292, %cst_97 [1] : vector<8x32xf32> to vector<8xf32>
    %294 = vector.shape_cast %293 : vector<8xf32> to vector<8x1xf32>
    %cst_98 = arith.constant 3.200000e+01 : f32
    %295 = vector.broadcast %cst_98 : f32 to vector<8x1xf32>
    %296 = arith.divf %294, %295 : vector<8x1xf32>
    %297 = vector.broadcast %296 : vector<8x1xf32> to vector<8x32xf32>
    %298 = arith.subf %292, %297 : vector<8x32xf32>
    %299 = arith.mulf %298, %298 : vector<8x32xf32>
    %cst_99 = arith.constant dense<0.000000e+00> : vector<8xf32>
    %300 = vector.multi_reduction <add>, %299, %cst_99 [1] : vector<8x32xf32> to vector<8xf32>
    %301 = vector.shape_cast %300 : vector<8xf32> to vector<8x1xf32>
    %cst_100 = arith.constant 3.100000e+01 : f32
    %302 = vector.broadcast %cst_100 : f32 to vector<8x1xf32>
    %303 = arith.divf %301, %302 : vector<8x1xf32>
    %c792 = arith.constant 792 : index
    %c0_101 = arith.constant 0 : index
    %304 = vector.load %arg5[%c792, %c0_101] : memref<1240x128xf32, #tpu.memory_space<vmem>>, vector<1x32xf32>
    %305 = vector.broadcast %296 : vector<8x1xf32> to vector<8x32xf32>
    %306 = arith.subf %292, %305 : vector<8x32xf32>
    %307 = vector.broadcast %304 : vector<1x32xf32> to vector<8x32xf32>
    %308 = arith.mulf %307, %306 : vector<8x32xf32>
    %309 = math.sqrt %303 : vector<8x1xf32>
    %cst_102 = arith.constant 9.99999997E-7 : f32
    %310 = vector.broadcast %cst_102 : f32 to vector<8x1xf32>
    %311 = arith.addf %309, %310 : vector<8x1xf32>
    %312 = vector.broadcast %311 : vector<8x1xf32> to vector<8x32xf32>
    %313 = arith.divf %308, %312 : vector<8x32xf32>
    %c800 = arith.constant 800 : index
    %c0_103 = arith.constant 0 : index
    %314 = vector.load %arg5[%c800, %c0_103] : memref<1240x128xf32, #tpu.memory_space<vmem>>, vector<1x32xf32>
    %315 = vector.broadcast %314 : vector<1x32xf32> to vector<8x32xf32>
    %316 = arith.addf %313, %315 : vector<8x32xf32>
    %c664 = arith.constant 664 : index
    %c0_104 = arith.constant 0 : index
    %317 = vector.load %arg5[%c664, %c0_104] : memref<1240x128xf32, #tpu.memory_space<vmem>>, vector<32x64xf32>
    %cst_105 = arith.constant dense<0.000000e+00> : vector<8x64xf32>
    %318 = tpu.matmul %316, %317, %cst_105 {dimension_numbers = #tpu.dot_dimension_numbers<[1], [0], [0], [1], [0, 0, 1, 1], [], []>} : vector<8x32xf32>, vector<32x64xf32>, vector<8x64xf32> -> vector<8x64xf32>
    %c696 = arith.constant 696 : index
    %c0_106 = arith.constant 0 : index
    %319 = vector.load %arg5[%c696, %c0_106] : memref<1240x128xf32, #tpu.memory_space<vmem>>, vector<1x64xf32>
    %320 = vector.broadcast %319 : vector<1x64xf32> to vector<8x64xf32>
    %321 = arith.addf %318, %320 : vector<8x64xf32>
    %cst_107 = arith.constant 0.000000e+00 : f32
    %322 = vector.broadcast %cst_107 : f32 to vector<8x64xf32>
    %323 = arith.maximumf %321, %322 : vector<8x64xf32>
    %c704 = arith.constant 704 : index
    %c0_108 = arith.constant 0 : index
    %324 = vector.load %arg5[%c704, %c0_108] : memref<1240x128xf32, #tpu.memory_space<vmem>>, vector<64x32xf32>
    %cst_109 = arith.constant dense<0.000000e+00> : vector<8x32xf32>
    %325 = tpu.matmul %323, %324, %cst_109 {dimension_numbers = #tpu.dot_dimension_numbers<[1], [0], [0], [1], [0, 0, 1, 1], [], []>} : vector<8x64xf32>, vector<64x32xf32>, vector<8x32xf32> -> vector<8x32xf32>
    %c768 = arith.constant 768 : index
    %c0_110 = arith.constant 0 : index
    %326 = vector.load %arg5[%c768, %c0_110] : memref<1240x128xf32, #tpu.memory_space<vmem>>, vector<1x32xf32>
    %327 = vector.broadcast %326 : vector<1x32xf32> to vector<8x32xf32>
    %328 = arith.addf %325, %327 : vector<8x32xf32>
    %329 = arith.addf %292, %328 : vector<8x32xf32>
    %cst_111 = arith.constant dense<0.000000e+00> : vector<8xf32>
    %330 = vector.multi_reduction <add>, %329, %cst_111 [1] : vector<8x32xf32> to vector<8xf32>
    %331 = vector.shape_cast %330 : vector<8xf32> to vector<8x1xf32>
    %cst_112 = arith.constant 3.200000e+01 : f32
    %332 = vector.broadcast %cst_112 : f32 to vector<8x1xf32>
    %333 = arith.divf %331, %332 : vector<8x1xf32>
    %334 = vector.broadcast %333 : vector<8x1xf32> to vector<8x32xf32>
    %335 = arith.subf %329, %334 : vector<8x32xf32>
    %336 = arith.mulf %335, %335 : vector<8x32xf32>
    %cst_113 = arith.constant dense<0.000000e+00> : vector<8xf32>
    %337 = vector.multi_reduction <add>, %336, %cst_113 [1] : vector<8x32xf32> to vector<8xf32>
    %338 = vector.shape_cast %337 : vector<8xf32> to vector<8x1xf32>
    %cst_114 = arith.constant 3.100000e+01 : f32
    %339 = vector.broadcast %cst_114 : f32 to vector<8x1xf32>
    %340 = arith.divf %338, %339 : vector<8x1xf32>
    %c1168 = arith.constant 1168 : index
    %c0_115 = arith.constant 0 : index
    %341 = vector.load %arg5[%c1168, %c0_115] : memref<1240x128xf32, #tpu.memory_space<vmem>>, vector<1x32xf32>
    %342 = vector.broadcast %333 : vector<8x1xf32> to vector<8x32xf32>
    %343 = arith.subf %329, %342 : vector<8x32xf32>
    %344 = vector.broadcast %341 : vector<1x32xf32> to vector<8x32xf32>
    %345 = arith.mulf %344, %343 : vector<8x32xf32>
    %346 = math.sqrt %340 : vector<8x1xf32>
    %cst_116 = arith.constant 9.99999997E-7 : f32
    %347 = vector.broadcast %cst_116 : f32 to vector<8x1xf32>
    %348 = arith.addf %346, %347 : vector<8x1xf32>
    %349 = vector.broadcast %348 : vector<8x1xf32> to vector<8x32xf32>
    %350 = arith.divf %345, %349 : vector<8x32xf32>
    %c1176 = arith.constant 1176 : index
    %c0_117 = arith.constant 0 : index
    %351 = vector.load %arg5[%c1176, %c0_117] : memref<1240x128xf32, #tpu.memory_space<vmem>>, vector<1x32xf32>
    %352 = vector.broadcast %351 : vector<1x32xf32> to vector<8x32xf32>
    %353 = arith.addf %350, %352 : vector<8x32xf32>
    %c0_118 = arith.constant 0 : index
    %c0_119 = arith.constant 0 : index
    %354 = vector.load %arg2[%c0_118, %c0_119] : memref<8x1xi32, #tpu.memory_space<vmem>>, vector<8x1xi32>
    %355 = tpu.iota {dimensions = array<i32: 1>} : vector<8x16xi32>
    %356 = vector.broadcast %354 : vector<8x1xi32> to vector<8x16xi32>
    %357 = arith.cmpi eq, %356, %355 : vector<8x16xi32>
    %358 = arith.extui %357 : vector<8x16xi1> to vector<8x16xi32>
    %359 = arith.sitofp %358 : vector<8x16xi32> to vector<8x16xf32>
    %c1216 = arith.constant 1216 : index
    %c0_120 = arith.constant 0 : index
    %360 = vector.load %arg5[%c1216, %c0_120] : memref<1240x128xf32, #tpu.memory_space<vmem>>, vector<16x32xf32>
    %cst_121 = arith.constant dense<0.000000e+00> : vector<8x32xf32>
    %361 = tpu.matmul %359, %360, %cst_121 {dimension_numbers = #tpu.dot_dimension_numbers<[1], [0], [0], [1], [0, 0, 1, 1], [], []>} : vector<8x16xf32>, vector<16x32xf32>, vector<8x32xf32> -> vector<8x32xf32>
    %cst_122 = arith.constant 5.65685415 : f32
    %362 = vector.broadcast %cst_122 : f32 to vector<8x32xf32>
    %363 = arith.mulf %361, %362 : vector<8x32xf32>
    %c1232_123 = arith.constant 1232 : index
    %c0_124 = arith.constant 0 : index
    %364 = vector.load %arg5[%c1232_123, %c0_124] : memref<1240x128xf32, #tpu.memory_space<vmem>>, vector<8x32xf32>
    %365 = arith.addf %363, %364 : vector<8x32xf32>
    %cst_125 = arith.constant dense<0.000000e+00> : vector<8xf32>
    %366 = vector.multi_reduction <add>, %365, %cst_125 [1] : vector<8x32xf32> to vector<8xf32>
    %367 = vector.shape_cast %366 : vector<8xf32> to vector<8x1xf32>
    %cst_126 = arith.constant 3.200000e+01 : f32
    %368 = vector.broadcast %cst_126 : f32 to vector<8x1xf32>
    %369 = arith.divf %367, %368 : vector<8x1xf32>
    %370 = vector.broadcast %369 : vector<8x1xf32> to vector<8x32xf32>
    %371 = arith.subf %365, %370 : vector<8x32xf32>
    %372 = arith.mulf %371, %371 : vector<8x32xf32>
    %cst_127 = arith.constant dense<0.000000e+00> : vector<8xf32>
    %373 = vector.multi_reduction <add>, %372, %cst_127 [1] : vector<8x32xf32> to vector<8xf32>
    %374 = vector.shape_cast %373 : vector<8xf32> to vector<8x1xf32>
    %cst_128 = arith.constant 3.100000e+01 : f32
    %375 = vector.broadcast %cst_128 : f32 to vector<8x1xf32>
    %376 = arith.divf %374, %375 : vector<8x1xf32>
    %c536 = arith.constant 536 : index
    %c0_129 = arith.constant 0 : index
    %377 = vector.load %arg5[%c536, %c0_129] : memref<1240x128xf32, #tpu.memory_space<vmem>>, vector<1x32xf32>
    %378 = vector.broadcast %369 : vector<8x1xf32> to vector<8x32xf32>
    %379 = arith.subf %365, %378 : vector<8x32xf32>
    %380 = vector.broadcast %377 : vector<1x32xf32> to vector<8x32xf32>
    %381 = arith.mulf %380, %379 : vector<8x32xf32>
    %382 = math.sqrt %376 : vector<8x1xf32>
    %cst_130 = arith.constant 9.99999997E-7 : f32
    %383 = vector.broadcast %cst_130 : f32 to vector<8x1xf32>
    %384 = arith.addf %382, %383 : vector<8x1xf32>
    %385 = vector.broadcast %384 : vector<8x1xf32> to vector<8x32xf32>
    %386 = arith.divf %381, %385 : vector<8x32xf32>
    %c544 = arith.constant 544 : index
    %c0_131 = arith.constant 0 : index
    %387 = vector.load %arg5[%c544, %c0_131] : memref<1240x128xf32, #tpu.memory_space<vmem>>, vector<1x32xf32>
    %388 = vector.broadcast %387 : vector<1x32xf32> to vector<8x32xf32>
    %389 = arith.addf %386, %388 : vector<8x32xf32>
    %c224 = arith.constant 224 : index
    %c0_132 = arith.constant 0 : index
    %390 = vector.load %arg5[%c224, %c0_132] : memref<1240x128xf32, #tpu.memory_space<vmem>>, vector<32x96xf32>
    %cst_133 = arith.constant dense<0.000000e+00> : vector<8x96xf32>
    %391 = tpu.matmul %389, %390, %cst_133 {dimension_numbers = #tpu.dot_dimension_numbers<[1], [0], [0], [1], [0, 0, 1, 1], [], []>} : vector<8x32xf32>, vector<32x96xf32>, vector<8x96xf32> -> vector<8x96xf32>
    %c256 = arith.constant 256 : index
    %c0_134 = arith.constant 0 : index
    %392 = vector.load %arg5[%c256, %c0_134] : memref<1240x128xf32, #tpu.memory_space<vmem>>, vector<1x96xf32>
    %393 = vector.broadcast %392 : vector<1x96xf32> to vector<8x96xf32>
    %394 = arith.addf %391, %393 : vector<8x96xf32>
    %395 = vector.extract_strided_slice %394 {offsets = [0, 0], sizes = [8, 32], strides = [1, 1]} : vector<8x96xf32> to vector<8x32xf32>
    %396 = vector.extract_strided_slice %394 {offsets = [0, 32], sizes = [8, 32], strides = [1, 1]} : vector<8x96xf32> to vector<8x32xf32>
    %397 = vector.extract_strided_slice %394 {offsets = [0, 64], sizes = [8, 32], strides = [1, 1]} : vector<8x96xf32> to vector<8x32xf32>
    %c264 = arith.constant 264 : index
    %c0_135 = arith.constant 0 : index
    %398 = vector.load %arg5[%c264, %c0_135] : memref<1240x128xf32, #tpu.memory_space<vmem>>, vector<32x32xf32>
    %399 = vector.extract_strided_slice %395 {offsets = [0, 0], sizes = [8, 8], strides = [1, 1]} : vector<8x32xf32> to vector<8x8xf32>
    %400 = vector.extract_strided_slice %396 {offsets = [0, 0], sizes = [8, 8], strides = [1, 1]} : vector<8x32xf32> to vector<8x8xf32>
    %cst_136 = arith.constant dense<0.000000e+00> : vector<8x8xf32>
    %401 = tpu.matmul %399, %400, %cst_136 {dimension_numbers = #tpu.dot_dimension_numbers<[1], [1], [0], [0], [0, 0, 1, 0], [], []>} : vector<8x8xf32>, vector<8x8xf32>, vector<8x8xf32> -> vector<8x8xf32>
    %cst_137 = arith.constant 0.353553385 : f32
    %402 = vector.broadcast %cst_137 : f32 to vector<8x8xf32>
    %403 = arith.mulf %401, %402 : vector<8x8xf32>
    %404 = arith.addf %403, %3 : vector<8x8xf32>
    %cst_138 = arith.constant dense<0xFF800000> : vector<8xf32>
    %405 = vector.multi_reduction <maximumf>, %404, %cst_138 [1] : vector<8x8xf32> to vector<8xf32>
    %406 = vector.shape_cast %405 : vector<8xf32> to vector<8x1xf32>
    %407 = vector.broadcast %406 : vector<8x1xf32> to vector<8x8xf32>
    %408 = arith.subf %404, %407 : vector<8x8xf32>
    %409 = math.exp %408 : vector<8x8xf32>
    %cst_139 = arith.constant dense<0.000000e+00> : vector<8xf32>
    %410 = vector.multi_reduction <add>, %409, %cst_139 [1] : vector<8x8xf32> to vector<8xf32>
    %411 = vector.shape_cast %410 : vector<8xf32> to vector<8x1xf32>
    %412 = vector.broadcast %411 : vector<8x1xf32> to vector<8x8xf32>
    %413 = arith.divf %409, %412 : vector<8x8xf32>
    %414 = vector.extract_strided_slice %397 {offsets = [0, 0], sizes = [8, 8], strides = [1, 1]} : vector<8x32xf32> to vector<8x8xf32>
    %cst_140 = arith.constant dense<0.000000e+00> : vector<8x8xf32>
    %415 = tpu.matmul %413, %414, %cst_140 {dimension_numbers = #tpu.dot_dimension_numbers<[1], [0], [0], [1], [0, 0, 1, 1], [], []>} : vector<8x8xf32>, vector<8x8xf32>, vector<8x8xf32> -> vector<8x8xf32>
    %416 = vector.extract_strided_slice %398 {offsets = [0, 0], sizes = [8, 32], strides = [1, 1]} : vector<32x32xf32> to vector<8x32xf32>
    %cst_141 = arith.constant dense<0.000000e+00> : vector<8x32xf32>
    %417 = tpu.matmul %415, %416, %cst_141 {dimension_numbers = #tpu.dot_dimension_numbers<[1], [0], [0], [1], [0, 0, 1, 1], [], []>} : vector<8x8xf32>, vector<8x32xf32>, vector<8x32xf32> -> vector<8x32xf32>
    %418 = vector.extract_strided_slice %395 {offsets = [0, 8], sizes = [8, 8], strides = [1, 1]} : vector<8x32xf32> to vector<8x8xf32>
    %419 = vector.extract_strided_slice %396 {offsets = [0, 8], sizes = [8, 8], strides = [1, 1]} : vector<8x32xf32> to vector<8x8xf32>
    %cst_142 = arith.constant dense<0.000000e+00> : vector<8x8xf32>
    %420 = tpu.matmul %418, %419, %cst_142 {dimension_numbers = #tpu.dot_dimension_numbers<[1], [1], [0], [0], [0, 0, 1, 0], [], []>} : vector<8x8xf32>, vector<8x8xf32>, vector<8x8xf32> -> vector<8x8xf32>
    %cst_143 = arith.constant 0.353553385 : f32
    %421 = vector.broadcast %cst_143 : f32 to vector<8x8xf32>
    %422 = arith.mulf %420, %421 : vector<8x8xf32>
    %423 = arith.addf %422, %3 : vector<8x8xf32>
    %cst_144 = arith.constant dense<0xFF800000> : vector<8xf32>
    %424 = vector.multi_reduction <maximumf>, %423, %cst_144 [1] : vector<8x8xf32> to vector<8xf32>
    %425 = vector.shape_cast %424 : vector<8xf32> to vector<8x1xf32>
    %426 = vector.broadcast %425 : vector<8x1xf32> to vector<8x8xf32>
    %427 = arith.subf %423, %426 : vector<8x8xf32>
    %428 = math.exp %427 : vector<8x8xf32>
    %cst_145 = arith.constant dense<0.000000e+00> : vector<8xf32>
    %429 = vector.multi_reduction <add>, %428, %cst_145 [1] : vector<8x8xf32> to vector<8xf32>
    %430 = vector.shape_cast %429 : vector<8xf32> to vector<8x1xf32>
    %431 = vector.broadcast %430 : vector<8x1xf32> to vector<8x8xf32>
    %432 = arith.divf %428, %431 : vector<8x8xf32>
    %433 = vector.extract_strided_slice %397 {offsets = [0, 8], sizes = [8, 8], strides = [1, 1]} : vector<8x32xf32> to vector<8x8xf32>
    %cst_146 = arith.constant dense<0.000000e+00> : vector<8x8xf32>
    %434 = tpu.matmul %432, %433, %cst_146 {dimension_numbers = #tpu.dot_dimension_numbers<[1], [0], [0], [1], [0, 0, 1, 1], [], []>} : vector<8x8xf32>, vector<8x8xf32>, vector<8x8xf32> -> vector<8x8xf32>
    %435 = vector.extract_strided_slice %398 {offsets = [8, 0], sizes = [8, 32], strides = [1, 1]} : vector<32x32xf32> to vector<8x32xf32>
    %cst_147 = arith.constant dense<0.000000e+00> : vector<8x32xf32>
    %436 = tpu.matmul %434, %435, %cst_147 {dimension_numbers = #tpu.dot_dimension_numbers<[1], [0], [0], [1], [0, 0, 1, 1], [], []>} : vector<8x8xf32>, vector<8x32xf32>, vector<8x32xf32> -> vector<8x32xf32>
    %437 = arith.addf %417, %436 : vector<8x32xf32>
    %438 = vector.extract_strided_slice %395 {offsets = [0, 16], sizes = [8, 8], strides = [1, 1]} : vector<8x32xf32> to vector<8x8xf32>
    %439 = vector.extract_strided_slice %396 {offsets = [0, 16], sizes = [8, 8], strides = [1, 1]} : vector<8x32xf32> to vector<8x8xf32>
    %cst_148 = arith.constant dense<0.000000e+00> : vector<8x8xf32>
    %440 = tpu.matmul %438, %439, %cst_148 {dimension_numbers = #tpu.dot_dimension_numbers<[1], [1], [0], [0], [0, 0, 1, 0], [], []>} : vector<8x8xf32>, vector<8x8xf32>, vector<8x8xf32> -> vector<8x8xf32>
    %cst_149 = arith.constant 0.353553385 : f32
    %441 = vector.broadcast %cst_149 : f32 to vector<8x8xf32>
    %442 = arith.mulf %440, %441 : vector<8x8xf32>
    %443 = arith.addf %442, %3 : vector<8x8xf32>
    %cst_150 = arith.constant dense<0xFF800000> : vector<8xf32>
    %444 = vector.multi_reduction <maximumf>, %443, %cst_150 [1] : vector<8x8xf32> to vector<8xf32>
    %445 = vector.shape_cast %444 : vector<8xf32> to vector<8x1xf32>
    %446 = vector.broadcast %445 : vector<8x1xf32> to vector<8x8xf32>
    %447 = arith.subf %443, %446 : vector<8x8xf32>
    %448 = math.exp %447 : vector<8x8xf32>
    %cst_151 = arith.constant dense<0.000000e+00> : vector<8xf32>
    %449 = vector.multi_reduction <add>, %448, %cst_151 [1] : vector<8x8xf32> to vector<8xf32>
    %450 = vector.shape_cast %449 : vector<8xf32> to vector<8x1xf32>
    %451 = vector.broadcast %450 : vector<8x1xf32> to vector<8x8xf32>
    %452 = arith.divf %448, %451 : vector<8x8xf32>
    %453 = vector.extract_strided_slice %397 {offsets = [0, 16], sizes = [8, 8], strides = [1, 1]} : vector<8x32xf32> to vector<8x8xf32>
    %cst_152 = arith.constant dense<0.000000e+00> : vector<8x8xf32>
    %454 = tpu.matmul %452, %453, %cst_152 {dimension_numbers = #tpu.dot_dimension_numbers<[1], [0], [0], [1], [0, 0, 1, 1], [], []>} : vector<8x8xf32>, vector<8x8xf32>, vector<8x8xf32> -> vector<8x8xf32>
    %455 = vector.extract_strided_slice %398 {offsets = [16, 0], sizes = [8, 32], strides = [1, 1]} : vector<32x32xf32> to vector<8x32xf32>
    %cst_153 = arith.constant dense<0.000000e+00> : vector<8x32xf32>
    %456 = tpu.matmul %454, %455, %cst_153 {dimension_numbers = #tpu.dot_dimension_numbers<[1], [0], [0], [1], [0, 0, 1, 1], [], []>} : vector<8x8xf32>, vector<8x32xf32>, vector<8x32xf32> -> vector<8x32xf32>
    %457 = arith.addf %437, %456 : vector<8x32xf32>
    %458 = vector.extract_strided_slice %395 {offsets = [0, 24], sizes = [8, 8], strides = [1, 1]} : vector<8x32xf32> to vector<8x8xf32>
    %459 = vector.extract_strided_slice %396 {offsets = [0, 24], sizes = [8, 8], strides = [1, 1]} : vector<8x32xf32> to vector<8x8xf32>
    %cst_154 = arith.constant dense<0.000000e+00> : vector<8x8xf32>
    %460 = tpu.matmul %458, %459, %cst_154 {dimension_numbers = #tpu.dot_dimension_numbers<[1], [1], [0], [0], [0, 0, 1, 0], [], []>} : vector<8x8xf32>, vector<8x8xf32>, vector<8x8xf32> -> vector<8x8xf32>
    %cst_155 = arith.constant 0.353553385 : f32
    %461 = vector.broadcast %cst_155 : f32 to vector<8x8xf32>
    %462 = arith.mulf %460, %461 : vector<8x8xf32>
    %463 = arith.addf %462, %3 : vector<8x8xf32>
    %cst_156 = arith.constant dense<0xFF800000> : vector<8xf32>
    %464 = vector.multi_reduction <maximumf>, %463, %cst_156 [1] : vector<8x8xf32> to vector<8xf32>
    %465 = vector.shape_cast %464 : vector<8xf32> to vector<8x1xf32>
    %466 = vector.broadcast %465 : vector<8x1xf32> to vector<8x8xf32>
    %467 = arith.subf %463, %466 : vector<8x8xf32>
    %468 = math.exp %467 : vector<8x8xf32>
    %cst_157 = arith.constant dense<0.000000e+00> : vector<8xf32>
    %469 = vector.multi_reduction <add>, %468, %cst_157 [1] : vector<8x8xf32> to vector<8xf32>
    %470 = vector.shape_cast %469 : vector<8xf32> to vector<8x1xf32>
    %471 = vector.broadcast %470 : vector<8x1xf32> to vector<8x8xf32>
    %472 = arith.divf %468, %471 : vector<8x8xf32>
    %473 = vector.extract_strided_slice %397 {offsets = [0, 24], sizes = [8, 8], strides = [1, 1]} : vector<8x32xf32> to vector<8x8xf32>
    %cst_158 = arith.constant dense<0.000000e+00> : vector<8x8xf32>
    %474 = tpu.matmul %472, %473, %cst_158 {dimension_numbers = #tpu.dot_dimension_numbers<[1], [0], [0], [1], [0, 0, 1, 1], [], []>} : vector<8x8xf32>, vector<8x8xf32>, vector<8x8xf32> -> vector<8x8xf32>
    %475 = vector.extract_strided_slice %398 {offsets = [24, 0], sizes = [8, 32], strides = [1, 1]} : vector<32x32xf32> to vector<8x32xf32>
    %cst_159 = arith.constant dense<0.000000e+00> : vector<8x32xf32>
    %476 = tpu.matmul %474, %475, %cst_159 {dimension_numbers = #tpu.dot_dimension_numbers<[1], [0], [0], [1], [0, 0, 1, 1], [], []>} : vector<8x8xf32>, vector<8x32xf32>, vector<8x32xf32> -> vector<8x32xf32>
    %477 = arith.addf %457, %476 : vector<8x32xf32>
    %c296 = arith.constant 296 : index
    %c0_160 = arith.constant 0 : index
    %478 = vector.load %arg5[%c296, %c0_160] : memref<1240x128xf32, #tpu.memory_space<vmem>>, vector<1x32xf32>
    %479 = vector.broadcast %478 : vector<1x32xf32> to vector<8x32xf32>
    %480 = arith.addf %477, %479 : vector<8x32xf32>
    %481 = arith.addf %365, %480 : vector<8x32xf32>
    %cst_161 = arith.constant dense<0.000000e+00> : vector<8xf32>
    %482 = vector.multi_reduction <add>, %481, %cst_161 [1] : vector<8x32xf32> to vector<8xf32>
    %483 = vector.shape_cast %482 : vector<8xf32> to vector<8x1xf32>
    %cst_162 = arith.constant 3.200000e+01 : f32
    %484 = vector.broadcast %cst_162 : f32 to vector<8x1xf32>
    %485 = arith.divf %483, %484 : vector<8x1xf32>
    %486 = vector.broadcast %485 : vector<8x1xf32> to vector<8x32xf32>
    %487 = arith.subf %481, %486 : vector<8x32xf32>
    %488 = arith.mulf %487, %487 : vector<8x32xf32>
    %cst_163 = arith.constant dense<0.000000e+00> : vector<8xf32>
    %489 = vector.multi_reduction <add>, %488, %cst_163 [1] : vector<8x32xf32> to vector<8xf32>
    %490 = vector.shape_cast %489 : vector<8xf32> to vector<8x1xf32>
    %cst_164 = arith.constant 3.100000e+01 : f32
    %491 = vector.broadcast %cst_164 : f32 to vector<8x1xf32>
    %492 = arith.divf %490, %491 : vector<8x1xf32>
    %c552 = arith.constant 552 : index
    %c0_165 = arith.constant 0 : index
    %493 = vector.load %arg5[%c552, %c0_165] : memref<1240x128xf32, #tpu.memory_space<vmem>>, vector<1x32xf32>
    %494 = vector.broadcast %485 : vector<8x1xf32> to vector<8x32xf32>
    %495 = arith.subf %481, %494 : vector<8x32xf32>
    %496 = vector.broadcast %493 : vector<1x32xf32> to vector<8x32xf32>
    %497 = arith.mulf %496, %495 : vector<8x32xf32>
    %498 = math.sqrt %492 : vector<8x1xf32>
    %cst_166 = arith.constant 9.99999997E-7 : f32
    %499 = vector.broadcast %cst_166 : f32 to vector<8x1xf32>
    %500 = arith.addf %498, %499 : vector<8x1xf32>
    %501 = vector.broadcast %500 : vector<8x1xf32> to vector<8x32xf32>
    %502 = arith.divf %497, %501 : vector<8x32xf32>
    %c560 = arith.constant 560 : index
    %c0_167 = arith.constant 0 : index
    %503 = vector.load %arg5[%c560, %c0_167] : memref<1240x128xf32, #tpu.memory_space<vmem>>, vector<1x32xf32>
    %504 = vector.broadcast %503 : vector<1x32xf32> to vector<8x32xf32>
    %505 = arith.addf %502, %504 : vector<8x32xf32>
    %c304 = arith.constant 304 : index
    %c0_168 = arith.constant 0 : index
    %506 = vector.load %arg5[%c304, %c0_168] : memref<1240x128xf32, #tpu.memory_space<vmem>>, vector<32x32xf32>
    %cst_169 = arith.constant dense<0.000000e+00> : vector<8x32xf32>
    %507 = tpu.matmul %505, %506, %cst_169 {dimension_numbers = #tpu.dot_dimension_numbers<[1], [0], [0], [1], [0, 0, 1, 1], [], []>} : vector<8x32xf32>, vector<32x32xf32>, vector<8x32xf32> -> vector<8x32xf32>
    %c336 = arith.constant 336 : index
    %c0_170 = arith.constant 0 : index
    %508 = vector.load %arg5[%c336, %c0_170] : memref<1240x128xf32, #tpu.memory_space<vmem>>, vector<1x32xf32>
    %509 = vector.broadcast %508 : vector<1x32xf32> to vector<8x32xf32>
    %510 = arith.addf %507, %509 : vector<8x32xf32>
    %c344 = arith.constant 344 : index
    %c0_171 = arith.constant 0 : index
    %511 = vector.load %arg5[%c344, %c0_171] : memref<1240x128xf32, #tpu.memory_space<vmem>>, vector<32x64xf32>
    %cst_172 = arith.constant dense<0.000000e+00> : vector<8x64xf32>
    %512 = tpu.matmul %353, %511, %cst_172 {dimension_numbers = #tpu.dot_dimension_numbers<[1], [0], [0], [1], [0, 0, 1, 1], [], []>} : vector<8x32xf32>, vector<32x64xf32>, vector<8x64xf32> -> vector<8x64xf32>
    %c376 = arith.constant 376 : index
    %c0_173 = arith.constant 0 : index
    %513 = vector.load %arg5[%c376, %c0_173] : memref<1240x128xf32, #tpu.memory_space<vmem>>, vector<1x64xf32>
    %514 = vector.broadcast %513 : vector<1x64xf32> to vector<8x64xf32>
    %515 = arith.addf %512, %514 : vector<8x64xf32>
    %516 = vector.extract_strided_slice %515 {offsets = [0, 0], sizes = [8, 32], strides = [1, 1]} : vector<8x64xf32> to vector<8x32xf32>
    %517 = vector.extract_strided_slice %515 {offsets = [0, 32], sizes = [8, 32], strides = [1, 1]} : vector<8x64xf32> to vector<8x32xf32>
    %c384 = arith.constant 384 : index
    %c0_174 = arith.constant 0 : index
    %518 = vector.load %arg5[%c384, %c0_174] : memref<1240x128xf32, #tpu.memory_space<vmem>>, vector<32x32xf32>
    %519 = vector.extract_strided_slice %510 {offsets = [0, 0], sizes = [8, 8], strides = [1, 1]} : vector<8x32xf32> to vector<8x8xf32>
    %520 = vector.extract_strided_slice %516 {offsets = [0, 0], sizes = [8, 8], strides = [1, 1]} : vector<8x32xf32> to vector<8x8xf32>
    %cst_175 = arith.constant dense<0.000000e+00> : vector<8x8xf32>
    %521 = tpu.matmul %519, %520, %cst_175 {dimension_numbers = #tpu.dot_dimension_numbers<[1], [1], [0], [0], [0, 0, 1, 0], [], []>} : vector<8x8xf32>, vector<8x8xf32>, vector<8x8xf32> -> vector<8x8xf32>
    %cst_176 = arith.constant 0.353553385 : f32
    %522 = vector.broadcast %cst_176 : f32 to vector<8x8xf32>
    %523 = arith.mulf %521, %522 : vector<8x8xf32>
    %524 = vector.broadcast %1 : vector<1x8xf32> to vector<8x8xf32>
    %525 = arith.addf %523, %524 : vector<8x8xf32>
    %cst_177 = arith.constant dense<0xFF800000> : vector<8xf32>
    %526 = vector.multi_reduction <maximumf>, %525, %cst_177 [1] : vector<8x8xf32> to vector<8xf32>
    %527 = vector.shape_cast %526 : vector<8xf32> to vector<8x1xf32>
    %528 = vector.broadcast %527 : vector<8x1xf32> to vector<8x8xf32>
    %529 = arith.subf %525, %528 : vector<8x8xf32>
    %530 = math.exp %529 : vector<8x8xf32>
    %cst_178 = arith.constant dense<0.000000e+00> : vector<8xf32>
    %531 = vector.multi_reduction <add>, %530, %cst_178 [1] : vector<8x8xf32> to vector<8xf32>
    %532 = vector.shape_cast %531 : vector<8xf32> to vector<8x1xf32>
    %533 = vector.broadcast %532 : vector<8x1xf32> to vector<8x8xf32>
    %534 = arith.divf %530, %533 : vector<8x8xf32>
    %535 = vector.extract_strided_slice %517 {offsets = [0, 0], sizes = [8, 8], strides = [1, 1]} : vector<8x32xf32> to vector<8x8xf32>
    %cst_179 = arith.constant dense<0.000000e+00> : vector<8x8xf32>
    %536 = tpu.matmul %534, %535, %cst_179 {dimension_numbers = #tpu.dot_dimension_numbers<[1], [0], [0], [1], [0, 0, 1, 1], [], []>} : vector<8x8xf32>, vector<8x8xf32>, vector<8x8xf32> -> vector<8x8xf32>
    %537 = vector.extract_strided_slice %518 {offsets = [0, 0], sizes = [8, 32], strides = [1, 1]} : vector<32x32xf32> to vector<8x32xf32>
    %cst_180 = arith.constant dense<0.000000e+00> : vector<8x32xf32>
    %538 = tpu.matmul %536, %537, %cst_180 {dimension_numbers = #tpu.dot_dimension_numbers<[1], [0], [0], [1], [0, 0, 1, 1], [], []>} : vector<8x8xf32>, vector<8x32xf32>, vector<8x32xf32> -> vector<8x32xf32>
    %539 = vector.extract_strided_slice %510 {offsets = [0, 8], sizes = [8, 8], strides = [1, 1]} : vector<8x32xf32> to vector<8x8xf32>
    %540 = vector.extract_strided_slice %516 {offsets = [0, 8], sizes = [8, 8], strides = [1, 1]} : vector<8x32xf32> to vector<8x8xf32>
    %cst_181 = arith.constant dense<0.000000e+00> : vector<8x8xf32>
    %541 = tpu.matmul %539, %540, %cst_181 {dimension_numbers = #tpu.dot_dimension_numbers<[1], [1], [0], [0], [0, 0, 1, 0], [], []>} : vector<8x8xf32>, vector<8x8xf32>, vector<8x8xf32> -> vector<8x8xf32>
    %cst_182 = arith.constant 0.353553385 : f32
    %542 = vector.broadcast %cst_182 : f32 to vector<8x8xf32>
    %543 = arith.mulf %541, %542 : vector<8x8xf32>
    %544 = vector.broadcast %1 : vector<1x8xf32> to vector<8x8xf32>
    %545 = arith.addf %543, %544 : vector<8x8xf32>
    %cst_183 = arith.constant dense<0xFF800000> : vector<8xf32>
    %546 = vector.multi_reduction <maximumf>, %545, %cst_183 [1] : vector<8x8xf32> to vector<8xf32>
    %547 = vector.shape_cast %546 : vector<8xf32> to vector<8x1xf32>
    %548 = vector.broadcast %547 : vector<8x1xf32> to vector<8x8xf32>
    %549 = arith.subf %545, %548 : vector<8x8xf32>
    %550 = math.exp %549 : vector<8x8xf32>
    %cst_184 = arith.constant dense<0.000000e+00> : vector<8xf32>
    %551 = vector.multi_reduction <add>, %550, %cst_184 [1] : vector<8x8xf32> to vector<8xf32>
    %552 = vector.shape_cast %551 : vector<8xf32> to vector<8x1xf32>
    %553 = vector.broadcast %552 : vector<8x1xf32> to vector<8x8xf32>
    %554 = arith.divf %550, %553 : vector<8x8xf32>
    %555 = vector.extract_strided_slice %517 {offsets = [0, 8], sizes = [8, 8], strides = [1, 1]} : vector<8x32xf32> to vector<8x8xf32>
    %cst_185 = arith.constant dense<0.000000e+00> : vector<8x8xf32>
    %556 = tpu.matmul %554, %555, %cst_185 {dimension_numbers = #tpu.dot_dimension_numbers<[1], [0], [0], [1], [0, 0, 1, 1], [], []>} : vector<8x8xf32>, vector<8x8xf32>, vector<8x8xf32> -> vector<8x8xf32>
    %557 = vector.extract_strided_slice %518 {offsets = [8, 0], sizes = [8, 32], strides = [1, 1]} : vector<32x32xf32> to vector<8x32xf32>
    %cst_186 = arith.constant dense<0.000000e+00> : vector<8x32xf32>
    %558 = tpu.matmul %556, %557, %cst_186 {dimension_numbers = #tpu.dot_dimension_numbers<[1], [0], [0], [1], [0, 0, 1, 1], [], []>} : vector<8x8xf32>, vector<8x32xf32>, vector<8x32xf32> -> vector<8x32xf32>
    %559 = arith.addf %538, %558 : vector<8x32xf32>
    %560 = vector.extract_strided_slice %510 {offsets = [0, 16], sizes = [8, 8], strides = [1, 1]} : vector<8x32xf32> to vector<8x8xf32>
    %561 = vector.extract_strided_slice %516 {offsets = [0, 16], sizes = [8, 8], strides = [1, 1]} : vector<8x32xf32> to vector<8x8xf32>
    %cst_187 = arith.constant dense<0.000000e+00> : vector<8x8xf32>
    %562 = tpu.matmul %560, %561, %cst_187 {dimension_numbers = #tpu.dot_dimension_numbers<[1], [1], [0], [0], [0, 0, 1, 0], [], []>} : vector<8x8xf32>, vector<8x8xf32>, vector<8x8xf32> -> vector<8x8xf32>
    %cst_188 = arith.constant 0.353553385 : f32
    %563 = vector.broadcast %cst_188 : f32 to vector<8x8xf32>
    %564 = arith.mulf %562, %563 : vector<8x8xf32>
    %565 = vector.broadcast %1 : vector<1x8xf32> to vector<8x8xf32>
    %566 = arith.addf %564, %565 : vector<8x8xf32>
    %cst_189 = arith.constant dense<0xFF800000> : vector<8xf32>
    %567 = vector.multi_reduction <maximumf>, %566, %cst_189 [1] : vector<8x8xf32> to vector<8xf32>
    %568 = vector.shape_cast %567 : vector<8xf32> to vector<8x1xf32>
    %569 = vector.broadcast %568 : vector<8x1xf32> to vector<8x8xf32>
    %570 = arith.subf %566, %569 : vector<8x8xf32>
    %571 = math.exp %570 : vector<8x8xf32>
    %cst_190 = arith.constant dense<0.000000e+00> : vector<8xf32>
    %572 = vector.multi_reduction <add>, %571, %cst_190 [1] : vector<8x8xf32> to vector<8xf32>
    %573 = vector.shape_cast %572 : vector<8xf32> to vector<8x1xf32>
    %574 = vector.broadcast %573 : vector<8x1xf32> to vector<8x8xf32>
    %575 = arith.divf %571, %574 : vector<8x8xf32>
    %576 = vector.extract_strided_slice %517 {offsets = [0, 16], sizes = [8, 8], strides = [1, 1]} : vector<8x32xf32> to vector<8x8xf32>
    %cst_191 = arith.constant dense<0.000000e+00> : vector<8x8xf32>
    %577 = tpu.matmul %575, %576, %cst_191 {dimension_numbers = #tpu.dot_dimension_numbers<[1], [0], [0], [1], [0, 0, 1, 1], [], []>} : vector<8x8xf32>, vector<8x8xf32>, vector<8x8xf32> -> vector<8x8xf32>
    %578 = vector.extract_strided_slice %518 {offsets = [16, 0], sizes = [8, 32], strides = [1, 1]} : vector<32x32xf32> to vector<8x32xf32>
    %cst_192 = arith.constant dense<0.000000e+00> : vector<8x32xf32>
    %579 = tpu.matmul %577, %578, %cst_192 {dimension_numbers = #tpu.dot_dimension_numbers<[1], [0], [0], [1], [0, 0, 1, 1], [], []>} : vector<8x8xf32>, vector<8x32xf32>, vector<8x32xf32> -> vector<8x32xf32>
    %580 = arith.addf %559, %579 : vector<8x32xf32>
    %581 = vector.extract_strided_slice %510 {offsets = [0, 24], sizes = [8, 8], strides = [1, 1]} : vector<8x32xf32> to vector<8x8xf32>
    %582 = vector.extract_strided_slice %516 {offsets = [0, 24], sizes = [8, 8], strides = [1, 1]} : vector<8x32xf32> to vector<8x8xf32>
    %cst_193 = arith.constant dense<0.000000e+00> : vector<8x8xf32>
    %583 = tpu.matmul %581, %582, %cst_193 {dimension_numbers = #tpu.dot_dimension_numbers<[1], [1], [0], [0], [0, 0, 1, 0], [], []>} : vector<8x8xf32>, vector<8x8xf32>, vector<8x8xf32> -> vector<8x8xf32>
    %cst_194 = arith.constant 0.353553385 : f32
    %584 = vector.broadcast %cst_194 : f32 to vector<8x8xf32>
    %585 = arith.mulf %583, %584 : vector<8x8xf32>
    %586 = vector.broadcast %1 : vector<1x8xf32> to vector<8x8xf32>
    %587 = arith.addf %585, %586 : vector<8x8xf32>
    %cst_195 = arith.constant dense<0xFF800000> : vector<8xf32>
    %588 = vector.multi_reduction <maximumf>, %587, %cst_195 [1] : vector<8x8xf32> to vector<8xf32>
    %589 = vector.shape_cast %588 : vector<8xf32> to vector<8x1xf32>
    %590 = vector.broadcast %589 : vector<8x1xf32> to vector<8x8xf32>
    %591 = arith.subf %587, %590 : vector<8x8xf32>
    %592 = math.exp %591 : vector<8x8xf32>
    %cst_196 = arith.constant dense<0.000000e+00> : vector<8xf32>
    %593 = vector.multi_reduction <add>, %592, %cst_196 [1] : vector<8x8xf32> to vector<8xf32>
    %594 = vector.shape_cast %593 : vector<8xf32> to vector<8x1xf32>
    %595 = vector.broadcast %594 : vector<8x1xf32> to vector<8x8xf32>
    %596 = arith.divf %592, %595 : vector<8x8xf32>
    %597 = vector.extract_strided_slice %517 {offsets = [0, 24], sizes = [8, 8], strides = [1, 1]} : vector<8x32xf32> to vector<8x8xf32>
    %cst_197 = arith.constant dense<0.000000e+00> : vector<8x8xf32>
    %598 = tpu.matmul %596, %597, %cst_197 {dimension_numbers = #tpu.dot_dimension_numbers<[1], [0], [0], [1], [0, 0, 1, 1], [], []>} : vector<8x8xf32>, vector<8x8xf32>, vector<8x8xf32> -> vector<8x8xf32>
    %599 = vector.extract_strided_slice %518 {offsets = [24, 0], sizes = [8, 32], strides = [1, 1]} : vector<32x32xf32> to vector<8x32xf32>
    %cst_198 = arith.constant dense<0.000000e+00> : vector<8x32xf32>
    %600 = tpu.matmul %598, %599, %cst_198 {dimension_numbers = #tpu.dot_dimension_numbers<[1], [0], [0], [1], [0, 0, 1, 1], [], []>} : vector<8x8xf32>, vector<8x32xf32>, vector<8x32xf32> -> vector<8x32xf32>
    %601 = arith.addf %580, %600 : vector<8x32xf32>
    %c416 = arith.constant 416 : index
    %c0_199 = arith.constant 0 : index
    %602 = vector.load %arg5[%c416, %c0_199] : memref<1240x128xf32, #tpu.memory_space<vmem>>, vector<1x32xf32>
    %603 = vector.broadcast %602 : vector<1x32xf32> to vector<8x32xf32>
    %604 = arith.addf %601, %603 : vector<8x32xf32>
    %605 = arith.addf %481, %604 : vector<8x32xf32>
    %cst_200 = arith.constant dense<0.000000e+00> : vector<8xf32>
    %606 = vector.multi_reduction <add>, %605, %cst_200 [1] : vector<8x32xf32> to vector<8xf32>
    %607 = vector.shape_cast %606 : vector<8xf32> to vector<8x1xf32>
    %cst_201 = arith.constant 3.200000e+01 : f32
    %608 = vector.broadcast %cst_201 : f32 to vector<8x1xf32>
    %609 = arith.divf %607, %608 : vector<8x1xf32>
    %610 = vector.broadcast %609 : vector<8x1xf32> to vector<8x32xf32>
    %611 = arith.subf %605, %610 : vector<8x32xf32>
    %612 = arith.mulf %611, %611 : vector<8x32xf32>
    %cst_202 = arith.constant dense<0.000000e+00> : vector<8xf32>
    %613 = vector.multi_reduction <add>, %612, %cst_202 [1] : vector<8x32xf32> to vector<8xf32>
    %614 = vector.shape_cast %613 : vector<8xf32> to vector<8x1xf32>
    %cst_203 = arith.constant 3.100000e+01 : f32
    %615 = vector.broadcast %cst_203 : f32 to vector<8x1xf32>
    %616 = arith.divf %614, %615 : vector<8x1xf32>
    %c568 = arith.constant 568 : index
    %c0_204 = arith.constant 0 : index
    %617 = vector.load %arg5[%c568, %c0_204] : memref<1240x128xf32, #tpu.memory_space<vmem>>, vector<1x32xf32>
    %618 = vector.broadcast %609 : vector<8x1xf32> to vector<8x32xf32>
    %619 = arith.subf %605, %618 : vector<8x32xf32>
    %620 = vector.broadcast %617 : vector<1x32xf32> to vector<8x32xf32>
    %621 = arith.mulf %620, %619 : vector<8x32xf32>
    %622 = math.sqrt %616 : vector<8x1xf32>
    %cst_205 = arith.constant 9.99999997E-7 : f32
    %623 = vector.broadcast %cst_205 : f32 to vector<8x1xf32>
    %624 = arith.addf %622, %623 : vector<8x1xf32>
    %625 = vector.broadcast %624 : vector<8x1xf32> to vector<8x32xf32>
    %626 = arith.divf %621, %625 : vector<8x32xf32>
    %c576 = arith.constant 576 : index
    %c0_206 = arith.constant 0 : index
    %627 = vector.load %arg5[%c576, %c0_206] : memref<1240x128xf32, #tpu.memory_space<vmem>>, vector<1x32xf32>
    %628 = vector.broadcast %627 : vector<1x32xf32> to vector<8x32xf32>
    %629 = arith.addf %626, %628 : vector<8x32xf32>
    %c424 = arith.constant 424 : index
    %c0_207 = arith.constant 0 : index
    %630 = vector.load %arg5[%c424, %c0_207] : memref<1240x128xf32, #tpu.memory_space<vmem>>, vector<32x64xf32>
    %cst_208 = arith.constant dense<0.000000e+00> : vector<8x64xf32>
    %631 = tpu.matmul %629, %630, %cst_208 {dimension_numbers = #tpu.dot_dimension_numbers<[1], [0], [0], [1], [0, 0, 1, 1], [], []>} : vector<8x32xf32>, vector<32x64xf32>, vector<8x64xf32> -> vector<8x64xf32>
    %c456 = arith.constant 456 : index
    %c0_209 = arith.constant 0 : index
    %632 = vector.load %arg5[%c456, %c0_209] : memref<1240x128xf32, #tpu.memory_space<vmem>>, vector<1x64xf32>
    %633 = vector.broadcast %632 : vector<1x64xf32> to vector<8x64xf32>
    %634 = arith.addf %631, %633 : vector<8x64xf32>
    %cst_210 = arith.constant 0.000000e+00 : f32
    %635 = vector.broadcast %cst_210 : f32 to vector<8x64xf32>
    %636 = arith.maximumf %634, %635 : vector<8x64xf32>
    %c464 = arith.constant 464 : index
    %c0_211 = arith.constant 0 : index
    %637 = vector.load %arg5[%c464, %c0_211] : memref<1240x128xf32, #tpu.memory_space<vmem>>, vector<64x32xf32>
    %cst_212 = arith.constant dense<0.000000e+00> : vector<8x32xf32>
    %638 = tpu.matmul %636, %637, %cst_212 {dimension_numbers = #tpu.dot_dimension_numbers<[1], [0], [0], [1], [0, 0, 1, 1], [], []>} : vector<8x64xf32>, vector<64x32xf32>, vector<8x32xf32> -> vector<8x32xf32>
    %c528 = arith.constant 528 : index
    %c0_213 = arith.constant 0 : index
    %639 = vector.load %arg5[%c528, %c0_213] : memref<1240x128xf32, #tpu.memory_space<vmem>>, vector<1x32xf32>
    %640 = vector.broadcast %639 : vector<1x32xf32> to vector<8x32xf32>
    %641 = arith.addf %638, %640 : vector<8x32xf32>
    %642 = arith.addf %605, %641 : vector<8x32xf32>
    %cst_214 = arith.constant dense<0.000000e+00> : vector<8xf32>
    %643 = vector.multi_reduction <add>, %642, %cst_214 [1] : vector<8x32xf32> to vector<8xf32>
    %644 = vector.shape_cast %643 : vector<8xf32> to vector<8x1xf32>
    %cst_215 = arith.constant 3.200000e+01 : f32
    %645 = vector.broadcast %cst_215 : f32 to vector<8x1xf32>
    %646 = arith.divf %644, %645 : vector<8x1xf32>
    %647 = vector.broadcast %646 : vector<8x1xf32> to vector<8x32xf32>
    %648 = arith.subf %642, %647 : vector<8x32xf32>
    %649 = arith.mulf %648, %648 : vector<8x32xf32>
    %cst_216 = arith.constant dense<0.000000e+00> : vector<8xf32>
    %650 = vector.multi_reduction <add>, %649, %cst_216 [1] : vector<8x32xf32> to vector<8xf32>
    %651 = vector.shape_cast %650 : vector<8xf32> to vector<8x1xf32>
    %cst_217 = arith.constant 3.100000e+01 : f32
    %652 = vector.broadcast %cst_217 : f32 to vector<8x1xf32>
    %653 = arith.divf %651, %652 : vector<8x1xf32>
    %c1120 = arith.constant 1120 : index
    %c0_218 = arith.constant 0 : index
    %654 = vector.load %arg5[%c1120, %c0_218] : memref<1240x128xf32, #tpu.memory_space<vmem>>, vector<1x32xf32>
    %655 = vector.broadcast %646 : vector<8x1xf32> to vector<8x32xf32>
    %656 = arith.subf %642, %655 : vector<8x32xf32>
    %657 = vector.broadcast %654 : vector<1x32xf32> to vector<8x32xf32>
    %658 = arith.mulf %657, %656 : vector<8x32xf32>
    %659 = math.sqrt %653 : vector<8x1xf32>
    %cst_219 = arith.constant 9.99999997E-7 : f32
    %660 = vector.broadcast %cst_219 : f32 to vector<8x1xf32>
    %661 = arith.addf %659, %660 : vector<8x1xf32>
    %662 = vector.broadcast %661 : vector<8x1xf32> to vector<8x32xf32>
    %663 = arith.divf %658, %662 : vector<8x32xf32>
    %c1128 = arith.constant 1128 : index
    %c0_220 = arith.constant 0 : index
    %664 = vector.load %arg5[%c1128, %c0_220] : memref<1240x128xf32, #tpu.memory_space<vmem>>, vector<1x32xf32>
    %665 = vector.broadcast %664 : vector<1x32xf32> to vector<8x32xf32>
    %666 = arith.addf %663, %665 : vector<8x32xf32>
    %c808 = arith.constant 808 : index
    %c0_221 = arith.constant 0 : index
    %667 = vector.load %arg5[%c808, %c0_221] : memref<1240x128xf32, #tpu.memory_space<vmem>>, vector<32x96xf32>
    %cst_222 = arith.constant dense<0.000000e+00> : vector<8x96xf32>
    %668 = tpu.matmul %666, %667, %cst_222 {dimension_numbers = #tpu.dot_dimension_numbers<[1], [0], [0], [1], [0, 0, 1, 1], [], []>} : vector<8x32xf32>, vector<32x96xf32>, vector<8x96xf32> -> vector<8x96xf32>
    %c840 = arith.constant 840 : index
    %c0_223 = arith.constant 0 : index
    %669 = vector.load %arg5[%c840, %c0_223] : memref<1240x128xf32, #tpu.memory_space<vmem>>, vector<1x96xf32>
    %670 = vector.broadcast %669 : vector<1x96xf32> to vector<8x96xf32>
    %671 = arith.addf %668, %670 : vector<8x96xf32>
    %672 = vector.extract_strided_slice %671 {offsets = [0, 0], sizes = [8, 32], strides = [1, 1]} : vector<8x96xf32> to vector<8x32xf32>
    %673 = vector.extract_strided_slice %671 {offsets = [0, 32], sizes = [8, 32], strides = [1, 1]} : vector<8x96xf32> to vector<8x32xf32>
    %674 = vector.extract_strided_slice %671 {offsets = [0, 64], sizes = [8, 32], strides = [1, 1]} : vector<8x96xf32> to vector<8x32xf32>
    %c848 = arith.constant 848 : index
    %c0_224 = arith.constant 0 : index
    %675 = vector.load %arg5[%c848, %c0_224] : memref<1240x128xf32, #tpu.memory_space<vmem>>, vector<32x32xf32>
    %676 = vector.extract_strided_slice %672 {offsets = [0, 0], sizes = [8, 8], strides = [1, 1]} : vector<8x32xf32> to vector<8x8xf32>
    %677 = vector.extract_strided_slice %673 {offsets = [0, 0], sizes = [8, 8], strides = [1, 1]} : vector<8x32xf32> to vector<8x8xf32>
    %cst_225 = arith.constant dense<0.000000e+00> : vector<8x8xf32>
    %678 = tpu.matmul %676, %677, %cst_225 {dimension_numbers = #tpu.dot_dimension_numbers<[1], [1], [0], [0], [0, 0, 1, 0], [], []>} : vector<8x8xf32>, vector<8x8xf32>, vector<8x8xf32> -> vector<8x8xf32>
    %cst_226 = arith.constant 0.353553385 : f32
    %679 = vector.broadcast %cst_226 : f32 to vector<8x8xf32>
    %680 = arith.mulf %678, %679 : vector<8x8xf32>
    %681 = arith.addf %680, %3 : vector<8x8xf32>
    %cst_227 = arith.constant dense<0xFF800000> : vector<8xf32>
    %682 = vector.multi_reduction <maximumf>, %681, %cst_227 [1] : vector<8x8xf32> to vector<8xf32>
    %683 = vector.shape_cast %682 : vector<8xf32> to vector<8x1xf32>
    %684 = vector.broadcast %683 : vector<8x1xf32> to vector<8x8xf32>
    %685 = arith.subf %681, %684 : vector<8x8xf32>
    %686 = math.exp %685 : vector<8x8xf32>
    %cst_228 = arith.constant dense<0.000000e+00> : vector<8xf32>
    %687 = vector.multi_reduction <add>, %686, %cst_228 [1] : vector<8x8xf32> to vector<8xf32>
    %688 = vector.shape_cast %687 : vector<8xf32> to vector<8x1xf32>
    %689 = vector.broadcast %688 : vector<8x1xf32> to vector<8x8xf32>
    %690 = arith.divf %686, %689 : vector<8x8xf32>
    %691 = vector.extract_strided_slice %674 {offsets = [0, 0], sizes = [8, 8], strides = [1, 1]} : vector<8x32xf32> to vector<8x8xf32>
    %cst_229 = arith.constant dense<0.000000e+00> : vector<8x8xf32>
    %692 = tpu.matmul %690, %691, %cst_229 {dimension_numbers = #tpu.dot_dimension_numbers<[1], [0], [0], [1], [0, 0, 1, 1], [], []>} : vector<8x8xf32>, vector<8x8xf32>, vector<8x8xf32> -> vector<8x8xf32>
    %693 = vector.extract_strided_slice %675 {offsets = [0, 0], sizes = [8, 32], strides = [1, 1]} : vector<32x32xf32> to vector<8x32xf32>
    %cst_230 = arith.constant dense<0.000000e+00> : vector<8x32xf32>
    %694 = tpu.matmul %692, %693, %cst_230 {dimension_numbers = #tpu.dot_dimension_numbers<[1], [0], [0], [1], [0, 0, 1, 1], [], []>} : vector<8x8xf32>, vector<8x32xf32>, vector<8x32xf32> -> vector<8x32xf32>
    %695 = vector.extract_strided_slice %672 {offsets = [0, 8], sizes = [8, 8], strides = [1, 1]} : vector<8x32xf32> to vector<8x8xf32>
    %696 = vector.extract_strided_slice %673 {offsets = [0, 8], sizes = [8, 8], strides = [1, 1]} : vector<8x32xf32> to vector<8x8xf32>
    %cst_231 = arith.constant dense<0.000000e+00> : vector<8x8xf32>
    %697 = tpu.matmul %695, %696, %cst_231 {dimension_numbers = #tpu.dot_dimension_numbers<[1], [1], [0], [0], [0, 0, 1, 0], [], []>} : vector<8x8xf32>, vector<8x8xf32>, vector<8x8xf32> -> vector<8x8xf32>
    %cst_232 = arith.constant 0.353553385 : f32
    %698 = vector.broadcast %cst_232 : f32 to vector<8x8xf32>
    %699 = arith.mulf %697, %698 : vector<8x8xf32>
    %700 = arith.addf %699, %3 : vector<8x8xf32>
    %cst_233 = arith.constant dense<0xFF800000> : vector<8xf32>
    %701 = vector.multi_reduction <maximumf>, %700, %cst_233 [1] : vector<8x8xf32> to vector<8xf32>
    %702 = vector.shape_cast %701 : vector<8xf32> to vector<8x1xf32>
    %703 = vector.broadcast %702 : vector<8x1xf32> to vector<8x8xf32>
    %704 = arith.subf %700, %703 : vector<8x8xf32>
    %705 = math.exp %704 : vector<8x8xf32>
    %cst_234 = arith.constant dense<0.000000e+00> : vector<8xf32>
    %706 = vector.multi_reduction <add>, %705, %cst_234 [1] : vector<8x8xf32> to vector<8xf32>
    %707 = vector.shape_cast %706 : vector<8xf32> to vector<8x1xf32>
    %708 = vector.broadcast %707 : vector<8x1xf32> to vector<8x8xf32>
    %709 = arith.divf %705, %708 : vector<8x8xf32>
    %710 = vector.extract_strided_slice %674 {offsets = [0, 8], sizes = [8, 8], strides = [1, 1]} : vector<8x32xf32> to vector<8x8xf32>
    %cst_235 = arith.constant dense<0.000000e+00> : vector<8x8xf32>
    %711 = tpu.matmul %709, %710, %cst_235 {dimension_numbers = #tpu.dot_dimension_numbers<[1], [0], [0], [1], [0, 0, 1, 1], [], []>} : vector<8x8xf32>, vector<8x8xf32>, vector<8x8xf32> -> vector<8x8xf32>
    %712 = vector.extract_strided_slice %675 {offsets = [8, 0], sizes = [8, 32], strides = [1, 1]} : vector<32x32xf32> to vector<8x32xf32>
    %cst_236 = arith.constant dense<0.000000e+00> : vector<8x32xf32>
    %713 = tpu.matmul %711, %712, %cst_236 {dimension_numbers = #tpu.dot_dimension_numbers<[1], [0], [0], [1], [0, 0, 1, 1], [], []>} : vector<8x8xf32>, vector<8x32xf32>, vector<8x32xf32> -> vector<8x32xf32>
    %714 = arith.addf %694, %713 : vector<8x32xf32>
    %715 = vector.extract_strided_slice %672 {offsets = [0, 16], sizes = [8, 8], strides = [1, 1]} : vector<8x32xf32> to vector<8x8xf32>
    %716 = vector.extract_strided_slice %673 {offsets = [0, 16], sizes = [8, 8], strides = [1, 1]} : vector<8x32xf32> to vector<8x8xf32>
    %cst_237 = arith.constant dense<0.000000e+00> : vector<8x8xf32>
    %717 = tpu.matmul %715, %716, %cst_237 {dimension_numbers = #tpu.dot_dimension_numbers<[1], [1], [0], [0], [0, 0, 1, 0], [], []>} : vector<8x8xf32>, vector<8x8xf32>, vector<8x8xf32> -> vector<8x8xf32>
    %cst_238 = arith.constant 0.353553385 : f32
    %718 = vector.broadcast %cst_238 : f32 to vector<8x8xf32>
    %719 = arith.mulf %717, %718 : vector<8x8xf32>
    %720 = arith.addf %719, %3 : vector<8x8xf32>
    %cst_239 = arith.constant dense<0xFF800000> : vector<8xf32>
    %721 = vector.multi_reduction <maximumf>, %720, %cst_239 [1] : vector<8x8xf32> to vector<8xf32>
    %722 = vector.shape_cast %721 : vector<8xf32> to vector<8x1xf32>
    %723 = vector.broadcast %722 : vector<8x1xf32> to vector<8x8xf32>
    %724 = arith.subf %720, %723 : vector<8x8xf32>
    %725 = math.exp %724 : vector<8x8xf32>
    %cst_240 = arith.constant dense<0.000000e+00> : vector<8xf32>
    %726 = vector.multi_reduction <add>, %725, %cst_240 [1] : vector<8x8xf32> to vector<8xf32>
    %727 = vector.shape_cast %726 : vector<8xf32> to vector<8x1xf32>
    %728 = vector.broadcast %727 : vector<8x1xf32> to vector<8x8xf32>
    %729 = arith.divf %725, %728 : vector<8x8xf32>
    %730 = vector.extract_strided_slice %674 {offsets = [0, 16], sizes = [8, 8], strides = [1, 1]} : vector<8x32xf32> to vector<8x8xf32>
    %cst_241 = arith.constant dense<0.000000e+00> : vector<8x8xf32>
    %731 = tpu.matmul %729, %730, %cst_241 {dimension_numbers = #tpu.dot_dimension_numbers<[1], [0], [0], [1], [0, 0, 1, 1], [], []>} : vector<8x8xf32>, vector<8x8xf32>, vector<8x8xf32> -> vector<8x8xf32>
    %732 = vector.extract_strided_slice %675 {offsets = [16, 0], sizes = [8, 32], strides = [1, 1]} : vector<32x32xf32> to vector<8x32xf32>
    %cst_242 = arith.constant dense<0.000000e+00> : vector<8x32xf32>
    %733 = tpu.matmul %731, %732, %cst_242 {dimension_numbers = #tpu.dot_dimension_numbers<[1], [0], [0], [1], [0, 0, 1, 1], [], []>} : vector<8x8xf32>, vector<8x32xf32>, vector<8x32xf32> -> vector<8x32xf32>
    %734 = arith.addf %714, %733 : vector<8x32xf32>
    %735 = vector.extract_strided_slice %672 {offsets = [0, 24], sizes = [8, 8], strides = [1, 1]} : vector<8x32xf32> to vector<8x8xf32>
    %736 = vector.extract_strided_slice %673 {offsets = [0, 24], sizes = [8, 8], strides = [1, 1]} : vector<8x32xf32> to vector<8x8xf32>
    %cst_243 = arith.constant dense<0.000000e+00> : vector<8x8xf32>
    %737 = tpu.matmul %735, %736, %cst_243 {dimension_numbers = #tpu.dot_dimension_numbers<[1], [1], [0], [0], [0, 0, 1, 0], [], []>} : vector<8x8xf32>, vector<8x8xf32>, vector<8x8xf32> -> vector<8x8xf32>
    %cst_244 = arith.constant 0.353553385 : f32
    %738 = vector.broadcast %cst_244 : f32 to vector<8x8xf32>
    %739 = arith.mulf %737, %738 : vector<8x8xf32>
    %740 = arith.addf %739, %3 : vector<8x8xf32>
    %cst_245 = arith.constant dense<0xFF800000> : vector<8xf32>
    %741 = vector.multi_reduction <maximumf>, %740, %cst_245 [1] : vector<8x8xf32> to vector<8xf32>
    %742 = vector.shape_cast %741 : vector<8xf32> to vector<8x1xf32>
    %743 = vector.broadcast %742 : vector<8x1xf32> to vector<8x8xf32>
    %744 = arith.subf %740, %743 : vector<8x8xf32>
    %745 = math.exp %744 : vector<8x8xf32>
    %cst_246 = arith.constant dense<0.000000e+00> : vector<8xf32>
    %746 = vector.multi_reduction <add>, %745, %cst_246 [1] : vector<8x8xf32> to vector<8xf32>
    %747 = vector.shape_cast %746 : vector<8xf32> to vector<8x1xf32>
    %748 = vector.broadcast %747 : vector<8x1xf32> to vector<8x8xf32>
    %749 = arith.divf %745, %748 : vector<8x8xf32>
    %750 = vector.extract_strided_slice %674 {offsets = [0, 24], sizes = [8, 8], strides = [1, 1]} : vector<8x32xf32> to vector<8x8xf32>
    %cst_247 = arith.constant dense<0.000000e+00> : vector<8x8xf32>
    %751 = tpu.matmul %749, %750, %cst_247 {dimension_numbers = #tpu.dot_dimension_numbers<[1], [0], [0], [1], [0, 0, 1, 1], [], []>} : vector<8x8xf32>, vector<8x8xf32>, vector<8x8xf32> -> vector<8x8xf32>
    %752 = vector.extract_strided_slice %675 {offsets = [24, 0], sizes = [8, 32], strides = [1, 1]} : vector<32x32xf32> to vector<8x32xf32>
    %cst_248 = arith.constant dense<0.000000e+00> : vector<8x32xf32>
    %753 = tpu.matmul %751, %752, %cst_248 {dimension_numbers = #tpu.dot_dimension_numbers<[1], [0], [0], [1], [0, 0, 1, 1], [], []>} : vector<8x8xf32>, vector<8x32xf32>, vector<8x32xf32> -> vector<8x32xf32>
    %754 = arith.addf %734, %753 : vector<8x32xf32>
    %c880 = arith.constant 880 : index
    %c0_249 = arith.constant 0 : index
    %755 = vector.load %arg5[%c880, %c0_249] : memref<1240x128xf32, #tpu.memory_space<vmem>>, vector<1x32xf32>
    %756 = vector.broadcast %755 : vector<1x32xf32> to vector<8x32xf32>
    %757 = arith.addf %754, %756 : vector<8x32xf32>
    %758 = arith.addf %642, %757 : vector<8x32xf32>
    %cst_250 = arith.constant dense<0.000000e+00> : vector<8xf32>
    %759 = vector.multi_reduction <add>, %758, %cst_250 [1] : vector<8x32xf32> to vector<8xf32>
    %760 = vector.shape_cast %759 : vector<8xf32> to vector<8x1xf32>
    %cst_251 = arith.constant 3.200000e+01 : f32
    %761 = vector.broadcast %cst_251 : f32 to vector<8x1xf32>
    %762 = arith.divf %760, %761 : vector<8x1xf32>
    %763 = vector.broadcast %762 : vector<8x1xf32> to vector<8x32xf32>
    %764 = arith.subf %758, %763 : vector<8x32xf32>
    %765 = arith.mulf %764, %764 : vector<8x32xf32>
    %cst_252 = arith.constant dense<0.000000e+00> : vector<8xf32>
    %766 = vector.multi_reduction <add>, %765, %cst_252 [1] : vector<8x32xf32> to vector<8xf32>
    %767 = vector.shape_cast %766 : vector<8xf32> to vector<8x1xf32>
    %cst_253 = arith.constant 3.100000e+01 : f32
    %768 = vector.broadcast %cst_253 : f32 to vector<8x1xf32>
    %769 = arith.divf %767, %768 : vector<8x1xf32>
    %c1136 = arith.constant 1136 : index
    %c0_254 = arith.constant 0 : index
    %770 = vector.load %arg5[%c1136, %c0_254] : memref<1240x128xf32, #tpu.memory_space<vmem>>, vector<1x32xf32>
    %771 = vector.broadcast %762 : vector<8x1xf32> to vector<8x32xf32>
    %772 = arith.subf %758, %771 : vector<8x32xf32>
    %773 = vector.broadcast %770 : vector<1x32xf32> to vector<8x32xf32>
    %774 = arith.mulf %773, %772 : vector<8x32xf32>
    %775 = math.sqrt %769 : vector<8x1xf32>
    %cst_255 = arith.constant 9.99999997E-7 : f32
    %776 = vector.broadcast %cst_255 : f32 to vector<8x1xf32>
    %777 = arith.addf %775, %776 : vector<8x1xf32>
    %778 = vector.broadcast %777 : vector<8x1xf32> to vector<8x32xf32>
    %779 = arith.divf %774, %778 : vector<8x32xf32>
    %c1144 = arith.constant 1144 : index
    %c0_256 = arith.constant 0 : index
    %780 = vector.load %arg5[%c1144, %c0_256] : memref<1240x128xf32, #tpu.memory_space<vmem>>, vector<1x32xf32>
    %781 = vector.broadcast %780 : vector<1x32xf32> to vector<8x32xf32>
    %782 = arith.addf %779, %781 : vector<8x32xf32>
    %c888 = arith.constant 888 : index
    %c0_257 = arith.constant 0 : index
    %783 = vector.load %arg5[%c888, %c0_257] : memref<1240x128xf32, #tpu.memory_space<vmem>>, vector<32x32xf32>
    %cst_258 = arith.constant dense<0.000000e+00> : vector<8x32xf32>
    %784 = tpu.matmul %782, %783, %cst_258 {dimension_numbers = #tpu.dot_dimension_numbers<[1], [0], [0], [1], [0, 0, 1, 1], [], []>} : vector<8x32xf32>, vector<32x32xf32>, vector<8x32xf32> -> vector<8x32xf32>
    %c920 = arith.constant 920 : index
    %c0_259 = arith.constant 0 : index
    %785 = vector.load %arg5[%c920, %c0_259] : memref<1240x128xf32, #tpu.memory_space<vmem>>, vector<1x32xf32>
    %786 = vector.broadcast %785 : vector<1x32xf32> to vector<8x32xf32>
    %787 = arith.addf %784, %786 : vector<8x32xf32>
    %c928 = arith.constant 928 : index
    %c0_260 = arith.constant 0 : index
    %788 = vector.load %arg5[%c928, %c0_260] : memref<1240x128xf32, #tpu.memory_space<vmem>>, vector<32x64xf32>
    %cst_261 = arith.constant dense<0.000000e+00> : vector<8x64xf32>
    %789 = tpu.matmul %353, %788, %cst_261 {dimension_numbers = #tpu.dot_dimension_numbers<[1], [0], [0], [1], [0, 0, 1, 1], [], []>} : vector<8x32xf32>, vector<32x64xf32>, vector<8x64xf32> -> vector<8x64xf32>
    %c960 = arith.constant 960 : index
    %c0_262 = arith.constant 0 : index
    %790 = vector.load %arg5[%c960, %c0_262] : memref<1240x128xf32, #tpu.memory_space<vmem>>, vector<1x64xf32>
    %791 = vector.broadcast %790 : vector<1x64xf32> to vector<8x64xf32>
    %792 = arith.addf %789, %791 : vector<8x64xf32>
    %793 = vector.extract_strided_slice %792 {offsets = [0, 0], sizes = [8, 32], strides = [1, 1]} : vector<8x64xf32> to vector<8x32xf32>
    %794 = vector.extract_strided_slice %792 {offsets = [0, 32], sizes = [8, 32], strides = [1, 1]} : vector<8x64xf32> to vector<8x32xf32>
    %c968 = arith.constant 968 : index
    %c0_263 = arith.constant 0 : index
    %795 = vector.load %arg5[%c968, %c0_263] : memref<1240x128xf32, #tpu.memory_space<vmem>>, vector<32x32xf32>
    %796 = vector.extract_strided_slice %787 {offsets = [0, 0], sizes = [8, 8], strides = [1, 1]} : vector<8x32xf32> to vector<8x8xf32>
    %797 = vector.extract_strided_slice %793 {offsets = [0, 0], sizes = [8, 8], strides = [1, 1]} : vector<8x32xf32> to vector<8x8xf32>
    %cst_264 = arith.constant dense<0.000000e+00> : vector<8x8xf32>
    %798 = tpu.matmul %796, %797, %cst_264 {dimension_numbers = #tpu.dot_dimension_numbers<[1], [1], [0], [0], [0, 0, 1, 0], [], []>} : vector<8x8xf32>, vector<8x8xf32>, vector<8x8xf32> -> vector<8x8xf32>
    %cst_265 = arith.constant 0.353553385 : f32
    %799 = vector.broadcast %cst_265 : f32 to vector<8x8xf32>
    %800 = arith.mulf %798, %799 : vector<8x8xf32>
    %801 = vector.broadcast %1 : vector<1x8xf32> to vector<8x8xf32>
    %802 = arith.addf %800, %801 : vector<8x8xf32>
    %cst_266 = arith.constant dense<0xFF800000> : vector<8xf32>
    %803 = vector.multi_reduction <maximumf>, %802, %cst_266 [1] : vector<8x8xf32> to vector<8xf32>
    %804 = vector.shape_cast %803 : vector<8xf32> to vector<8x1xf32>
    %805 = vector.broadcast %804 : vector<8x1xf32> to vector<8x8xf32>
    %806 = arith.subf %802, %805 : vector<8x8xf32>
    %807 = math.exp %806 : vector<8x8xf32>
    %cst_267 = arith.constant dense<0.000000e+00> : vector<8xf32>
    %808 = vector.multi_reduction <add>, %807, %cst_267 [1] : vector<8x8xf32> to vector<8xf32>
    %809 = vector.shape_cast %808 : vector<8xf32> to vector<8x1xf32>
    %810 = vector.broadcast %809 : vector<8x1xf32> to vector<8x8xf32>
    %811 = arith.divf %807, %810 : vector<8x8xf32>
    %812 = vector.extract_strided_slice %794 {offsets = [0, 0], sizes = [8, 8], strides = [1, 1]} : vector<8x32xf32> to vector<8x8xf32>
    %cst_268 = arith.constant dense<0.000000e+00> : vector<8x8xf32>
    %813 = tpu.matmul %811, %812, %cst_268 {dimension_numbers = #tpu.dot_dimension_numbers<[1], [0], [0], [1], [0, 0, 1, 1], [], []>} : vector<8x8xf32>, vector<8x8xf32>, vector<8x8xf32> -> vector<8x8xf32>
    %814 = vector.extract_strided_slice %795 {offsets = [0, 0], sizes = [8, 32], strides = [1, 1]} : vector<32x32xf32> to vector<8x32xf32>
    %cst_269 = arith.constant dense<0.000000e+00> : vector<8x32xf32>
    %815 = tpu.matmul %813, %814, %cst_269 {dimension_numbers = #tpu.dot_dimension_numbers<[1], [0], [0], [1], [0, 0, 1, 1], [], []>} : vector<8x8xf32>, vector<8x32xf32>, vector<8x32xf32> -> vector<8x32xf32>
    %816 = vector.extract_strided_slice %787 {offsets = [0, 8], sizes = [8, 8], strides = [1, 1]} : vector<8x32xf32> to vector<8x8xf32>
    %817 = vector.extract_strided_slice %793 {offsets = [0, 8], sizes = [8, 8], strides = [1, 1]} : vector<8x32xf32> to vector<8x8xf32>
    %cst_270 = arith.constant dense<0.000000e+00> : vector<8x8xf32>
    %818 = tpu.matmul %816, %817, %cst_270 {dimension_numbers = #tpu.dot_dimension_numbers<[1], [1], [0], [0], [0, 0, 1, 0], [], []>} : vector<8x8xf32>, vector<8x8xf32>, vector<8x8xf32> -> vector<8x8xf32>
    %cst_271 = arith.constant 0.353553385 : f32
    %819 = vector.broadcast %cst_271 : f32 to vector<8x8xf32>
    %820 = arith.mulf %818, %819 : vector<8x8xf32>
    %821 = vector.broadcast %1 : vector<1x8xf32> to vector<8x8xf32>
    %822 = arith.addf %820, %821 : vector<8x8xf32>
    %cst_272 = arith.constant dense<0xFF800000> : vector<8xf32>
    %823 = vector.multi_reduction <maximumf>, %822, %cst_272 [1] : vector<8x8xf32> to vector<8xf32>
    %824 = vector.shape_cast %823 : vector<8xf32> to vector<8x1xf32>
    %825 = vector.broadcast %824 : vector<8x1xf32> to vector<8x8xf32>
    %826 = arith.subf %822, %825 : vector<8x8xf32>
    %827 = math.exp %826 : vector<8x8xf32>
    %cst_273 = arith.constant dense<0.000000e+00> : vector<8xf32>
    %828 = vector.multi_reduction <add>, %827, %cst_273 [1] : vector<8x8xf32> to vector<8xf32>
    %829 = vector.shape_cast %828 : vector<8xf32> to vector<8x1xf32>
    %830 = vector.broadcast %829 : vector<8x1xf32> to vector<8x8xf32>
    %831 = arith.divf %827, %830 : vector<8x8xf32>
    %832 = vector.extract_strided_slice %794 {offsets = [0, 8], sizes = [8, 8], strides = [1, 1]} : vector<8x32xf32> to vector<8x8xf32>
    %cst_274 = arith.constant dense<0.000000e+00> : vector<8x8xf32>
    %833 = tpu.matmul %831, %832, %cst_274 {dimension_numbers = #tpu.dot_dimension_numbers<[1], [0], [0], [1], [0, 0, 1, 1], [], []>} : vector<8x8xf32>, vector<8x8xf32>, vector<8x8xf32> -> vector<8x8xf32>
    %834 = vector.extract_strided_slice %795 {offsets = [8, 0], sizes = [8, 32], strides = [1, 1]} : vector<32x32xf32> to vector<8x32xf32>
    %cst_275 = arith.constant dense<0.000000e+00> : vector<8x32xf32>
    %835 = tpu.matmul %833, %834, %cst_275 {dimension_numbers = #tpu.dot_dimension_numbers<[1], [0], [0], [1], [0, 0, 1, 1], [], []>} : vector<8x8xf32>, vector<8x32xf32>, vector<8x32xf32> -> vector<8x32xf32>
    %836 = arith.addf %815, %835 : vector<8x32xf32>
    %837 = vector.extract_strided_slice %787 {offsets = [0, 16], sizes = [8, 8], strides = [1, 1]} : vector<8x32xf32> to vector<8x8xf32>
    %838 = vector.extract_strided_slice %793 {offsets = [0, 16], sizes = [8, 8], strides = [1, 1]} : vector<8x32xf32> to vector<8x8xf32>
    %cst_276 = arith.constant dense<0.000000e+00> : vector<8x8xf32>
    %839 = tpu.matmul %837, %838, %cst_276 {dimension_numbers = #tpu.dot_dimension_numbers<[1], [1], [0], [0], [0, 0, 1, 0], [], []>} : vector<8x8xf32>, vector<8x8xf32>, vector<8x8xf32> -> vector<8x8xf32>
    %cst_277 = arith.constant 0.353553385 : f32
    %840 = vector.broadcast %cst_277 : f32 to vector<8x8xf32>
    %841 = arith.mulf %839, %840 : vector<8x8xf32>
    %842 = vector.broadcast %1 : vector<1x8xf32> to vector<8x8xf32>
    %843 = arith.addf %841, %842 : vector<8x8xf32>
    %cst_278 = arith.constant dense<0xFF800000> : vector<8xf32>
    %844 = vector.multi_reduction <maximumf>, %843, %cst_278 [1] : vector<8x8xf32> to vector<8xf32>
    %845 = vector.shape_cast %844 : vector<8xf32> to vector<8x1xf32>
    %846 = vector.broadcast %845 : vector<8x1xf32> to vector<8x8xf32>
    %847 = arith.subf %843, %846 : vector<8x8xf32>
    %848 = math.exp %847 : vector<8x8xf32>
    %cst_279 = arith.constant dense<0.000000e+00> : vector<8xf32>
    %849 = vector.multi_reduction <add>, %848, %cst_279 [1] : vector<8x8xf32> to vector<8xf32>
    %850 = vector.shape_cast %849 : vector<8xf32> to vector<8x1xf32>
    %851 = vector.broadcast %850 : vector<8x1xf32> to vector<8x8xf32>
    %852 = arith.divf %848, %851 : vector<8x8xf32>
    %853 = vector.extract_strided_slice %794 {offsets = [0, 16], sizes = [8, 8], strides = [1, 1]} : vector<8x32xf32> to vector<8x8xf32>
    %cst_280 = arith.constant dense<0.000000e+00> : vector<8x8xf32>
    %854 = tpu.matmul %852, %853, %cst_280 {dimension_numbers = #tpu.dot_dimension_numbers<[1], [0], [0], [1], [0, 0, 1, 1], [], []>} : vector<8x8xf32>, vector<8x8xf32>, vector<8x8xf32> -> vector<8x8xf32>
    %855 = vector.extract_strided_slice %795 {offsets = [16, 0], sizes = [8, 32], strides = [1, 1]} : vector<32x32xf32> to vector<8x32xf32>
    %cst_281 = arith.constant dense<0.000000e+00> : vector<8x32xf32>
    %856 = tpu.matmul %854, %855, %cst_281 {dimension_numbers = #tpu.dot_dimension_numbers<[1], [0], [0], [1], [0, 0, 1, 1], [], []>} : vector<8x8xf32>, vector<8x32xf32>, vector<8x32xf32> -> vector<8x32xf32>
    %857 = arith.addf %836, %856 : vector<8x32xf32>
    %858 = vector.extract_strided_slice %787 {offsets = [0, 24], sizes = [8, 8], strides = [1, 1]} : vector<8x32xf32> to vector<8x8xf32>
    %859 = vector.extract_strided_slice %793 {offsets = [0, 24], sizes = [8, 8], strides = [1, 1]} : vector<8x32xf32> to vector<8x8xf32>
    %cst_282 = arith.constant dense<0.000000e+00> : vector<8x8xf32>
    %860 = tpu.matmul %858, %859, %cst_282 {dimension_numbers = #tpu.dot_dimension_numbers<[1], [1], [0], [0], [0, 0, 1, 0], [], []>} : vector<8x8xf32>, vector<8x8xf32>, vector<8x8xf32> -> vector<8x8xf32>
    %cst_283 = arith.constant 0.353553385 : f32
    %861 = vector.broadcast %cst_283 : f32 to vector<8x8xf32>
    %862 = arith.mulf %860, %861 : vector<8x8xf32>
    %863 = vector.broadcast %1 : vector<1x8xf32> to vector<8x8xf32>
    %864 = arith.addf %862, %863 : vector<8x8xf32>
    %cst_284 = arith.constant dense<0xFF800000> : vector<8xf32>
    %865 = vector.multi_reduction <maximumf>, %864, %cst_284 [1] : vector<8x8xf32> to vector<8xf32>
    %866 = vector.shape_cast %865 : vector<8xf32> to vector<8x1xf32>
    %867 = vector.broadcast %866 : vector<8x1xf32> to vector<8x8xf32>
    %868 = arith.subf %864, %867 : vector<8x8xf32>
    %869 = math.exp %868 : vector<8x8xf32>
    %cst_285 = arith.constant dense<0.000000e+00> : vector<8xf32>
    %870 = vector.multi_reduction <add>, %869, %cst_285 [1] : vector<8x8xf32> to vector<8xf32>
    %871 = vector.shape_cast %870 : vector<8xf32> to vector<8x1xf32>
    %872 = vector.broadcast %871 : vector<8x1xf32> to vector<8x8xf32>
    %873 = arith.divf %869, %872 : vector<8x8xf32>
    %874 = vector.extract_strided_slice %794 {offsets = [0, 24], sizes = [8, 8], strides = [1, 1]} : vector<8x32xf32> to vector<8x8xf32>
    %cst_286 = arith.constant dense<0.000000e+00> : vector<8x8xf32>
    %875 = tpu.matmul %873, %874, %cst_286 {dimension_numbers = #tpu.dot_dimension_numbers<[1], [0], [0], [1], [0, 0, 1, 1], [], []>} : vector<8x8xf32>, vector<8x8xf32>, vector<8x8xf32> -> vector<8x8xf32>
    %876 = vector.extract_strided_slice %795 {offsets = [24, 0], sizes = [8, 32], strides = [1, 1]} : vector<32x32xf32> to vector<8x32xf32>
    %cst_287 = arith.constant dense<0.000000e+00> : vector<8x32xf32>
    %877 = tpu.matmul %875, %876, %cst_287 {dimension_numbers = #tpu.dot_dimension_numbers<[1], [0], [0], [1], [0, 0, 1, 1], [], []>} : vector<8x8xf32>, vector<8x32xf32>, vector<8x32xf32> -> vector<8x32xf32>
    %878 = arith.addf %857, %877 : vector<8x32xf32>
    %c1000 = arith.constant 1000 : index
    %c0_288 = arith.constant 0 : index
    %879 = vector.load %arg5[%c1000, %c0_288] : memref<1240x128xf32, #tpu.memory_space<vmem>>, vector<1x32xf32>
    %880 = vector.broadcast %879 : vector<1x32xf32> to vector<8x32xf32>
    %881 = arith.addf %878, %880 : vector<8x32xf32>
    %882 = arith.addf %758, %881 : vector<8x32xf32>
    %cst_289 = arith.constant dense<0.000000e+00> : vector<8xf32>
    %883 = vector.multi_reduction <add>, %882, %cst_289 [1] : vector<8x32xf32> to vector<8xf32>
    %884 = vector.shape_cast %883 : vector<8xf32> to vector<8x1xf32>
    %cst_290 = arith.constant 3.200000e+01 : f32
    %885 = vector.broadcast %cst_290 : f32 to vector<8x1xf32>
    %886 = arith.divf %884, %885 : vector<8x1xf32>
    %887 = vector.broadcast %886 : vector<8x1xf32> to vector<8x32xf32>
    %888 = arith.subf %882, %887 : vector<8x32xf32>
    %889 = arith.mulf %888, %888 : vector<8x32xf32>
    %cst_291 = arith.constant dense<0.000000e+00> : vector<8xf32>
    %890 = vector.multi_reduction <add>, %889, %cst_291 [1] : vector<8x32xf32> to vector<8xf32>
    %891 = vector.shape_cast %890 : vector<8xf32> to vector<8x1xf32>
    %cst_292 = arith.constant 3.100000e+01 : f32
    %892 = vector.broadcast %cst_292 : f32 to vector<8x1xf32>
    %893 = arith.divf %891, %892 : vector<8x1xf32>
    %c1152 = arith.constant 1152 : index
    %c0_293 = arith.constant 0 : index
    %894 = vector.load %arg5[%c1152, %c0_293] : memref<1240x128xf32, #tpu.memory_space<vmem>>, vector<1x32xf32>
    %895 = vector.broadcast %886 : vector<8x1xf32> to vector<8x32xf32>
    %896 = arith.subf %882, %895 : vector<8x32xf32>
    %897 = vector.broadcast %894 : vector<1x32xf32> to vector<8x32xf32>
    %898 = arith.mulf %897, %896 : vector<8x32xf32>
    %899 = math.sqrt %893 : vector<8x1xf32>
    %cst_294 = arith.constant 9.99999997E-7 : f32
    %900 = vector.broadcast %cst_294 : f32 to vector<8x1xf32>
    %901 = arith.addf %899, %900 : vector<8x1xf32>
    %902 = vector.broadcast %901 : vector<8x1xf32> to vector<8x32xf32>
    %903 = arith.divf %898, %902 : vector<8x32xf32>
    %c1160 = arith.constant 1160 : index
    %c0_295 = arith.constant 0 : index
    %904 = vector.load %arg5[%c1160, %c0_295] : memref<1240x128xf32, #tpu.memory_space<vmem>>, vector<1x32xf32>
    %905 = vector.broadcast %904 : vector<1x32xf32> to vector<8x32xf32>
    %906 = arith.addf %903, %905 : vector<8x32xf32>
    %c1008 = arith.constant 1008 : index
    %c0_296 = arith.constant 0 : index
    %907 = vector.load %arg5[%c1008, %c0_296] : memref<1240x128xf32, #tpu.memory_space<vmem>>, vector<32x64xf32>
    %cst_297 = arith.constant dense<0.000000e+00> : vector<8x64xf32>
    %908 = tpu.matmul %906, %907, %cst_297 {dimension_numbers = #tpu.dot_dimension_numbers<[1], [0], [0], [1], [0, 0, 1, 1], [], []>} : vector<8x32xf32>, vector<32x64xf32>, vector<8x64xf32> -> vector<8x64xf32>
    %c1040 = arith.constant 1040 : index
    %c0_298 = arith.constant 0 : index
    %909 = vector.load %arg5[%c1040, %c0_298] : memref<1240x128xf32, #tpu.memory_space<vmem>>, vector<1x64xf32>
    %910 = vector.broadcast %909 : vector<1x64xf32> to vector<8x64xf32>
    %911 = arith.addf %908, %910 : vector<8x64xf32>
    %cst_299 = arith.constant 0.000000e+00 : f32
    %912 = vector.broadcast %cst_299 : f32 to vector<8x64xf32>
    %913 = arith.maximumf %911, %912 : vector<8x64xf32>
    %c1048 = arith.constant 1048 : index
    %c0_300 = arith.constant 0 : index
    %914 = vector.load %arg5[%c1048, %c0_300] : memref<1240x128xf32, #tpu.memory_space<vmem>>, vector<64x32xf32>
    %cst_301 = arith.constant dense<0.000000e+00> : vector<8x32xf32>
    %915 = tpu.matmul %913, %914, %cst_301 {dimension_numbers = #tpu.dot_dimension_numbers<[1], [0], [0], [1], [0, 0, 1, 1], [], []>} : vector<8x64xf32>, vector<64x32xf32>, vector<8x32xf32> -> vector<8x32xf32>
    %c1112 = arith.constant 1112 : index
    %c0_302 = arith.constant 0 : index
    %916 = vector.load %arg5[%c1112, %c0_302] : memref<1240x128xf32, #tpu.memory_space<vmem>>, vector<1x32xf32>
    %917 = vector.broadcast %916 : vector<1x32xf32> to vector<8x32xf32>
    %918 = arith.addf %915, %917 : vector<8x32xf32>
    %919 = arith.addf %882, %918 : vector<8x32xf32>
    %cst_303 = arith.constant dense<0.000000e+00> : vector<8xf32>
    %920 = vector.multi_reduction <add>, %919, %cst_303 [1] : vector<8x32xf32> to vector<8xf32>
    %921 = vector.shape_cast %920 : vector<8xf32> to vector<8x1xf32>
    %cst_304 = arith.constant 3.200000e+01 : f32
    %922 = vector.broadcast %cst_304 : f32 to vector<8x1xf32>
    %923 = arith.divf %921, %922 : vector<8x1xf32>
    %924 = vector.broadcast %923 : vector<8x1xf32> to vector<8x32xf32>
    %925 = arith.subf %919, %924 : vector<8x32xf32>
    %926 = arith.mulf %925, %925 : vector<8x32xf32>
    %cst_305 = arith.constant dense<0.000000e+00> : vector<8xf32>
    %927 = vector.multi_reduction <add>, %926, %cst_305 [1] : vector<8x32xf32> to vector<8xf32>
    %928 = vector.shape_cast %927 : vector<8xf32> to vector<8x1xf32>
    %cst_306 = arith.constant 3.100000e+01 : f32
    %929 = vector.broadcast %cst_306 : f32 to vector<8x1xf32>
    %930 = arith.divf %928, %929 : vector<8x1xf32>
    %c1184 = arith.constant 1184 : index
    %c0_307 = arith.constant 0 : index
    %931 = vector.load %arg5[%c1184, %c0_307] : memref<1240x128xf32, #tpu.memory_space<vmem>>, vector<1x32xf32>
    %932 = vector.broadcast %923 : vector<8x1xf32> to vector<8x32xf32>
    %933 = arith.subf %919, %932 : vector<8x32xf32>
    %934 = vector.broadcast %931 : vector<1x32xf32> to vector<8x32xf32>
    %935 = arith.mulf %934, %933 : vector<8x32xf32>
    %936 = math.sqrt %930 : vector<8x1xf32>
    %cst_308 = arith.constant 9.99999997E-7 : f32
    %937 = vector.broadcast %cst_308 : f32 to vector<8x1xf32>
    %938 = arith.addf %936, %937 : vector<8x1xf32>
    %939 = vector.broadcast %938 : vector<8x1xf32> to vector<8x32xf32>
    %940 = arith.divf %935, %939 : vector<8x32xf32>
    %c1192 = arith.constant 1192 : index
    %c0_309 = arith.constant 0 : index
    %941 = vector.load %arg5[%c1192, %c0_309] : memref<1240x128xf32, #tpu.memory_space<vmem>>, vector<1x32xf32>
    %942 = vector.broadcast %941 : vector<1x32xf32> to vector<8x32xf32>
    %943 = arith.addf %940, %942 : vector<8x32xf32>
    %c0_310 = arith.constant 0 : index
    %c0_311 = arith.constant 0 : index
    %944 = vector.load %arg6[%c0_310, %c0_311] : memref<8x32xf32, #tpu.memory_space<vmem>>, vector<8x32xf32>
    tpu.vector_store %arg6[%c0_310, %c0_311], %943 {strides = array<i32>} : memref<8x32xf32, #tpu.memory_space<vmem>>, vector<8x32xf32>,
    return
  }
  func.func @transform_0(%arg0: i32) -> (i32, i32) {
    %c0_i32 = arith.constant 0 : i32
    %c0_i32_0 = arith.constant 0 : i32
    return %arg0, %c0_i32 : i32, i32
  }
  func.func @transform_1(%arg0: i32) -> (i32, i32) {
    %c0_i32 = arith.constant 0 : i32
    %c0_i32_0 = arith.constant 0 : i32
    return %arg0, %c0_i32 : i32, i32
  }
  func.func @transform_2(%arg0: i32) -> (i32, i32, i32) {
    %c0_i32 = arith.constant 0 : i32
    %c0_i32_0 = arith.constant 0 : i32
    %c0_i32_1 = arith.constant 0 : i32
    return %arg0, %c0_i32, %c0_i32_0 : i32, i32, i32
  }
  func.func @transform_3(%arg0: i32) -> (i32, i32, i32) {
    %c0_i32 = arith.constant 0 : i32
    %c0_i32_0 = arith.constant 0 : i32
    %c0_i32_1 = arith.constant 0 : i32
    return %arg0, %c0_i32, %c0_i32_0 : i32, i32, i32
  }
  func.func @transform_4(%arg0: i32) -> (i32, i32) {
    %c0_i32 = arith.constant 0 : i32
    %c0_i32_0 = arith.constant 0 : i32
    %c0_i32_1 = arith.constant 0 : i32
    return %c0_i32, %c0_i32_0 : i32, i32
  }
  func.func @transform_5(%arg0: i32) -> (i32, i32) {
    %c0_i32 = arith.constant 0 : i32
    %c0_i32_0 = arith.constant 0 : i32
    return %arg0, %c0_i32 : i32, i32
  }
}

</mosaic_0001>

<bundles_post_ra>
// kernel: encoder_decoder_forward.1
= control target key start
LH: loop header
LB: loop body
LE: loop exit
PB: predicated region body
PF: predicated region fallthrough
CT: control target
= control target key end

     0   :  { %10 = vsyncpa [#allocation3], 0  ;;  %s10402_s0 = inlined_call_operand.vmem [shape: s32[16,1], index: 0, kind: input, shape index: {}]   ;;  %s10403_s1 = inlined_call_operand.vmem [shape: s32[16,1], index: 1, kind: input, shape index: {}]   ;;  %s10404_s2 = inlined_call_operand.vmem [shape: f32[2,1,8], index: 2, kind: input, shape index: {}]   ;;  %s10405_s3 = inlined_call_operand.vmem [shape: f32[2,8,8], index: 3, kind: input, shape index: {}]   ;;  %s10406_s4 = inlined_call_operand.hbm [shape: f32[1240,128], index: 4, kind: input, shape index: {}]   ;;  %s10407_s5 = inlined_call_operand.hbm [shape: f32[16,32], index: 5, kind: output, shape index: {}]  }
   0x1   :  { %11 = vsyncpa [#allocation4], 0 }
   0x2   :  { %13 = vsyncpa [#allocation4 + $0x1], 0  ;;  %s9495_s18 = smov 0   ;;  %s9497_s19 = smov 0  }
   0x3   :  { %s9499_s20 = smov 0   ;;  %s9501_s21 = smov 0  }
   0x4 LB: > { %s9516_s22 = sadd.s32 4294967295, %s9445_s21   ;;  %s8134_s23 = sadd.s32 4294967294, %s9445_s21   ;;  %s9445_s21 = sphi %s9501_s21, %s10415_s21   ;;  %s9441_s20 = sphi %s9499_s20, %s10414_s20   ;;  %s9437_s19 = sphi %s9497_s19, %s10413_s19   ;;  %s9433_s18 = sphi %s9495_s18, %s10412_s18  }
   0x5   : > { %s9520_s24 = sadd.s32 1, %s9445_s21   ;;  %s151_s25 = sadd.s32 1, %s9441_s20 }
   0x6   : > { %s148_s26 = ssub.s32 %s9445_s21, %s9520_s24  ;;  %p161_p0 = scmp.ne.s32.totalorder %s9441_s20, %s9437_s19 }
   0x7   : > { %p149_p1 = scmp.eq.s32.totalorder %s148_s26, 0  ;;  %p162_p2 = scmp.eq.s32.totalorder %s9516_s22, 1 }
   0x8   : > { %p167_p3 = scmp.ne.s32.totalorder %s9437_s19, %s9433_s18  ;;  %p168_p4 = scmp.eq.s32.totalorder %s8134_s23, 1 }
   0x9   : > { %s9531_s27 = scalar_select %p149_p1, %s9441_s20, %s151_s25  }
   0xa   : > { %p9533_p5 = por %p162_p2, %p161_p0  ;;  %p9537_p6 = por %p168_p4, %p167_p3 }
   0xb   : > { %p8135_p7 = scmp.ge.s32.totalorder %s9445_s21, 1  ;;  %p175_p8 = scmp.lt.s32.totalorder %s9445_s21, 3 }
   0xc   : > { %s10409_s29 = scalar_select %p9537_p6, 1, 0 }
   0xd   : > { %p9153_p9 = scmp.eq.s32.totalorder %s9516_s22, 0  ;;  %p9544_p10 = pnand %p8135_p7, %p175_p8 }
   0xe   : > { %s9447_s6 = smov [#allocation2]  }
   0xf   : > { %s187_s7 = sshll.u32 %s9447_s6, 4  ;;  %p9145_p11 = pneg %p9544_p10  ;;  %s188_s7 = int_to_ptr.vmem [resolvable:$true] %s187_s7 }
  0x10   : > { %s9366_s8 = scalar_lea.vmem %s188_s7, 19840  ;;  %p9374_p3 = scmp.lt.s32.totalorder %s188_s7, %s188_s7 }
  0x11   : > { %p9146_p12 = pnand %p9153_p9, %p9145_p11  ;;  %p9367_p0 = scmp.ne.s32.totalorder %s188_s7, %s9366_s8 }
  0x12   : > { %p9375_p4 = scmp.lt.s32.totalorder %s9366_s8, %s9366_s8 }
  0x13   : > { %p9357_p13 = pneg %p9146_p12 }
  0x14   : > { %p9376_p6 = por %p9375_p4, %p9374_p3 }
  0x15   : > { %p9369_p1 = pnand %p9367_p0, %p9357_p13 }
  0x17   : > { %p9370_p2 = pneg %p9369_p1 }
  0x19   : > { %p9377_p7 = pnand %p9376_p6, %p9370_p2 }
  0x1b   : > { %9380 = shalt.err (!%p9377_p7)
}
  0x1c   : > { %s9448_s9 = smov 128   ;;  %s9449_s10 = smov 8  }
  0x1d   : > { %9148 = dma.hbm_to_vmem [thread:$0]  (!%p9146_p12), %s10406_s4, 19840, %s188_s7, [#allocation3], %s9448_s9, %s9448_s9, %s9449_s10  }
  0x1e   : > { %230 = sbr.rel (%p9544_p10) target bundleno = 20443 (0x4fdb), region = 40 }
  0x23   : > { %9424 = dma.done.wait (%p9153_p9), [#allocation3], 19840  }
  0x24   : > { %9426 = vsyncadd (%p9153_p9), [#allocation3], 4294947456  ;;  %p268_p8 = scmp.lt.s32.totalorder %s9516_s22, 1  ;;  %v9450_v0 = vmov 0   ;;  %v9451_v1 = vmov 0.0   ;;  %vm9452_vm0 = vmmov 0   ;;  %v286_v5 = vlaneseq }
  0x25   : > { %9205 = vset.pattern.permute.xlu0 %v9450_v0  ;;  %8557 = vmatprep.subr.mxu0 %v9451_v1  ;;  %v295_v3 = vld [vmem:[#allocation2 + $0x4b8] sm:$0xff]  ;;  %v294_v4 = vld [vmem:[#allocation2 + $0x4b0] sm:$0xff]  ;;  %vm296_vm1 = vcmask 130048   ;;  %vm373_vm3 = vcmask 261120   ;;  %v409_v22 = vld [vmem:[#allocation2 + $0x8] sm:$0xff]  ;;  %s9453_s23 = smov 96  }
  0x26   : > { %s9564_s13 = scalar_select %p268_p8, %s9516_s22, 1  ;;  %8564 = vmatprep.subr.mxu1 %v9451_v1  ;;  %9206 = vset.pattern.permute.xlu1 %v9450_v0  ;;  %v9580_v6 = vand.u32 127, %v286_v5  ;;  %v371_v10 = vld [vmem:[#allocation2 + $0x4d0] sm:$0xff]  ;;  %v411_v20 = vld [vmem:[#allocation2 + $0x18] sm:$0xff]  ;;  %v408_v23 = vld [vmem:[#allocation2] sm:$0xff]  ;;  %vm497_vm6 = vcmask 64512  }
  0x27   : > { %8561 = vmatprep.mubr.msk.f32.mxu0 %vm9452_vm0, %v9451_v1  ;;  %8572 = vmatprep.mubr.msk.f32.mxu1 %vm9452_vm0, %v9451_v1  ;;  %v410_v21 = vld [vmem:[#allocation2 + $0x10] sm:$0xff]  ;;  %v8146_v32 = vld [vmem:[#allocation2 + $0xc0] ss:$0 sm:$0xff]  ;;  %v8147_v35 = vld [vmem:[#allocation2 + $0xc8] ss:$0 sm:$0xff]  ;;  %s9454_s6 = smov 88  }
  0x28   : > { %s9568_s14 = sshll.u32 %s9564_s13, 3  ;;  %8558 = vmatpush3.msra.mxu0 %v295_v3  ;;  %8565 = vmatpush3.msra.mxu1 %v411_v20  ;;  %v8148_v38 = vld [vmem:[#allocation2 + $0x20] ss:$0 sm:$0xff]  ;;  %s9614_s30 = scalar_lea.vmem %s10404_s2, %s9564_s13  ;;  %vm1597_vm9 = vcmask 523264  }
  0x29   : > { %s271_s17 = scalar_lea.vmem %s10402_s0, %s9568_s14  ;;  %8559 = vmatprep.subr.mxu0 %v9451_v1  ;;  %8566 = vmatprep.subr.mxu1 %v9451_v1  ;;  %v9617_v43 = vld [vmem:[%s9614_s30] ss:$0 sm:$0xff]  ;;  %s9455_s7 = smov 64  }
  0x2a   : > { %v285_v2 = vld [vmem:[%s271_s17] sm:$0xff]  ;;  %8560 = vmatpush3.msra.mxu0 %v294_v4  ;;  %8567 = vmatpush3.msra.mxu1 %v410_v21  ;;  %s9456_s8 = smov 120   ;;  %s9457_s9 = smov 56  }
  0x2b   : > { %289 = vperm.xlu0 %9205, %v285_v2   ;;  %8575 = vmatprep.subr.mxu0 %v9451_v1  ;;  %s9458_s10 = smov 112   ;;  %s9459_s11 = smov 80  }
  0x2c   : > { %8568 = vmatprep.subr.mxu1 %v9451_v1  ;;  %s9460_s12 = smov 48   ;;  %s9461_s13 = smov 104  }
  0x2d   : > { %8569 = vmatpush3.msra.mxu1 %v409_v22  ;;  %s9462_s15 = smov 72   ;;  %s9463_s16 = smov 40  }
  0x2e   : > { %8570 = vmatprep.subr.mxu1 %v9451_v1  ;;  %s275_s26 = scalar_lea.vmem %s10403_s1, %s9568_s14 }
  0x2f   : > { %8571 = vmatpush3.msra.mxu1 %v408_v23 }
  0x30   : > { %8595 = vmatprep.subr.mxu1 %v9451_v1 }
  0xa6   : > { %v290_v7 = vpop.permute.xlu0 %289 }
  0xa7   : > { %vm291_vm2 = vcmp.eq.s32.totalorder %v290_v7, %v9580_v6 }
  0xa8   : > { %v8144_v8 = vsel %vm291_vm2, 1.0, %v9451_v1 }
  0xa9   : > { %8562 = vmatmul.mubr.msk.f32.vlgmr.msra.gmra.mxu0 %vm296_vm1, %v8144_v8 }
  0xaa   : > { %8577 = vmatprep.mubr.msk.f32.mxu0 %vm9452_vm0, %v9451_v1 }
 0x169   : > { %v366_v9 = vpop.f32.mrf.mxu0 }
 0x16a   : > { %v370_v11 = vmul.f32 5.656854, %v366_v9 }
 0x16b   : > { %v8563_v12 = vpop.f32.mrf.mxu0 }
 0x16c   : > { %v9587_v13 = vadd.f32 %v371_v10, %v370_v11  ;;  %v491_v11 = vld [vmem:[#allocation2 + $0x30] sm:$0xff] }
 0x16e   : > { %v374_v14 = vsel %vm373_vm3, %v9587_v13, 0.0 }
 0x16f   : > { %375 = vadd.xlane.f32.xlu0 %v374_v14 }
 0x1f8   : > { %v376_v15 = vpop.xlane.xlu0 %375 }
 0x1f9   : > { %v378_v16 = vmul.f32 0.03125, %v376_v15 }
 0x1fb   : > { %v379_v17 = vsub.f32 %v9587_v13, %v378_v16  ;;  %v490_v16 = vld [vmem:[#allocation2 + $0x28] sm:$0xff] }
 0x1fd   : > { %v380_v18 = vmul.f32 %v379_v17, %v379_v17  ;;  %v391_v33 = vmul.f32 %v8146_v32, %v379_v17 }
 0x1ff   : > { %v381_v19 = vsel %vm373_vm3, %v380_v18, 0.0 }
 0x200   : > { %382 = vadd.xlane.f32.xlu1 %v381_v19 }
 0x289   : > { %v383_v24 = vpop.xlane.xlu1 %382 }
 0x28a   : > { %v385_v25 = vmul.f32 0.032258064, %v383_v24 }
 0x28c   : > { %9207 = vrsqrt.f32 %v385_v25  ;;  %vm394_vm4 = vcmp.eq.f32.partialorder %v385_v25, inf  ;;  %v397_v28 = vand.u32 2147483648, %v385_v25  ;;  %vm396_vm5 = vcmp.eq.f32.partialorder %v385_v25, 0.0 }
 0x299   : > { %v9208_v26 = vpop.eup %9207 }
 0x29a   : > { %v393_v27 = vmul.f32 %v9208_v26, %v385_v25 }
 0x29c   : > { %v395_v29 = vsel %vm394_vm4, %v385_v25, %v393_v27 }
 0x29d   : > { %v398_v30 = vsel %vm396_vm5, %v397_v28, %v395_v29 }
 0x29e   : > { %v399_v31 = vadd.f32 1e-06, %v398_v30 }
 0x2a0   : > { %9209 = vrcp.f32 %v399_v31 }
 0x2ad   : > { %v9210_v34 = vpop.eup %9209 }
 0x2ae   : > { %v401_v36 = vmul.f32 %v9210_v34, %v391_v33 }
 0x2b0   : > { %v407_v37 = vadd.f32 %v8147_v35, %v401_v36 }
 0x2b2   : > { %8573 = vmatmul.mubr.msk.f32.vlgmr.msra.gmra.mxu1 %vm373_vm3, %v407_v37 }
 0x2b3   : > { %8597 = vmatprep.mubr.msk.f32.mxu1 %vm9452_vm0, %v9451_v1  ;;  %8596 = vmatpush3.msra.mxu1 %v491_v11 }
 0x2b4   : > { %8605 = vmatprep.subr.mxu1 %v9451_v1 }
 0x372   : > { %v486_v39 = vpop.f32.mrf.mxu1 }
 0x373   : > { %v9600_v40 = vadd.f32 %v8148_v38, %v486_v39 }
 0x374   : > { %v8574_v41 = vpop.f32.mrf.mxu1 }
 0x375   : > { %495 = vrot.lane.b32.xlu1 %v9600_v40, %s9453_s23 }
 0x3e7   : > { %v496_v42 = vpop.permute.xlu1 %495 }
 0x3e8   : > { %8576 = vmatpush3.xpose.msk.msra.mxu0 %vm497_vm6, %v496_v42  ;;  %v492_v42 = vld [vmem:[#allocation2 + $0x38] sm:$0xff] }
 0x3e9   : > { %8580 = vmatprep.subr.mxu0 %v9451_v1 }
 0x3eb   : > { %8578 = vmatmul.mubr.msk.f32.vlgmr.msra.gmra.mxu0 %vm497_vm6, %v9600_v40 }
 0x3ec   : > { %8582 = vmatprep.mubr.msk.f32.mxu0 %vm9452_vm0, %v9451_v1 }
 0x4ab   : > { %v568_v44 = vpop.f32.mrf.mxu0 }
 0x4ac   : > { %v572_v45 = vmul.f32 0.35355338, %v568_v44 }
 0x4ad   : > { %v8579_v46 = vpop.f32.mrf.mxu0 }
 0x4ae   : > { %v579_v47 = vadd.f32 %v9617_v43, %v572_v45 }
 0x4b0   : > { %v580_v48 = vsel %vm497_vm6, %v579_v47, -inf }
 0x4b1   : > { %581 = vmax.xlane.f32.xlu1 %v580_v48 }
 0x4c2   : > { %669 = vrot.lane.b32.xlu1 %v9600_v40, %s9454_s6 }
 0x53a   : > { %v582_v49 = vpop.xlane.xlu1 %581 }
 0x53b   : > { %v583_v50 = vsub.f32 %v579_v47, %v582_v49 }
 0x53d   : > { %v584_v51 = vmul.f32 1.442695, %v583_v50 }
 0x53e   : > { %v670_v58 = vpop.permute.xlu1 %669 }
 0x53f   : > { %9211 = vpow2.f32 %v584_v51 }
 0x54c   : > { %v9212_v52 = vpop.eup %9211 }
 0x54d   : > { %v586_v53 = vsel %vm497_vm6, %v9212_v52, 0.0 }
 0x54e   : > { %587 = vadd.xlane.f32.xlu0 %v586_v53 }
 0x564   : > { %591 = vrot.lane.b32.xlu0 %v9600_v40, %s9455_s7 }
 0x568   : > { %667 = vrot.lane.b32.xlu0 %v9600_v40, %s9456_s8 }
 0x5d7   : > { %v588_v54 = vpop.xlane.xlu0 %587 }
 0x5d8   : > { %9213 = vrcp.f32 %v588_v54 }
 0x5db   : > { %v592_v55 = vpop.permute.xlu0 %591 }
 0x5dc   : > { %8581 = vmatpush3.msra.mxu0 %v592_v55 }
 0x5dd   : > { %8585 = vmatprep.subr.mxu0 %v9451_v1 }
 0x5df   : > { %v668_v59 = vpop.permute.xlu0 %667 }
 0x5e5   : > { %v9214_v56 = vpop.eup %9213 }
 0x5e6   : > { %v590_v57 = vmul.f32 %v9214_v56, %v9212_v52 }
 0x5e8   : > { %8583 = vmatmul.mubr.msk.f32.vlgmr.msra.gmra.mxu0 %vm497_vm6, %v590_v57 }
 0x5e9   : > { %8586 = vmatpush3.xpose.msk.msra.mxu0 %vm497_vm6, %v670_v58  ;;  %8587 = vmatprep.mubr.msk.f32.mxu0 %vm9452_vm0, %v9451_v1 }
 0x5ea   : > { %8590 = vmatprep.subr.mxu0 %v9451_v1 }
 0x5ec   : > { %8588 = vmatmul.mubr.msk.f32.vlgmr.msra.gmra.mxu0 %vm497_vm6, %v668_v59  ;;  %v493_v59 = vld [vmem:[#allocation2 + $0x40] sm:$0xff] }
 0x5ed   : > { %8592 = vmatprep.mubr.msk.f32.mxu0 %vm9452_vm0, %v9451_v1 }
 0x6a8   : > { %v663_v60 = vpop.f32.mrf.mxu0 }
 0x6aa   : > { %v8584_v61 = vpop.f32.mrf.mxu0 }
 0x6ac   : > { %v741_v62 = vpop.f32.mrf.mxu0 }
 0x6ad   : > { %v745_v63 = vmul.f32 0.35355338, %v741_v62 }
 0x6ae   : > { %v8589_v0 = vpop.f32.mrf.mxu0 }
 0x6af   : > { %v746_v2 = vadd.f32 %v9617_v43, %v745_v63 }
 0x6b1   : > { %v747_v3 = vsel %vm497_vm6, %v746_v2, -inf }
 0x6b2   : > { %748 = vmax.xlane.f32.xlu0 %v747_v3 }
 0x6c8   : > { %758 = vrot.lane.b32.xlu0 %v9600_v40, %s9457_s9 }
 0x6cc   : > { %980 = vrot.lane.b32.xlu0 %v9600_v40, %s9458_s10 }
 0x73b   : > { %v749_v4 = vpop.xlane.xlu0 %748 }
 0x73c   : > { %v750_v5 = vsub.f32 %v746_v2, %v749_v4  ;;  %v8167_v4 = vld [vmem:[#allocation2 + $0x48] ss:$0 sm:$0xff] }
 0x73e   : > { %v751_v7 = vmul.f32 1.442695, %v750_v5 }
 0x73f   : > { %v759_v8 = vpop.permute.xlu0 %758 }
 0x740   : > { %9215 = vpow2.f32 %v751_v7  ;;  %8591 = vmatpush3.msra.mxu0 %v759_v8 }
 0x741   : > { %8600 = vmatprep.subr.mxu0 %v9451_v1 }
 0x743   : > { %v981_v20 = vpop.permute.xlu0 %980 }
 0x74d   : > { %v9216_v9 = vpop.eup %9215 }
 0x74e   : > { %v753_v10 = vsel %vm497_vm6, %v9216_v9, 0.0 }
 0x74f   : > { %754 = vadd.xlane.f32.xlu1 %v753_v10 }
 0x760   : > { %982 = vrot.lane.b32.xlu1 %v9600_v40, %s9459_s11 }
 0x7d8   : > { %v755_v12 = vpop.xlane.xlu1 %754 }
 0x7d9   : > { %9217 = vrcp.f32 %v755_v12 }
 0x7dc   : > { %v983_v18 = vpop.permute.xlu1 %982 }
 0x7e6   : > { %v9218_v14 = vpop.eup %9217 }
 0x7e7   : > { %v757_v15 = vmul.f32 %v9218_v14, %v9216_v9 }
 0x7e9   : > { %8593 = vmatmul.mubr.msk.f32.vlgmr.msra.gmra.mxu0 %vm497_vm6, %v757_v15 }
 0x7ea   : > { %8601 = vmatpush3.msra.mxu0 %v490_v16  ;;  %8602 = vmatprep.mubr.msk.f32.mxu0 %vm9452_vm0, %v9451_v1 }
 0x7eb   : > { %8610 = vmatprep.subr.mxu0 %v9451_v1 }
 0x7ed   : > { %8603 = vmatmul.mubr.msk.f32.vlgmr.msra.gmra.mxu0 %vm497_vm6, %v663_v60 }
 0x7ee   : > { %8612 = vmatprep.mubr.msk.f32.mxu0 %vm9452_vm0, %v9451_v1 }
 0x8a9   : > { %v830_v17 = vpop.f32.mrf.mxu0 }
 0x8aa   : > { %8598 = vmatmul.mubr.msk.f32.vlgmr.msra.gmra.mxu1 %vm497_vm6, %v830_v17  ;;  %v1504_v17 = vld [vmem:[#allocation2 + $0x68] sm:$0xff] }
 0x8ab   : > { %8606 = vmatpush3.xpose.msk.msra.mxu1 %vm497_vm6, %v983_v18  ;;  %v8594_v19 = vpop.f32.mrf.mxu0  ;;  %8607 = vmatprep.mubr.msk.f32.mxu1 %vm9452_vm0, %v9451_v1  ;;  %v1503_v18 = vld [vmem:[#allocation2 + $0x60] sm:$0xff] }
 0x8ac   : > { %8615 = vmatprep.subr.mxu1 %v9451_v1  ;;  %v1502_v19 = vld [vmem:[#allocation2 + $0x58] sm:$0xff] }
 0x8ad   : > { %v9660_v21 = vpop.f32.mrf.mxu0 }
 0x8ae   : > { %8608 = vmatmul.mubr.msk.f32.vlgmr.msra.gmra.mxu1 %vm497_vm6, %v981_v20  ;;  %v1591_v20 = vld [vmem:[#allocation2 + $0xb0] sm:$0xff] }
 0x8af   : > { %v8604_v22 = vpop.f32.mrf.mxu0  ;;  %8617 = vmatprep.mubr.msk.f32.mxu1 %vm9452_vm0, %v9451_v1  ;;  %8616 = vmatpush3.msra.mxu1 %v492_v42  ;;  %v1584_v42 = vld [vmem:[#allocation2 + $0x78] sm:$0xff] }
 0x8b0   : > { %8625 = vmatprep.subr.mxu1 %v9451_v1  ;;  %v1589_v22 = vld [vmem:[#allocation2 + $0xa0] sm:$0xff] }
 0x96a   : > { %v903_v23 = vpop.f32.mrf.mxu1 }
 0x96b   : > { %v977_v57 = vadd.f32 %v9660_v21, %v903_v23  ;;  %v1590_v21 = vld [vmem:[#allocation2 + $0xa8] sm:$0xff]  ;;  %v1588_v23 = vld [vmem:[#allocation2 + $0x98] sm:$0xff] }
 0x96c   : > { %v8599_v24 = vpop.f32.mrf.mxu1 }
 0x96d   : > { %v1587_v24 = vld [vmem:[#allocation2 + $0x90] sm:$0xff] }
 0x96e   : > { %v1054_v25 = vpop.f32.mrf.mxu1 }
 0x96f   : > { %v1058_v26 = vmul.f32 0.35355338, %v1054_v25 }
 0x970   : > { %v8609_v27 = vpop.f32.mrf.mxu1 }
 0x971   : > { %v1059_v28 = vadd.f32 %v9617_v43, %v1058_v26 }
 0x973   : > { %v1060_v29 = vsel %vm497_vm6, %v1059_v28, -inf }
 0x974   : > { %1061 = vmax.xlane.f32.xlu0 %v1060_v29 }
 0x98a   : > { %1071 = vrot.lane.b32.xlu0 %v9600_v40, %s9460_s12 }
 0x98e   : > { %1221 = vrot.lane.b32.xlu0 %v9600_v40, %s9461_s13 }
 0x9fd   : > { %v1062_v30 = vpop.xlane.xlu0 %1061 }
 0x9fe   : > { %v1063_v31 = vsub.f32 %v1059_v28, %v1062_v30 }
 0xa00   : > { %v1064_v32 = vmul.f32 1.442695, %v1063_v31 }
 0xa01   : > { %v1072_v33 = vpop.permute.xlu0 %1071 }
 0xa02   : > { %9219 = vpow2.f32 %v1064_v32  ;;  %8611 = vmatpush3.msra.mxu0 %v1072_v33  ;;  %v8168_v33 = vld [vmem:[#allocation2 + $0xd0] ss:$0 sm:$0xff] }
 0xa03   : > { %8620 = vmatprep.subr.mxu0 %v9451_v1 }
 0xa05   : > { %v1222_v41 = vpop.permute.xlu0 %1221 }
 0xa0f   : > { %v9220_v34 = vpop.eup %9219 }
 0xa10   : > { %v1066_v35 = vsel %vm497_vm6, %v9220_v34, 0.0 }
 0xa11   : > { %1067 = vadd.xlane.f32.xlu1 %v1066_v35 }
 0xa22   : > { %1223 = vrot.lane.b32.xlu1 %v9600_v40, %s9462_s15 }
 0xa9a   : > { %v1068_v36 = vpop.xlane.xlu1 %1067 }
 0xa9b   : > { %9221 = vrcp.f32 %v1068_v36  ;;  %v8169_v36 = vld [vmem:[#allocation2 + $0xd8] ss:$0 sm:$0xff] }
 0xa9e   : > { %v1224_v39 = vpop.permute.xlu1 %1223 }
 0xaa8   : > { %v9222_v37 = vpop.eup %9221 }
 0xaa9   : > { %v1070_v38 = vmul.f32 %v9222_v37, %v9220_v34 }
 0xaab   : > { %8613 = vmatmul.mubr.msk.f32.vlgmr.msra.gmra.mxu0 %vm497_vm6, %v1070_v38 }
 0xaac   : > { %8621 = vmatpush3.xpose.msk.msra.mxu0 %vm497_vm6, %v1224_v39  ;;  %8622 = vmatprep.mubr.msk.f32.mxu0 %vm9452_vm0, %v9451_v1  ;;  %v1586_v39 = vld [vmem:[#allocation2 + $0x88] sm:$0xff] }
 0xaad   : > { %8630 = vmatprep.subr.mxu0 %v9451_v1 }
 0xaaf   : > { %8623 = vmatmul.mubr.msk.f32.vlgmr.msra.gmra.mxu0 %vm497_vm6, %v1222_v41  ;;  %v1585_v41 = vld [vmem:[#allocation2 + $0x80] sm:$0xff] }
 0xab0   : > { %8632 = vmatprep.mubr.msk.f32.mxu0 %vm9452_vm0, %v9451_v1  ;;  %8631 = vmatpush3.msra.mxu0 %v493_v59 }
 0xab1   : > { %8646 = vmatprep.subr.mxu0 %v9451_v1 }
 0xb6b   : > { %v1143_v44 = vpop.f32.mrf.mxu0 }
 0xb6c   : > { %8618 = vmatmul.mubr.msk.f32.vlgmr.msra.gmra.mxu1 %vm497_vm6, %v1143_v44  ;;  %v8170_v44 = vld [vmem:[#allocation2 + $0x70] ss:$0 sm:$0xff] }
 0xb6d   : > { %v8614_v45 = vpop.f32.mrf.mxu0  ;;  %8627 = vmatprep.mubr.msk.f32.mxu1 %vm9452_vm0, %v9451_v1 }
 0xb6f   : > { %v1295_v46 = vpop.f32.mrf.mxu0 }
 0xb70   : > { %v1299_v47 = vmul.f32 0.35355338, %v1295_v46 }
 0xb71   : > { %v8624_v48 = vpop.f32.mrf.mxu0 }
 0xb72   : > { %v1300_v49 = vadd.f32 %v9617_v43, %v1299_v47 }
 0xb74   : > { %v1301_v50 = vsel %vm497_vm6, %v1300_v49, -inf }
 0xb75   : > { %1302 = vmax.xlane.f32.xlu0 %v1301_v50 }
 0xb8b   : > { %1312 = vrot.lane.b32.xlu0 %v9600_v40, %s9463_s16 }
 0xbfe   : > { %v1303_v51 = vpop.xlane.xlu0 %1302 }
 0xbff   : > { %v1304_v52 = vsub.f32 %v1300_v49, %v1303_v51  ;;  %v8172_v49 = vld [vmem:[#allocation2 + $0xb8] ss:$0 sm:$0xff] }
 0xc01   : > { %v1305_v53 = vmul.f32 1.442695, %v1304_v52 }
 0xc02   : > { %v1313_v54 = vpop.permute.xlu0 %1312 }
 0xc03   : > { %9223 = vpow2.f32 %v1305_v53  ;;  %8626 = vmatpush3.msra.mxu1 %v1313_v54 }
 0xc04   : > { %8635 = vmatprep.subr.mxu1 %v9451_v1 }
 0xc10   : > { %v9224_v55 = vpop.eup %9223 }
 0xc11   : > { %v1307_v56 = vsel %vm497_vm6, %v9224_v55, 0.0 }
 0xc12   : > { %1308 = vadd.xlane.f32.xlu1 %v1307_v56 }
 0xc2c   : > { %v1216_v58 = vpop.f32.mrf.mxu1 }
 0xc2d   : > { %v1220_v60 = vadd.f32 %v1216_v58, %v977_v57 }
 0xc2e   : > { %v8619_v61 = vpop.f32.mrf.mxu1 }
 0xc2f   : > { %v1706_v61 = vld [vmem:[#allocation2 + $0x258] sm:$0xff] }
 0xc9b   : > { %v1309_v40 = vpop.xlane.xlu1 %1308 }
 0xc9c   : > { %9225 = vrcp.f32 %v1309_v40  ;;  %v1705_v40 = vld [vmem:[#allocation2 + $0x250] sm:$0xff] }
 0xca9   : > { %v9226_v62 = vpop.eup %9225 }
 0xcaa   : > { %v1311_v63 = vmul.f32 %v9226_v62, %v9224_v55  ;;  %v1704_v62 = vld [vmem:[#allocation2 + $0x248] sm:$0xff] }
 0xcac   : > { %8628 = vmatmul.mubr.msk.f32.vlgmr.msra.gmra.mxu1 %vm497_vm6, %v1311_v63 }
 0xcad   : > { %8643 = vmatprep.mubr.msk.f32.mxu1 %vm9452_vm0, %v9451_v1  ;;  %8636 = vmatpush3.msra.mxu1 %v1504_v17 }
 0xcae   : > { %8637 = vmatprep.subr.mxu1 %v9451_v1 }
 0xcaf   : > { %8638 = vmatpush3.msra.mxu1 %v1503_v18 }
 0xcb0   : > { %8639 = vmatprep.subr.mxu1 %v9451_v1 }
 0xcb1   : > { %8640 = vmatpush3.msra.mxu1 %v1502_v19 }
 0xcb2   : > { %8641 = vmatprep.subr.mxu1 %v9451_v1 }
 0xd6c   : > { %v1384_v0 = vpop.f32.mrf.mxu1 }
 0xd6d   : > { %8633 = vmatmul.mubr.msk.f32.vlgmr.msra.gmra.mxu0 %vm497_vm6, %v1384_v0 }
 0xd6e   : > { %v8629_v2 = vpop.f32.mrf.mxu1  ;;  %8662 = vmatprep.mubr.msk.f32.mxu0 %vm9452_vm0, %v9451_v1  ;;  %8647 = vmatpush3.msra.mxu0 %v1591_v20 }
 0xd6f   : > { %8648 = vmatprep.subr.mxu0 %v9451_v1 }
 0xd70   : > { %8649 = vmatpush3.msra.mxu0 %v1590_v21 }
 0xd71   : > { %8650 = vmatprep.subr.mxu0 %v9451_v1 }
 0xd72   : > { %8651 = vmatpush3.msra.mxu0 %v1589_v22 }
 0xd73   : > { %8652 = vmatprep.subr.mxu0 %v9451_v1 }
 0xd74   : > { %8653 = vmatpush3.msra.mxu0 %v1588_v23 }
 0xd75   : > { %8654 = vmatprep.subr.mxu0 %v9451_v1 }
 0xd76   : > { %8655 = vmatpush3.msra.mxu0 %v1587_v24 }
 0xd77   : > { %8656 = vmatprep.subr.mxu0 %v9451_v1 }
 0xd78   : > { %8657 = vmatpush3.msra.mxu0 %v1586_v39 }
 0xd79   : > { %8658 = vmatprep.subr.mxu0 %v9451_v1 }
 0xd7a   : > { %8659 = vmatpush3.msra.mxu0 %v1585_v41 }
 0xd7b   : > { %8660 = vmatprep.subr.mxu0 %v9451_v1 }
 0xd7c   : > { %8661 = vmatpush3.msra.mxu0 %v1584_v42 }
 0xd7d   : > { %8681 = vmatprep.subr.mxu0 %v9451_v1 }
 0xe2d   : > { %v1457_v3 = vpop.f32.mrf.mxu0 }
 0xe2e   : > { %v1461_v5 = vadd.f32 %v1457_v3, %v1220_v60  ;;  %v1707_v60 = vld [vmem:[#allocation2 + $0x260] sm:$0xff] }
 0xe2f   : > { %v8634_v7 = vpop.f32.mrf.mxu0 }
 0xe30   : > { %v1467_v8 = vadd.f32 %v8167_v4, %v1461_v5 }
 0xe32   : > { %v9702_v9 = vadd.f32 %v1467_v8, %v9587_v13  ;;  %v1501_v13 = vld [vmem:[#allocation2 + $0x50] sm:$0xff] }
 0xe33   : > { %8642 = vmatpush3.msra.mxu1 %v1501_v13 }
 0xe34   : > { %v1469_v10 = vsel %vm373_vm3, %v9702_v9, 0.0  ;;  %8665 = vmatprep.subr.mxu1 %v9451_v1 }
 0xe35   : > { %1470 = vadd.xlane.f32.xlu1 %v1469_v10 }
 0xebe   : > { %v1471_v11 = vpop.xlane.xlu1 %1470 }
 0xebf   : > { %v1472_v12 = vmul.f32 0.03125, %v1471_v11 }
 0xec1   : > { %v1473_v14 = vsub.f32 %v9702_v9, %v1472_v12  ;;  %v8175_v12 = vld [vmem:[#allocation2 + $0x310] ss:$0 sm:$0xff] }
 0xec3   : > { %v1474_v15 = vmul.f32 %v1473_v14, %v1473_v14  ;;  %v1484_v34 = vmul.f32 %v8168_v33, %v1473_v14 }
 0xec5   : > { %v1475_v16 = vsel %vm373_vm3, %v1474_v15, 0.0 }
 0xec6   : > { %1476 = vadd.xlane.f32.xlu1 %v1475_v16  ;;  %v8176_v16 = vld [vmem:[#allocation2 + $0x268] ss:$0 sm:$0xff] }
 0xf4f   : > { %v1477_v25 = vpop.xlane.xlu1 %1476 }
 0xf50   : > { %v1478_v26 = vmul.f32 0.032258064, %v1477_v25 }
 0xf52   : > { %9227 = vrsqrt.f32 %v1478_v26  ;;  %vm1487_vm7 = vcmp.eq.f32.partialorder %v1478_v26, inf  ;;  %v1490_v29 = vand.u32 2147483648, %v1478_v26  ;;  %vm1489_vm8 = vcmp.eq.f32.partialorder %v1478_v26, 0.0 }
 0xf5f   : > { %v9228_v27 = vpop.eup %9227 }
 0xf60   : > { %v1486_v28 = vmul.f32 %v9228_v27, %v1478_v26 }
 0xf62   : > { %v1488_v30 = vsel %vm1487_vm7, %v1478_v26, %v1486_v28 }
 0xf63   : > { %v1491_v31 = vsel %vm1489_vm8, %v1490_v29, %v1488_v30 }
 0xf64   : > { %v1492_v32 = vadd.f32 1e-06, %v1491_v31 }
 0xf66   : > { %9229 = vrcp.f32 %v1492_v32 }
 0xf73   : > { %v9230_v35 = vpop.eup %9229 }
 0xf74   : > { %v1494_v37 = vmul.f32 %v9230_v35, %v1484_v34 }
 0xf76   : > { %v1500_v38 = vadd.f32 %v8169_v36, %v1494_v37 }
 0xf78   : > { %8644 = vmatmul.mubr.msk.f32.vlgmr.msra.gmra.mxu1 %vm373_vm3, %v1500_v38 }
 0xf79   : > { %8673 = vmatprep.mubr.msk.f32.mxu1 %vm9452_vm0, %v9451_v1  ;;  %8666 = vmatpush3.msra.mxu1 %v1707_v60 }
 0xf7a   : > { %8667 = vmatprep.subr.mxu1 %v9451_v1 }
 0xf7b   : > { %8668 = vmatpush3.msra.mxu1 %v1706_v61 }
 0xf7c   : > { %8669 = vmatprep.subr.mxu1 %v9451_v1 }
 0xf7d   : > { %8670 = vmatpush3.msra.mxu1 %v1705_v40 }
 0xf7e   : > { %8671 = vmatprep.subr.mxu1 %v9451_v1 }
 0xf7f   : > { %8672 = vmatpush3.msra.mxu1 %v1704_v62 }
 0xf80   : > { %8676 = vmatprep.subr.mxu1 %v9451_v1 }
0x1038   : > { %v1579_v45 = vpop.f32.mrf.mxu1 }
0x1039   : > { %v1580_v46 = vadd.f32 %v8170_v44, %v1579_v45 }
0x103a   : > { %v8645_v47 = vpop.f32.mrf.mxu1 }
0x103b   : > { %v1583_v48 = vmax.f32 %v1580_v46, 0.0 }
0x103d   : > { %8663 = vmatmul.mubr.msk.f32.vlgmr.msra.gmra.mxu0 %vm1597_vm9, %v1583_v48 }
0x103e   : > { %8683 = vmatprep.mubr.msk.f32.mxu0 %vm9452_vm0, %v9451_v1 }
0x10fd   : > { %v1667_v50 = vpop.f32.mrf.mxu0 }
0x10fe   : > { %v1668_v51 = vadd.f32 %v8172_v49, %v1667_v50 }
0x10ff   : > { %v8664_v52 = vpop.f32.mrf.mxu0 }
0x1100   : > { %v9727_v53 = vadd.f32 %v1668_v51, %v9702_v9  ;;  %v8174_v9 = vld [vmem:[#allocation2 + $0x308] ss:$0 sm:$0xff]  ;;  %v1786_v52 = vld [vmem:[#allocation2 + $0x270] sm:$0xff] }
0x1102   : > { %v1672_v54 = vsel %vm373_vm3, %v9727_v53, 0.0 }
0x1103   : > { %1673 = vadd.xlane.f32.xlu1 %v1672_v54  ;;  %v1787_v54 = vld [vmem:[#allocation2 + $0x278] sm:$0xff] }
0x118c   : > { %v1674_v55 = vpop.xlane.xlu1 %1673 }
0x118d   : > { %v1675_v56 = vmul.f32 0.03125, %v1674_v55 }
0x118f   : > { %v1676_v57 = vsub.f32 %v9727_v53, %v1675_v56 }
0x1191   : > { %v1677_v58 = vmul.f32 %v1676_v57, %v1676_v57  ;;  %v1687_v10 = vmul.f32 %v8174_v9, %v1676_v57 }
0x1193   : > { %v1678_v59 = vsel %vm373_vm3, %v1677_v58, 0.0 }
0x1194   : > { %1679 = vadd.xlane.f32.xlu1 %v1678_v59 }
0x121d   : > { %v1680_v63 = vpop.xlane.xlu1 %1679 }
0x121e   : > { %v1681_v0 = vmul.f32 0.032258064, %v1680_v63 }
0x1220   : > { %9231 = vrsqrt.f32 %v1681_v0  ;;  %vm1690_vm10 = vcmp.eq.f32.partialorder %v1681_v0, inf  ;;  %v1693_v4 = vand.u32 2147483648, %v1681_v0  ;;  %vm1692_vm11 = vcmp.eq.f32.partialorder %v1681_v0, 0.0 }
0x122d   : > { %v9232_v2 = vpop.eup %9231 }
0x122e   : > { %v1689_v3 = vmul.f32 %v9232_v2, %v1681_v0 }
0x1230   : > { %v1691_v5 = vsel %vm1690_vm10, %v1681_v0, %v1689_v3 }
0x1231   : > { %v1694_v7 = vsel %vm1692_vm11, %v1693_v4, %v1691_v5 }
0x1232   : > { %v1695_v8 = vadd.f32 1e-06, %v1694_v7 }
0x1234   : > { %9233 = vrcp.f32 %v1695_v8 }
0x1241   : > { %v9234_v11 = vpop.eup %9233 }
0x1242   : > { %v1697_v14 = vmul.f32 %v9234_v11, %v1687_v10 }
0x1244   : > { %v1703_v15 = vadd.f32 %v8175_v12, %v1697_v14 }
0x1246   : > { %8674 = vmatmul.mubr.msk.f32.vlgmr.msra.gmra.mxu1 %vm373_vm3, %v1703_v15 }
0x1247   : > { %8678 = vmatprep.mubr.msk.f32.mxu1 %vm9452_vm0, %v9451_v1 }
0x1306   : > { %v1782_v17 = vpop.f32.mrf.mxu1 }
0x1307   : > { %v9740_v18 = vadd.f32 %v8176_v16, %v1782_v17 }
0x1308   : > { %v8675_v19 = vpop.f32.mrf.mxu1 }
0x1309   : > { %1958 = vrot.lane.b32.xlu1 %v9740_v18, %s9454_s6  ;;  %1791 = vrot.lane.b32.xlu0 %v9740_v18, %s9453_s23 }
0x130d   : > { %1956 = vrot.lane.b32.xlu0 %v9740_v18, %s9456_s8 }
0x137b   : > { %v1792_v13 = vpop.permute.xlu0 %1791  ;;  %v1959_v20 = vpop.permute.xlu1 %1958 }
0x137c   : > { %8677 = vmatpush3.xpose.msk.msra.mxu1 %vm497_vm6, %v1792_v13 }
0x137d   : > { %8686 = vmatprep.subr.mxu1 %v9451_v1 }
0x137f   : > { %8679 = vmatmul.mubr.msk.f32.vlgmr.msra.gmra.mxu1 %vm497_vm6, %v9740_v18  ;;  %v1957_v21 = vpop.permute.xlu0 %1956 }
0x1380   : > { %8687 = vmatpush3.xpose.msk.msra.mxu1 %vm497_vm6, %v1959_v20  ;;  %8688 = vmatprep.mubr.msk.f32.mxu1 %vm9452_vm0, %v9451_v1  ;;  %v1788_v20 = vld [vmem:[#allocation2 + $0x280] sm:$0xff] }
0x1381   : > { %8696 = vmatprep.subr.mxu1 %v9451_v1 }
0x1383   : > { %8689 = vmatmul.mubr.msk.f32.vlgmr.msra.gmra.mxu1 %vm497_vm6, %v1957_v21 }
0x1384   : > { %8698 = vmatprep.mubr.msk.f32.mxu1 %vm9452_vm0, %v9451_v1  ;;  %8697 = vmatpush3.msra.mxu1 %v1787_v54 }
0x1385   : > { %8706 = vmatprep.subr.mxu1 %v9451_v1 }
0x143f   : > { %v1863_v22 = vpop.f32.mrf.mxu1 }
0x1440   : > { %v1867_v23 = vmul.f32 0.35355338, %v1863_v22 }
0x1441   : > { %v8680_v24 = vpop.f32.mrf.mxu1 }
0x1442   : > { %v1868_v25 = vadd.f32 %v9617_v43, %v1867_v23 }
0x1443   : > { %v2030_v26 = vpop.f32.mrf.mxu1 }
0x1444   : > { %v2034_v27 = vmul.f32 0.35355338, %v2030_v26  ;;  %v1869_v28 = vsel %vm497_vm6, %v1868_v25, -inf }
0x1445   : > { %1870 = vmax.xlane.f32.xlu0 %v1869_v28  ;;  %v8690_v29 = vpop.f32.mrf.mxu1 }
0x1446   : > { %v2035_v30 = vadd.f32 %v9617_v43, %v2034_v27 }
0x1448   : > { %v2036_v31 = vsel %vm497_vm6, %v2035_v30, -inf }
0x1449   : > { %2037 = vmax.xlane.f32.xlu1 %v2036_v31 }
0x145a   : > { %2047 = vrot.lane.b32.xlu1 %v9740_v18, %s9457_s9 }
0x145e   : > { %2269 = vrot.lane.b32.xlu1 %v9740_v18, %s9458_s10 }
0x14ce   : > { %v1871_v32 = vpop.xlane.xlu0 %1870 }
0x14cf   : > { %v1872_v33 = vsub.f32 %v1868_v25, %v1871_v32 }
0x14d1   : > { %v1873_v34 = vmul.f32 1.442695, %v1872_v33 }
0x14d2   : > { %v2038_v35 = vpop.xlane.xlu1 %2037 }
0x14d3   : > { %9235 = vpow2.f32 %v1873_v34  ;;  %v2039_v36 = vsub.f32 %v2035_v30, %v2038_v35  ;;  %v1789_v34 = vld [vmem:[#allocation2 + $0x288] sm:$0xff] }
0x14d5   : > { %v2040_v37 = vmul.f32 1.442695, %v2039_v36 }
0x14d6   : > { %v2048_v49 = vpop.permute.xlu1 %2047 }
0x14d7   : > { %9237 = vpow2.f32 %v2040_v37 }
0x14da   : > { %v2270_v60 = vpop.permute.xlu1 %2269 }
0x14e0   : > { %v9236_v38 = vpop.eup %9235 }
0x14e1   : > { %v1875_v39 = vsel %vm497_vm6, %v9236_v38, 0.0 }
0x14e2   : > { %1876 = vadd.xlane.f32.xlu0 %v1875_v39 }
0x14e4   : > { %v9238_v41 = vpop.eup %9237 }
0x14e5   : > { %v2042_v42 = vsel %vm497_vm6, %v9238_v41, 0.0 }
0x14e6   : > { %2043 = vadd.xlane.f32.xlu0 %v2042_v42 }
0x14fc   : > { %1880 = vrot.lane.b32.xlu0 %v9740_v18, %s9455_s7 }
0x1500   : > { %2271 = vrot.lane.b32.xlu0 %v9740_v18, %s9459_s11 }
0x156b   : > { %v1877_v44 = vpop.xlane.xlu0 %1876 }
0x156c   : > { %9239 = vrcp.f32 %v1877_v44  ;;  %v8194_v44 = vld [vmem:[#allocation2 + $0x290] ss:$0 sm:$0xff] }
0x156f   : > { %v2044_v45 = vpop.xlane.xlu0 %2043 }
0x1570   : > { %9241 = vrcp.f32 %v2044_v45 }
0x1573   : > { %v1881_v46 = vpop.permute.xlu0 %1880 }
0x1574   : > { %8682 = vmatpush3.msra.mxu0 %v1881_v46 }
0x1575   : > { %8691 = vmatprep.subr.mxu0 %v9451_v1 }
0x1577   : > { %v2272_v58 = vpop.permute.xlu0 %2271 }
0x1579   : > { %v9240_v47 = vpop.eup %9239 }
0x157a   : > { %v1879_v48 = vmul.f32 %v9240_v47, %v9236_v38 }
0x157c   : > { %8684 = vmatmul.mubr.msk.f32.vlgmr.msra.gmra.mxu0 %vm497_vm6, %v1879_v48 }
0x157d   : > { %v9242_v50 = vpop.eup %9241  ;;  %8692 = vmatpush3.msra.mxu0 %v2048_v49  ;;  %8693 = vmatprep.mubr.msk.f32.mxu0 %vm9452_vm0, %v9451_v1 }
0x157e   : > { %v2046_v51 = vmul.f32 %v9242_v50, %v9238_v41  ;;  %8701 = vmatprep.subr.mxu0 %v9451_v1 }
0x1580   : > { %8694 = vmatmul.mubr.msk.f32.vlgmr.msra.gmra.mxu0 %vm497_vm6, %v2046_v51 }
0x1581   : > { %8703 = vmatprep.mubr.msk.f32.mxu0 %vm9452_vm0, %v9451_v1  ;;  %8702 = vmatpush3.msra.mxu0 %v1786_v52 }
0x1582   : > { %8711 = vmatprep.subr.mxu0 %v9451_v1 }
0x163c   : > { %v1952_v55 = vpop.f32.mrf.mxu0 }
0x163d   : > { %8704 = vmatmul.mubr.msk.f32.vlgmr.msra.gmra.mxu0 %vm497_vm6, %v1952_v55 }
0x163e   : > { %v8685_v56 = vpop.f32.mrf.mxu0  ;;  %8713 = vmatprep.mubr.msk.f32.mxu0 %vm9452_vm0, %v9451_v1 }
0x163f   : > { %v2992_v56 = vld [vmem:[%s275_s26] sm:$0xff]  ;;  %s9903_s26 = scalar_lea.vmem %s10405_s3, %s9568_s14  ;;  %s265_s14 = sand.u32 1, %s9437_s19  }
0x1640   : > { %v2119_v57 = vpop.f32.mrf.mxu0 }
0x1641   : > { %8699 = vmatmul.mubr.msk.f32.vlgmr.msra.gmra.mxu1 %vm497_vm6, %v2119_v57  ;;  %v2792_v57 = vld [vmem:[#allocation2 + $0x2a8] sm:$0xff] }
0x1642   : > { %8707 = vmatpush3.xpose.msk.msra.mxu1 %vm497_vm6, %v2272_v58  ;;  %v8695_v59 = vpop.f32.mrf.mxu0  ;;  %8708 = vmatprep.mubr.msk.f32.mxu1 %vm9452_vm0, %v9451_v1  ;;  %v2791_v58 = vld [vmem:[#allocation2 + $0x2a0] sm:$0xff] }
0x1643   : > { %8716 = vmatprep.subr.mxu1 %v9451_v1  ;;  %v2790_v59 = vld [vmem:[#allocation2 + $0x298] sm:$0xff] }
0x1645   : > { %8709 = vmatmul.mubr.msk.f32.vlgmr.msra.gmra.mxu1 %vm497_vm6, %v2270_v60  ;;  %v2880_v60 = vld [vmem:[#allocation2 + $0x2f8] sm:$0xff] }
0x1646   : > { %8718 = vmatprep.mubr.msk.f32.mxu1 %vm9452_vm0, %v9451_v1  ;;  %8717 = vmatpush3.msra.mxu1 %v1788_v20 }
0x1647   : > { %8726 = vmatprep.subr.mxu1 %v9451_v1 }
0x16fd   : > { %v2265_v61 = vpop.f32.mrf.mxu0 }
0x16ff   : > { %v8705_v40 = vpop.f32.mrf.mxu0 }
0x1700   : > { %v2878_v40 = vld [vmem:[#allocation2 + $0x2e8] sm:$0xff] }
0x1701   : > { %v2192_v62 = vpop.f32.mrf.mxu1 }
0x1702   : > { %v2266_v63 = vadd.f32 %v2265_v61, %v2192_v62  ;;  %v2879_v61 = vld [vmem:[#allocation2 + $0x2f0] sm:$0xff]  ;;  %v2877_v62 = vld [vmem:[#allocation2 + $0x2e0] sm:$0xff] }
0x1703   : > { %v8700_v0 = vpop.f32.mrf.mxu1 }
0x1705   : > { %v2343_v2 = vpop.f32.mrf.mxu1 }
0x1706   : > { %v2347_v3 = vmul.f32 0.35355338, %v2343_v2 }
0x1707   : > { %v8710_v4 = vpop.f32.mrf.mxu1 }
0x1708   : > { %v2348_v5 = vadd.f32 %v9617_v43, %v2347_v3 }
0x170a   : > { %v2349_v7 = vsel %vm497_vm6, %v2348_v5, -inf }
0x170b   : > { %2350 = vmax.xlane.f32.xlu0 %v2349_v7 }
0x1721   : > { %2360 = vrot.lane.b32.xlu0 %v9740_v18, %s9460_s12 }
0x1725   : > { %2510 = vrot.lane.b32.xlu0 %v9740_v18, %s9461_s13 }
0x1794   : > { %v2351_v8 = vpop.xlane.xlu0 %2350 }
0x1795   : > { %v2352_v9 = vsub.f32 %v2348_v5, %v2351_v8 }
0x1797   : > { %v2353_v10 = vmul.f32 1.442695, %v2352_v9 }
0x1798   : > { %v2361_v11 = vpop.permute.xlu0 %2360 }
0x1799   : > { %9243 = vpow2.f32 %v2353_v10  ;;  %8712 = vmatpush3.msra.mxu0 %v2361_v11  ;;  %v8195_v10 = vld [vmem:[#allocation2 + $0x318] ss:$0 sm:$0xff] }
0x179a   : > { %8721 = vmatprep.subr.mxu0 %v9451_v1 }
0x179c   : > { %v2511_v13 = vpop.permute.xlu0 %2510 }
0x17a6   : > { %v9244_v12 = vpop.eup %9243 }
0x17a7   : > { %v2355_v14 = vsel %vm497_vm6, %v9244_v12, 0.0 }
0x17a8   : > { %2356 = vadd.xlane.f32.xlu1 %v2355_v14  ;;  %v8196_v14 = vld [vmem:[#allocation2 + $0x320] ss:$0 sm:$0xff] }
0x17b9   : > { %2512 = vrot.lane.b32.xlu1 %v9740_v18, %s9462_s15 }
0x1831   : > { %v2357_v15 = vpop.xlane.xlu1 %2356 }
0x1832   : > { %9245 = vrcp.f32 %v2357_v15 }
0x1835   : > { %v2513_v19 = vpop.permute.xlu1 %2512 }
0x183f   : > { %v9246_v16 = vpop.eup %9245 }
0x1840   : > { %v2359_v17 = vmul.f32 %v9246_v16, %v9244_v12 }
0x1842   : > { %8714 = vmatmul.mubr.msk.f32.vlgmr.msra.gmra.mxu0 %vm497_vm6, %v2359_v17 }
0x1843   : > { %8722 = vmatpush3.xpose.msk.msra.mxu0 %vm497_vm6, %v2513_v19  ;;  %8723 = vmatprep.mubr.msk.f32.mxu0 %vm9452_vm0, %v9451_v1  ;;  %v3000_v19 = vld [vmem:[#allocation2 + $0x4c8] sm:$0xff] }
0x1844   : > { %8731 = vmatprep.subr.mxu0 %v9451_v1 }
0x1846   : > { %8724 = vmatmul.mubr.msk.f32.vlgmr.msra.gmra.mxu0 %vm497_vm6, %v2511_v13  ;;  %v2999_v13 = vld [vmem:[#allocation2 + $0x4c0] sm:$0xff] }
0x1847   : > { %8733 = vmatprep.mubr.msk.f32.mxu0 %vm9452_vm0, %v9451_v1  ;;  %8732 = vmatpush3.msra.mxu0 %v1789_v34 }
0x1848   : > { %8747 = vmatprep.subr.mxu0 %v9451_v1 }
0x1902   : > { %v2432_v21 = vpop.f32.mrf.mxu0 }
0x1903   : > { %8719 = vmatmul.mubr.msk.f32.vlgmr.msra.gmra.mxu1 %vm497_vm6, %v2432_v21  ;;  %v2874_v21 = vld [vmem:[#allocation2 + $0x2c8] sm:$0xff] }
0x1904   : > { %v8715_v22 = vpop.f32.mrf.mxu0  ;;  %8728 = vmatprep.mubr.msk.f32.mxu1 %vm9452_vm0, %v9451_v1 }
0x1905   : > { %v2873_v22 = vld [vmem:[#allocation2 + $0x2c0] sm:$0xff] }
0x1906   : > { %v2584_v23 = vpop.f32.mrf.mxu0 }
0x1907   : > { %v2588_v24 = vmul.f32 0.35355338, %v2584_v23  ;;  %v8197_v23 = vld [vmem:[#allocation2 + $0x2b8] ss:$0 sm:$0xff] }
0x1908   : > { %v8725_v25 = vpop.f32.mrf.mxu0 }
0x1909   : > { %v2589_v26 = vadd.f32 %v9617_v43, %v2588_v24 }
0x190b   : > { %v2590_v27 = vsel %vm497_vm6, %v2589_v26, -inf }
0x190c   : > { %2591 = vmax.xlane.f32.xlu1 %v2590_v27 }
0x1995   : > { %v2592_v28 = vpop.xlane.xlu1 %2591 }
0x1996   : > { %v2593_v29 = vsub.f32 %v2589_v26, %v2592_v28 }
0x1998   : > { %v2594_v30 = vmul.f32 1.442695, %v2593_v29 }
0x199a   : > { %9247 = vpow2.f32 %v2594_v30 }
0x19a7   : > { %v9248_v31 = vpop.eup %9247 }
0x19a8   : > { %v2596_v32 = vsel %vm497_vm6, %v9248_v31, 0.0 }
0x19a9   : > { %2597 = vadd.xlane.f32.xlu0 %v2596_v32 }
0x19bf   : > { %2601 = vrot.lane.b32.xlu0 %v9740_v18, %s9463_s16 }
0x19c3   : > { %v2505_v33 = vpop.f32.mrf.mxu1 }
0x19c4   : > { %v2509_v35 = vadd.f32 %v2505_v33, %v2266_v63  ;;  %v2876_v63 = vld [vmem:[#allocation2 + $0x2d8] sm:$0xff] }
0x19c5   : > { %v8720_v36 = vpop.f32.mrf.mxu1 }
0x1a32   : > { %v2598_v43 = vpop.xlane.xlu0 %2597 }
0x1a33   : > { %9249 = vrcp.f32 %v2598_v43 }
0x1a36   : > { %v2602_v37 = vpop.permute.xlu0 %2601 }
0x1a37   : > { %8727 = vmatpush3.msra.mxu1 %v2602_v37 }
0x1a38   : > { %8736 = vmatprep.subr.mxu1 %v9451_v1 }
0x1a40   : > { %v9250_v38 = vpop.eup %9249 }
0x1a41   : > { %v2600_v39 = vmul.f32 %v9250_v38, %v9248_v31  ;;  %v9351_v31 = vld [vmem:[#allocation2 + $0x4d0] sm:$0xff]  ;;  %v3111_v38 = vld [vmem:[#allocation2 + $0xf8] sm:$0xff] }
0x1a43   : > { %8729 = vmatmul.mubr.msk.f32.vlgmr.msra.gmra.mxu1 %vm497_vm6, %v2600_v39  ;;  %v3110_v39 = vld [vmem:[#allocation2 + $0xf0] sm:$0xff] }
0x1a44   : > { %8744 = vmatprep.mubr.msk.f32.mxu1 %vm9452_vm0, %v9451_v1 }
0x1b03   : > { %v2673_v18 = vpop.f32.mrf.mxu1 }
0x1b04   : > { %8734 = vmatmul.mubr.msk.f32.vlgmr.msra.gmra.mxu0 %vm497_vm6, %v2673_v18  ;;  %v3109_v18 = vld [vmem:[#allocation2 + $0xe8] sm:$0xff] }
0x1b05   : > { %v8730_v41 = vpop.f32.mrf.mxu1  ;;  %8763 = vmatprep.mubr.msk.f32.mxu0 %vm9452_vm0, %v9451_v1  ;;  %8748 = vmatpush3.msra.mxu0 %v2880_v60  ;;  %v8207_v60 = vld [vmem:[#allocation2 + $0x100] ss:$0 sm:$0xff] }
0x1b06   : > { %8749 = vmatprep.subr.mxu0 %v9451_v1  ;;  %v3108_v41 = vld [vmem:[#allocation2 + $0xe0] sm:$0xff] }
0x1b07   : > { %8750 = vmatpush3.msra.mxu0 %v2879_v61 }
0x1b08   : > { %8751 = vmatprep.subr.mxu0 %v9451_v1 }
0x1b09   : > { %8752 = vmatpush3.msra.mxu0 %v2878_v40 }
0x1b0a   : > { %8753 = vmatprep.subr.mxu0 %v9451_v1 }
0x1b0b   : > { %8754 = vmatpush3.msra.mxu0 %v2877_v62 }
0x1b0c   : > { %8755 = vmatprep.subr.mxu0 %v9451_v1 }
0x1b0d   : > { %8756 = vmatpush3.msra.mxu0 %v2876_v63 }
0x1b0e   : > { %8757 = vmatprep.subr.mxu0 %v9451_v1 }
0x1bc4   : > { %v2746_v42 = vpop.f32.mrf.mxu0 }
0x1bc5   : > { %v2750_v45 = vadd.f32 %v2746_v42, %v2509_v35 }
0x1bc6   : > { %v8735_v46 = vpop.f32.mrf.mxu0 }
0x1bc7   : > { %v2756_v47 = vadd.f32 %v8194_v44, %v2750_v45 }
0x1bc9   : > { %v9830_v48 = vadd.f32 %v2756_v47, %v9727_v53  ;;  %v2793_v53 = vld [vmem:[#allocation2 + $0x2b0] sm:$0xff] }
0x1bca   : > { %8737 = vmatpush3.msra.mxu1 %v2793_v53 }
0x1bcb   : > { %v2758_v49 = vsel %vm373_vm3, %v9830_v48, 0.0  ;;  %8738 = vmatprep.subr.mxu1 %v9451_v1 }
0x1bcc   : > { %2759 = vadd.xlane.f32.xlu1 %v2758_v49  ;;  %8739 = vmatpush3.msra.mxu1 %v2792_v57  ;;  %v8206_v57 = vld [vmem:[#allocation2 + $0x220] ss:$0 sm:$0xff] }
0x1bcd   : > { %8740 = vmatprep.subr.mxu1 %v9451_v1 }
0x1bce   : > { %8741 = vmatpush3.msra.mxu1 %v2791_v58 }
0x1bcf   : > { %8742 = vmatprep.subr.mxu1 %v9451_v1 }
0x1bd0   : > { %8743 = vmatpush3.msra.mxu1 %v2790_v59 }
0x1bd1   : > { %8766 = vmatprep.subr.mxu1 %v9451_v1 }
0x1c55   : > { %v2760_v50 = vpop.xlane.xlu1 %2759 }
0x1c56   : > { %v2761_v51 = vmul.f32 0.03125, %v2760_v50 }
0x1c58   : > { %v2762_v52 = vsub.f32 %v9830_v48, %v2761_v51 }
0x1c5a   : > { %v2763_v54 = vmul.f32 %v2762_v52, %v2762_v52  ;;  %v2773_v11 = vmul.f32 %v8195_v10, %v2762_v52 }
0x1c5c   : > { %v2764_v55 = vsel %vm373_vm3, %v2763_v54, 0.0 }
0x1c5d   : > { %2765 = vadd.xlane.f32.xlu1 %v2764_v55  ;;  %v8205_v55 = vld [vmem:[#allocation2 + $0x218] ss:$0 sm:$0xff] }
0x1c6e   : > { %2994 = vperm.xlu1 %9206, %v2992_v56  }
0x1ce6   : > { %v2766_v0 = vpop.xlane.xlu1 %2765 }
0x1ce7   : > { %v2767_v2 = vmul.f32 0.032258064, %v2766_v0 }
0x1ce9   : > { %9251 = vrsqrt.f32 %v2767_v2  ;;  %vm2776_vm12 = vcmp.eq.f32.partialorder %v2767_v2, inf  ;;  %v2779_v5 = vand.u32 2147483648, %v2767_v2  ;;  %vm2778_vm13 = vcmp.eq.f32.partialorder %v2767_v2, 0.0 }
0x1cea   : > { %v2995_v15 = vpop.permute.xlu1 %2994 }
0x1ceb   : > { %vm2996_vm14 = vcmp.eq.s32.totalorder %v2995_v15, %v9580_v6  ;;  %v2875_v6 = vld [vmem:[#allocation2 + $0x2d0] sm:$0xff] }
0x1cec   : > { %v8203_v20 = vsel %vm2996_vm14, 1.0, %v9451_v1  ;;  %8758 = vmatpush3.msra.mxu0 %v2875_v6 }
0x1ced   : > { %8759 = vmatprep.subr.mxu0 %v9451_v1 }
0x1cee   : > { %8760 = vmatpush3.msra.mxu0 %v2874_v21 }
0x1cef   : > { %8761 = vmatprep.subr.mxu0 %v9451_v1 }
0x1cf0   : > { %8762 = vmatpush3.msra.mxu0 %v2873_v22 }
0x1cf1   : > { %8784 = vmatprep.subr.mxu0 %v9451_v1 }
0x1cf6   : > { %v9252_v3 = vpop.eup %9251 }
0x1cf7   : > { %v2775_v4 = vmul.f32 %v9252_v3, %v2767_v2  ;;  %v9906_v3 = vld [vmem:[%s9903_s26] sm:$0xff] }
0x1cf9   : > { %v2777_v7 = vsel %vm2776_vm12, %v2767_v2, %v2775_v4 }
0x1cfa   : > { %v2780_v8 = vsel %vm2778_vm13, %v2779_v5, %v2777_v7 }
0x1cfb   : > { %v2781_v9 = vadd.f32 1e-06, %v2780_v8 }
0x1cfd   : > { %9253 = vrcp.f32 %v2781_v9 }
0x1d0a   : > { %v9254_v12 = vpop.eup %9253 }
0x1d0b   : > { %v2783_v16 = vmul.f32 %v9254_v12, %v2773_v11 }
0x1d0d   : > { %v2789_v17 = vadd.f32 %v8196_v14, %v2783_v16 }
0x1d0f   : > { %8745 = vmatmul.mubr.msk.f32.vlgmr.msra.gmra.mxu1 %vm373_vm3, %v2789_v17 }
0x1d10   : > { %8767 = vmatpush3.msra.mxu1 %v3000_v19  ;;  %8770 = vmatprep.mubr.msk.f32.mxu1 %vm9452_vm0, %v9451_v1 }
0x1d11   : > { %8768 = vmatprep.subr.mxu1 %v9451_v1 }
0x1d12   : > { %8769 = vmatpush3.msra.mxu1 %v2999_v13 }
0x1d13   : > { %8771 = vmatmul.mubr.msk.f32.vlgmr.msra.gmra.mxu1 %vm296_vm1, %v8203_v20  ;;  %8773 = vmatprep.subr.mxu1 %v9451_v1 }
0x1d14   : > { %8781 = vmatprep.mubr.msk.f32.mxu1 %vm9452_vm0, %v9451_v1  ;;  %8774 = vmatpush3.msra.mxu1 %v3111_v38 }
0x1d15   : > { %8775 = vmatprep.subr.mxu1 %v9451_v1 }
0x1d16   : > { %8776 = vmatpush3.msra.mxu1 %v3110_v39 }
0x1d17   : > { %8777 = vmatprep.subr.mxu1 %v9451_v1 }
0x1d18   : > { %8778 = vmatpush3.msra.mxu1 %v3109_v18 }
0x1d19   : > { %8779 = vmatprep.subr.mxu1 %v9451_v1 }
0x1d1a   : > { %8780 = vmatpush3.msra.mxu1 %v3108_v41 }
0x1d1b   : > { %8789 = vmatprep.subr.mxu1 %v9451_v1 }
0x1dcf   : > { %v2868_v24 = vpop.f32.mrf.mxu1 }
0x1dd0   : > { %v2869_v25 = vadd.f32 %v8197_v23, %v2868_v24 }
0x1dd1   : > { %v8746_v26 = vpop.f32.mrf.mxu1 }
0x1dd2   : > { %v2872_v27 = vmax.f32 %v2869_v25, 0.0 }
0x1dd3   : > { %v3070_v28 = vpop.f32.mrf.mxu1 }
0x1dd4   : > { %v3074_v29 = vmul.f32 5.656854, %v3070_v28  ;;  %8764 = vmatmul.mubr.msk.f32.vlgmr.msra.gmra.mxu0 %vm1597_vm9, %v2872_v27 }
0x1dd5   : > { %v8772_v30 = vpop.f32.mrf.mxu1  ;;  %8786 = vmatprep.mubr.msk.f32.mxu0 %vm9452_vm0, %v9451_v1 }
0x1dd6   : > { %v9865_v32 = vadd.f32 %v9351_v31, %v3074_v29 }
0x1dd8   : > { %v3076_v33 = vsel %vm373_vm3, %v9865_v32, 0.0 }
0x1dd9   : > { %3077 = vadd.xlane.f32.xlu0 %v3076_v33 }
0x1e62   : > { %v3078_v34 = vpop.xlane.xlu0 %3077 }
0x1e63   : > { %v3079_v35 = vmul.f32 0.03125, %v3078_v34  ;;  %v3190_v34 = vld [vmem:[#allocation2 + $0x108] sm:$0xff] }
0x1e65   : > { %v3080_v36 = vsub.f32 %v9865_v32, %v3079_v35  ;;  %v3191_v35 = vld [vmem:[#allocation2 + $0x110] sm:$0xff] }
0x1e67   : > { %v3081_v43 = vmul.f32 %v3080_v36, %v3080_v36  ;;  %v3091_v56 = vmul.f32 %v8205_v55, %v3080_v36 }
0x1e69   : > { %v3082_v37 = vsel %vm373_vm3, %v3081_v43, 0.0 }
0x1e6a   : > { %3083 = vadd.xlane.f32.xlu1 %v3082_v37 }
0x1e94   : > { %v9875_v42 = vpop.f32.mrf.mxu0 }
0x1e96   : > { %v8765_v44 = vpop.f32.mrf.mxu0 }
0x1ef3   : > { %v3084_v45 = vpop.xlane.xlu1 %3083 }
0x1ef4   : > { %v3085_v46 = vmul.f32 0.032258064, %v3084_v45 }
0x1ef6   : > { %9255 = vrsqrt.f32 %v3085_v46  ;;  %vm3094_vm15 = vcmp.eq.f32.partialorder %v3085_v46, inf  ;;  %v3097_v50 = vand.u32 2147483648, %v3085_v46  ;;  %vm3096_vm1 = vcmp.eq.f32.partialorder %v3085_v46, 0.0 }
0x1f03   : > { %v9256_v47 = vpop.eup %9255 }
0x1f04   : > { %v3093_v49 = vmul.f32 %v9256_v47, %v3085_v46 }
0x1f06   : > { %v3095_v51 = vsel %vm3094_vm15, %v3085_v46, %v3093_v49 }
0x1f07   : > { %v3098_v52 = vsel %vm3096_vm1, %v3097_v50, %v3095_v51 }
0x1f08   : > { %v3099_v54 = vadd.f32 1e-06, %v3098_v52 }
0x1f0a   : > { %9257 = vrcp.f32 %v3099_v54 }
0x1f17   : > { %v9258_v53 = vpop.eup %9257 }
0x1f18   : > { %v3101_v58 = vmul.f32 %v9258_v53, %v3091_v56 }
0x1f1a   : > { %v3107_v59 = vadd.f32 %v8206_v57, %v3101_v58 }
0x1f1c   : > { %8782 = vmatmul.mubr.msk.f32.vlgmr.msra.gmra.mxu1 %vm373_vm3, %v3107_v59 }
0x1f1d   : > { %8791 = vmatprep.mubr.msk.f32.mxu1 %vm9452_vm0, %v9451_v1 }
0x1fdc   : > { %v3186_v61 = vpop.f32.mrf.mxu1 }
0x1fdd   : > { %v9880_v40 = vadd.f32 %v8207_v60, %v3186_v61 }
0x1fde   : > { %v8783_v62 = vpop.f32.mrf.mxu1 }
0x1fdf   : > { %3362 = vrot.lane.b32.xlu1 %v9880_v40, %s9454_s6  ;;  %3195 = vrot.lane.b32.xlu0 %v9880_v40, %s9453_s23 }
0x1fe3   : > { %3360 = vrot.lane.b32.xlu0 %v9880_v40, %s9456_s8 }
0x2051   : > { %v3196_v63 = vpop.permute.xlu0 %3195  ;;  %v3363_v0 = vpop.permute.xlu1 %3362 }
0x2052   : > { %8785 = vmatpush3.xpose.msk.msra.mxu0 %vm497_vm6, %v3196_v63 }
0x2053   : > { %8794 = vmatprep.subr.mxu0 %v9451_v1 }
0x2055   : > { %8787 = vmatmul.mubr.msk.f32.vlgmr.msra.gmra.mxu0 %vm497_vm6, %v9880_v40  ;;  %v3361_v2 = vpop.permute.xlu0 %3360 }
0x2056   : > { %8795 = vmatpush3.xpose.msk.msra.mxu0 %vm497_vm6, %v3363_v0  ;;  %8796 = vmatprep.mubr.msk.f32.mxu0 %vm9452_vm0, %v9451_v1 }
0x2057   : > { %8804 = vmatprep.subr.mxu0 %v9451_v1 }
0x2059   : > { %8797 = vmatmul.mubr.msk.f32.vlgmr.msra.gmra.mxu0 %vm497_vm6, %v3361_v2  ;;  %v3192_v2 = vld [vmem:[#allocation2 + $0x118] sm:$0xff] }
0x205a   : > { %8806 = vmatprep.mubr.msk.f32.mxu0 %vm9452_vm0, %v9451_v1  ;;  %8805 = vmatpush3.msra.mxu0 %v3191_v35 }
0x205b   : > { %8814 = vmatprep.subr.mxu0 %v9451_v1 }
0x2115   : > { %v3267_v4 = vpop.f32.mrf.mxu0 }
0x2116   : > { %v3271_v5 = vmul.f32 0.35355338, %v3267_v4 }
0x2117   : > { %v8788_v7 = vpop.f32.mrf.mxu0 }
0x2118   : > { %v3272_v8 = vadd.f32 %v3271_v5, %v9906_v3  ;;  %v8199_v5 = vld [vmem:[#allocation2 + $0x300] ss:$0 sm:$0xff] }
0x2119   : > { %v3434_v9 = vpop.f32.mrf.mxu0 }
0x211a   : > { %v3438_v10 = vmul.f32 0.35355338, %v3434_v9  ;;  %v3273_v11 = vsel %vm497_vm6, %v3272_v8, -inf  ;;  %v2956_v9 = vadd.f32 %v8199_v5, %v9875_v42  ;;  %v4194_v5 = vld [vmem:[#allocation2 + $0x130] sm:$0xff] }
0x211b   : > { %3274 = vmax.xlane.f32.xlu0 %v3273_v11  ;;  %v8798_v12 = vpop.f32.mrf.mxu0 }
0x211c   : > { %v3439_v14 = vadd.f32 %v3438_v10, %v9906_v3 }
0x211e   : > { %v3440_v15 = vsel %vm497_vm6, %v3439_v14, -inf }
0x211f   : > { %3441 = vmax.xlane.f32.xlu1 %v3440_v15  ;;  %v2959_v15 = vadd.f32 %v2956_v9, %v9830_v48 }
0x2130   : > { %3284 = vrot.lane.b32.xlu1 %v9880_v40, %s9455_s7 }
0x2134   : > { %3675 = vrot.lane.b32.xlu1 %v9880_v40, %s9459_s11 }
0x2138   : > { %3673 = vrot.lane.b32.xlu1 %v9880_v40, %s9458_s10 }
0x21a4   : > { %v3275_v16 = vpop.xlane.xlu0 %3274 }
0x21a5   : > { %v3276_v17 = vsub.f32 %v3272_v8, %v3275_v16  ;;  %v2960_v16 = vsel %vm373_vm3, %v2959_v15, 0.0 }
0x21a7   : > { %v3277_v19 = vmul.f32 1.442695, %v3276_v17 }
0x21a8   : > { %v3442_v13 = vpop.xlane.xlu1 %3441 }
0x21a9   : > { %9259 = vpow2.f32 %v3277_v19  ;;  %v3443_v20 = vsub.f32 %v3439_v14, %v3442_v13 }
0x21ab   : > { %v3444_v6 = vmul.f32 1.442695, %v3443_v20 }
0x21ac   : > { %v3285_v21 = vpop.permute.xlu1 %3284 }
0x21ad   : > { %9261 = vpow2.f32 %v3444_v6  ;;  %8790 = vmatpush3.msra.mxu1 %v3285_v21 }
0x21ae   : > { %8799 = vmatprep.subr.mxu1 %v9451_v1 }
0x21b0   : > { %v3676_v43 = vpop.permute.xlu1 %3675 }
0x21b4   : > { %v3674_v18 = vpop.permute.xlu1 %3673 }
0x21b6   : > { %v9260_v22 = vpop.eup %9259 }
0x21b7   : > { %v3279_v23 = vsel %vm497_vm6, %v9260_v22, 0.0 }
0x21b8   : > { %3280 = vadd.xlane.f32.xlu0 %v3279_v23 }
0x21ba   : > { %v9262_v24 = vpop.eup %9261 }
0x21bb   : > { %v3446_v25 = vsel %vm497_vm6, %v9262_v24, 0.0 }
0x21bc   : > { %3447 = vadd.xlane.f32.xlu0 %v3446_v25 }
0x21d2   : > { %3451 = vrot.lane.b32.xlu0 %v9880_v40, %s9457_s9 }
0x2241   : > { %v3281_v26 = vpop.xlane.xlu0 %3280 }
0x2242   : > { %9263 = vrcp.f32 %v3281_v26 }
0x2245   : > { %v3448_v27 = vpop.xlane.xlu0 %3447 }
0x2246   : > { %9265 = vrcp.f32 %v3448_v27 }
0x2249   : > { %v3452_v30 = vpop.permute.xlu0 %3451 }
0x224f   : > { %v9264_v28 = vpop.eup %9263 }
0x2250   : > { %v3283_v29 = vmul.f32 %v9264_v28, %v9260_v22 }
0x2252   : > { %8792 = vmatmul.mubr.msk.f32.vlgmr.msra.gmra.mxu1 %vm497_vm6, %v3283_v29 }
0x2253   : > { %v9266_v31 = vpop.eup %9265  ;;  %8800 = vmatpush3.msra.mxu1 %v3452_v30  ;;  %8801 = vmatprep.mubr.msk.f32.mxu1 %vm9452_vm0, %v9451_v1  ;;  %v8225_v30 = vld [vmem:[#allocation2 + $0x128] ss:$0 sm:$0xff] }
0x2254   : > { %v3450_v33 = vmul.f32 %v9266_v31, %v9262_v24  ;;  %8809 = vmatprep.subr.mxu1 %v9451_v1 }
0x2256   : > { %8802 = vmatmul.mubr.msk.f32.vlgmr.msra.gmra.mxu1 %vm497_vm6, %v3450_v33 }
0x2257   : > { %8811 = vmatprep.mubr.msk.f32.mxu1 %vm9452_vm0, %v9451_v1  ;;  %8810 = vmatpush3.msra.mxu1 %v3190_v34 }
0x2258   : > { %8819 = vmatprep.subr.mxu1 %v9451_v1 }
0x2312   : > { %v3356_v36 = vpop.f32.mrf.mxu1 }
0x2313   : > { %8812 = vmatmul.mubr.msk.f32.vlgmr.msra.gmra.mxu1 %vm497_vm6, %v3356_v36 }
0x2314   : > { %v8793_v37 = vpop.f32.mrf.mxu1  ;;  %8821 = vmatprep.mubr.msk.f32.mxu1 %vm9452_vm0, %v9451_v1 }
0x2316   : > { %v3523_v38 = vpop.f32.mrf.mxu1 }
0x2317   : > { %8807 = vmatmul.mubr.msk.f32.vlgmr.msra.gmra.mxu0 %vm497_vm6, %v3523_v38 }
0x2318   : > { %8815 = vmatpush3.xpose.msk.msra.mxu0 %vm497_vm6, %v3676_v43  ;;  %v8803_v39 = vpop.f32.mrf.mxu1  ;;  %8816 = vmatprep.mubr.msk.f32.mxu0 %vm9452_vm0, %v9451_v1 }
0x2319   : > { %8824 = vmatprep.subr.mxu0 %v9451_v1  ;;  %v4279_v39 = vld [vmem:[#allocation2 + $0x170] sm:$0xff] }
0x231b   : > { %8817 = vmatmul.mubr.msk.f32.vlgmr.msra.gmra.mxu0 %vm497_vm6, %v3674_v18  ;;  %v4278_v18 = vld [vmem:[#allocation2 + $0x168] sm:$0xff] }
0x231c   : > { %8826 = vmatprep.mubr.msk.f32.mxu0 %vm9452_vm0, %v9451_v1  ;;  %8825 = vmatpush3.msra.mxu0 %v3192_v2 }
0x231d   : > { %8834 = vmatprep.subr.mxu0 %v9451_v1 }
0x23d3   : > { %v3669_v41 = vpop.f32.mrf.mxu1 }
0x23d5   : > { %v8813_v44 = vpop.f32.mrf.mxu1 }
0x23d6   : > { %v4276_v44 = vld [vmem:[#allocation2 + $0x158] sm:$0xff] }
0x23d7   : > { %v3596_v45 = vpop.f32.mrf.mxu0 }
0x23d8   : > { %v3670_v46 = vadd.f32 %v3669_v41, %v3596_v45  ;;  %v4277_v41 = vld [vmem:[#allocation2 + $0x160] sm:$0xff] }
0x23d9   : > { %v8808_v47 = vpop.f32.mrf.mxu0 }
0x23db   : > { %v3747_v49 = vpop.f32.mrf.mxu0 }
0x23dc   : > { %v3751_v50 = vmul.f32 0.35355338, %v3747_v49 }
0x23dd   : > { %v8818_v51 = vpop.f32.mrf.mxu0 }
0x23de   : > { %v3752_v52 = vadd.f32 %v3751_v50, %v9906_v3 }
0x23e0   : > { %v3753_v54 = vsel %vm497_vm6, %v3752_v52, -inf }
0x23e1   : > { %3754 = vmax.xlane.f32.xlu0 %v3753_v54 }
0x23f7   : > { %3764 = vrot.lane.b32.xlu0 %v9880_v40, %s9460_s12 }
0x23fb   : > { %3914 = vrot.lane.b32.xlu0 %v9880_v40, %s9461_s13 }
0x246a   : > { %v3755_v55 = vpop.xlane.xlu0 %3754 }
0x246b   : > { %v3756_v56 = vsub.f32 %v3752_v52, %v3755_v55 }
0x246d   : > { %v3757_v53 = vmul.f32 1.442695, %v3756_v56 }
0x246e   : > { %v3765_v57 = vpop.permute.xlu0 %3764 }
0x246f   : > { %9267 = vpow2.f32 %v3757_v53  ;;  %8820 = vmatpush3.msra.mxu1 %v3765_v57 }
0x2470   : > { %8829 = vmatprep.subr.mxu1 %v9451_v1 }
0x2472   : > { %v3915_v0 = vpop.permute.xlu0 %3914 }
0x247c   : > { %v9268_v58 = vpop.eup %9267 }
0x247d   : > { %v3759_v59 = vsel %vm497_vm6, %v9268_v58, 0.0 }
0x247e   : > { %3760 = vadd.xlane.f32.xlu1 %v3759_v59 }
0x248f   : > { %3916 = vrot.lane.b32.xlu1 %v9880_v40, %s9462_s15 }
0x2507   : > { %v3761_v60 = vpop.xlane.xlu1 %3760 }
0x2508   : > { %9269 = vrcp.f32 %v3761_v60 }
0x250b   : > { %v3917_v63 = vpop.permute.xlu1 %3916 }
0x2515   : > { %v9270_v61 = vpop.eup %9269 }
0x2516   : > { %v3763_v62 = vmul.f32 %v9270_v61, %v9268_v58  ;;  %v8201_v58 = vld [vmem:[#allocation2 + $0x490] ss:$0 sm:$0xff]  ;;  %v8202_v61 = vld [vmem:[#allocation2 + $0x498] ss:$0 sm:$0xff] }
0x2518   : > { %8822 = vmatmul.mubr.msk.f32.vlgmr.msra.gmra.mxu1 %vm497_vm6, %v3763_v62 }
0x2519   : > { %8830 = vmatpush3.xpose.msk.msra.mxu1 %vm497_vm6, %v3917_v63  ;;  %8831 = vmatprep.mubr.msk.f32.mxu1 %vm9452_vm0, %v9451_v1  ;;  %v4197_v63 = vld [vmem:[#allocation2 + $0x148] sm:$0xff] }
0x251a   : > { %8839 = vmatprep.subr.mxu1 %v9451_v1 }
0x251c   : > { %8832 = vmatmul.mubr.msk.f32.vlgmr.msra.gmra.mxu1 %vm497_vm6, %v3915_v0  ;;  %v4196_v0 = vld [vmem:[#allocation2 + $0x140] sm:$0xff] }
0x251d   : > { %8841 = vmatprep.mubr.msk.f32.mxu1 %vm9452_vm0, %v9451_v1 }
0x25d8   : > { %v3836_v4 = vpop.f32.mrf.mxu1 }
0x25d9   : > { %8827 = vmatmul.mubr.msk.f32.vlgmr.msra.gmra.mxu0 %vm497_vm6, %v3836_v4  ;;  %v4195_v4 = vld [vmem:[#allocation2 + $0x138] sm:$0xff] }
0x25da   : > { %v8823_v7 = vpop.f32.mrf.mxu1  ;;  %8836 = vmatprep.mubr.msk.f32.mxu0 %vm9452_vm0, %v9451_v1 }
0x25dc   : > { %v3988_v8 = vpop.f32.mrf.mxu1 }
0x25dd   : > { %v3992_v10 = vmul.f32 0.35355338, %v3988_v8 }
0x25de   : > { %v8833_v11 = vpop.f32.mrf.mxu1 }
0x25df   : > { %v3993_v12 = vadd.f32 %v3992_v10, %v9906_v3  ;;  %v3193_v3 = vld [vmem:[#allocation2 + $0x120] sm:$0xff] }
0x25e0   : > { %8840 = vmatpush3.msra.mxu1 %v3193_v3 }
0x25e1   : > { %v3994_v14 = vsel %vm497_vm6, %v3993_v12, -inf  ;;  %8855 = vmatprep.subr.mxu1 %v9451_v1 }
0x25e2   : > { %3995 = vmax.xlane.f32.xlu1 %v3994_v14 }
0x25e6   : > { %2961 = vadd.xlane.f32.xlu1 %v2960_v16  ;;  %v8226_v16 = vld [vmem:[#allocation2 + $0x228] ss:$0 sm:$0xff] }
0x266b   : > { %v3996_v17 = vpop.xlane.xlu1 %3995 }
0x266c   : > { %v3997_v19 = vsub.f32 %v3993_v12, %v3996_v17 }
0x266e   : > { %v3998_v13 = vmul.f32 1.442695, %v3997_v19 }
0x266f   : > { %v2962_v27 = vpop.xlane.xlu1 %2961 }
0x2670   : > { %9271 = vpow2.f32 %v3998_v13  ;;  %v2963_v28 = vmul.f32 0.03125, %v2962_v27  ;;  %v8227_v13 = vld [vmem:[#allocation2 + $0x230] ss:$0 sm:$0xff] }
0x2672   : > { %v2964_v34 = vsub.f32 %v2959_v15, %v2963_v28 }
0x2674   : > { %v2965_v37 = vmul.f32 %v2964_v34, %v2964_v34  ;;  %v2975_v59 = vmul.f32 %v8201_v58, %v2964_v34 }
0x2676   : > { %v2966_v38 = vsel %vm373_vm3, %v2965_v37, 0.0 }
0x267d   : > { %v9272_v20 = vpop.eup %9271 }
0x267e   : > { %v4000_v6 = vsel %vm497_vm6, %v9272_v20, 0.0 }
0x267f   : > { %4001 = vadd.xlane.f32.xlu0 %v4000_v6 }
0x2695   : > { %4005 = vrot.lane.b32.xlu0 %v9880_v40, %s9463_s16 }
0x2699   : > { %v3909_v42 = vpop.f32.mrf.mxu0 }
0x269a   : > { %v3913_v21 = vadd.f32 %v3909_v42, %v3670_v46  ;;  %v8230_v42 = vld [vmem:[#allocation2 + $0x178] ss:$0 sm:$0xff] }
0x269b   : > { %v8828_v48 = vpop.f32.mrf.mxu0 }
0x2708   : > { %v4002_v22 = vpop.xlane.xlu0 %4001 }
0x2709   : > { %9273 = vrcp.f32 %v4002_v22  ;;  %v8228_v22 = vld [vmem:[#allocation2 + $0x150] ss:$0 sm:$0xff] }
0x270c   : > { %v4006_v23 = vpop.permute.xlu0 %4005 }
0x270d   : > { %8835 = vmatpush3.msra.mxu0 %v4006_v23 }
0x270e   : > { %8844 = vmatprep.subr.mxu0 %v9451_v1 }
0x2716   : > { %v9274_v24 = vpop.eup %9273 }
0x2717   : > { %v4004_v25 = vmul.f32 %v9274_v24, %v9272_v20 }
0x2719   : > { %8837 = vmatmul.mubr.msk.f32.vlgmr.msra.gmra.mxu0 %vm497_vm6, %v4004_v25 }
0x271a   : > { %8852 = vmatprep.mubr.msk.f32.mxu0 %vm9452_vm0, %v9451_v1  ;;  %8845 = vmatpush3.msra.mxu0 %v4197_v63 }
0x271b   : > { %8846 = vmatprep.subr.mxu0 %v9451_v1 }
0x271c   : > { %8847 = vmatpush3.msra.mxu0 %v4196_v0 }
0x271d   : > { %8848 = vmatprep.subr.mxu0 %v9451_v1 }
0x271e   : > { %8849 = vmatpush3.msra.mxu0 %v4195_v4 }
0x271f   : > { %8850 = vmatprep.subr.mxu0 %v9451_v1 }
0x2720   : > { %8851 = vmatpush3.msra.mxu0 %v4194_v5 }
0x2721   : > { %8866 = vmatprep.subr.mxu0 %v9451_v1 }
0x27d9   : > { %v4077_v40 = vpop.f32.mrf.mxu0 }
0x27da   : > { %8842 = vmatmul.mubr.msk.f32.vlgmr.msra.gmra.mxu1 %vm497_vm6, %v4077_v40 }
0x27db   : > { %v8838_v26 = vpop.f32.mrf.mxu0  ;;  %8863 = vmatprep.mubr.msk.f32.mxu1 %vm9452_vm0, %v9451_v1  ;;  %8856 = vmatpush3.msra.mxu1 %v4279_v39 }
0x27dc   : > { %8857 = vmatprep.subr.mxu1 %v9451_v1 }
0x27dd   : > { %8858 = vmatpush3.msra.mxu1 %v4278_v18 }
0x27de   : > { %8859 = vmatprep.subr.mxu1 %v9451_v1 }
0x27df   : > { %8860 = vmatpush3.msra.mxu1 %v4277_v41 }
0x27e0   : > { %8861 = vmatprep.subr.mxu1 %v9451_v1 }
0x27e1   : > { %8862 = vmatpush3.msra.mxu1 %v4276_v44 }
0x27e2   : > { %8871 = vmatprep.subr.mxu1 %v9451_v1 }
0x289a   : > { %v4150_v29 = vpop.f32.mrf.mxu1 }
0x289b   : > { %v4154_v31 = vadd.f32 %v4150_v29, %v3913_v21 }
0x289c   : > { %v8843_v33 = vpop.f32.mrf.mxu1 }
0x289d   : > { %v4160_v35 = vadd.f32 %v8225_v30, %v4154_v31  ;;  %v10027_v30 = vld [vmem:[%s9614_s30] ss:$0 sm:$0xff] }
0x289f   : > { %v9982_v36 = vadd.f32 %v4160_v35, %v9865_v32 }
0x28a1   : > { %v4162_v43 = vsel %vm373_vm3, %v9982_v36, 0.0 }
0x28a2   : > { %4163 = vadd.xlane.f32.xlu1 %v4162_v43 }
0x28a6   : > { %2967 = vadd.xlane.f32.xlu1 %v2966_v38 }
0x292b   : > { %v4164_v32 = vpop.xlane.xlu1 %4163 }
0x292c   : > { %v4165_v45 = vmul.f32 0.03125, %v4164_v32 }
0x292e   : > { %v4166_v46 = vsub.f32 %v9982_v36, %v4165_v45 }
0x292f   : > { %v2968_v47 = vpop.xlane.xlu1 %2967 }
0x2930   : > { %v2969_v49 = vmul.f32 0.032258064, %v2968_v47  ;;  %v4167_v50 = vmul.f32 %v4166_v46, %v4166_v46  ;;  %v4177_v17 = vmul.f32 %v8226_v16, %v4166_v46 }
0x2932   : > { %9275 = vrsqrt.f32 %v2969_v49  ;;  %v4168_v51 = vsel %vm373_vm3, %v4167_v50, 0.0  ;;  %vm2978_vm2 = vcmp.eq.f32.partialorder %v2969_v49, inf  ;;  %v2981_v55 = vand.u32 2147483648, %v2969_v49 }
0x2933   : > { %4169 = vadd.xlane.f32.xlu1 %v4168_v51  ;;  %vm2980_vm4 = vcmp.eq.f32.partialorder %v2969_v49, 0.0 }
0x293f   : > { %v9276_v52 = vpop.eup %9275 }
0x2940   : > { %v2977_v54 = vmul.f32 %v9276_v52, %v2969_v49 }
0x2942   : > { %v2979_v56 = vsel %vm2978_vm2, %v2969_v49, %v2977_v54 }
0x2943   : > { %v2982_v53 = vsel %vm2980_vm4, %v2981_v55, %v2979_v56 }
0x2944   : > { %v2983_v57 = vadd.f32 1e-06, %v2982_v53 }
0x2946   : > { %9277 = vrcp.f32 %v2983_v57 }
0x2953   : > { %v9278_v60 = vpop.eup %9277 }
0x2954   : > { %v2985_v62 = vmul.f32 %v9278_v60, %v2975_v59  ;;  %v4358_v59 = vld [vmem:[#allocation2 + $0x180] sm:$0xff]  ;;  %v4359_v60 = vld [vmem:[#allocation2 + $0x188] sm:$0xff] }
0x2956   : > { %v9993_v2 = vadd.f32 %v8202_v61, %v2985_v62 }
0x2958   : > { %8864 = vmatmul.mubr.msk.f32.vlgmr.msra.gmra.mxu1 %vm373_vm3, %v9993_v2 }
0x2959   : > { %8873 = vmatprep.mubr.msk.f32.mxu1 %vm9452_vm0, %v9451_v1 }
0x29bc   : > { %v4170_v7 = vpop.xlane.xlu1 %4169 }
0x29bd   : > { %v4171_v8 = vmul.f32 0.032258064, %v4170_v7 }
0x29bf   : > { %9279 = vrsqrt.f32 %v4171_v8  ;;  %vm4180_vm5 = vcmp.eq.f32.partialorder %v4171_v8, inf  ;;  %v4183_v11 = vand.u32 2147483648, %v4171_v8  ;;  %vm4182_vm7 = vcmp.eq.f32.partialorder %v4171_v8, 0.0 }
0x29cc   : > { %v9280_v9 = vpop.eup %9279 }
0x29cd   : > { %v4179_v10 = vmul.f32 %v9280_v9, %v4171_v8 }
0x29cf   : > { %v4181_v12 = vsel %vm4180_vm5, %v4171_v8, %v4179_v10 }
0x29d0   : > { %v4184_v14 = vsel %vm4182_vm7, %v4183_v11, %v4181_v12 }
0x29d1   : > { %v4185_v15 = vadd.f32 1e-06, %v4184_v14 }
0x29d3   : > { %9281 = vrcp.f32 %v4185_v15 }
0x29e0   : > { %v9282_v19 = vpop.eup %9281 }
0x29e1   : > { %v4187_v20 = vmul.f32 %v9282_v19, %v4177_v17 }
0x29e3   : > { %v4193_v6 = vadd.f32 %v8227_v13, %v4187_v20 }
0x29e5   : > { %8853 = vmatmul.mubr.msk.f32.vlgmr.msra.gmra.mxu0 %vm373_vm3, %v4193_v6 }
0x29e6   : > { %8868 = vmatprep.mubr.msk.f32.mxu0 %vm9452_vm0, %v9451_v1 }
0x2a18   : > { %v4354_v3 = vpop.f32.mrf.mxu1 }
0x2a19   : > { %v10006_v21 = vadd.f32 %v8230_v42, %v4354_v3 }
0x2a1a   : > { %v8865_v48 = vpop.f32.mrf.mxu1 }
0x2a1b   : > { %4529 = vrot.lane.b32.xlu1 %v10006_v21, %s9456_s8  ;;  %8867 = vmatpush3.xpose.msk.msra.mxu0 %vm497_vm6, %v10006_v21 }
0x2a1c   : > { %8876 = vmatprep.subr.mxu0 %v9451_v1 }
0x2a8d   : > { %v4530_v40 = vpop.permute.xlu1 %4529 }
0x2aa5   : > { %v4272_v23 = vpop.f32.mrf.mxu0 }
0x2aa6   : > { %v10013_v24 = vadd.f32 %v8228_v22, %v4272_v23 }
0x2aa7   : > { %v8854_v25 = vpop.f32.mrf.mxu0 }
0x2aa8   : > { %4527 = vrot.lane.b32.xlu0 %v10013_v24, %s9456_s8  ;;  %8869 = vmatmul.mubr.msk.f32.vlgmr.msra.gmra.mxu0 %vm497_vm6, %v10013_v24 }
0x2aa9   : > { %8877 = vmatpush3.xpose.msk.msra.mxu0 %vm497_vm6, %v4530_v40  ;;  %8878 = vmatprep.mubr.msk.f32.mxu0 %vm9452_vm0, %v9451_v1  ;;  %v4360_v40 = vld [vmem:[#allocation2 + $0x190] sm:$0xff] }
0x2aaa   : > { %8886 = vmatprep.subr.mxu0 %v9451_v1 }
0x2b1a   : > { %v4528_v26 = vpop.permute.xlu0 %4527 }
0x2b1b   : > { %8879 = vmatmul.mubr.msk.f32.vlgmr.msra.gmra.mxu0 %vm497_vm6, %v4528_v26 }
0x2b1c   : > { %8888 = vmatprep.mubr.msk.f32.mxu0 %vm9452_vm0, %v9451_v1  ;;  %8887 = vmatpush3.msra.mxu0 %v4359_v60 }
0x2b1d   : > { %8896 = vmatprep.subr.mxu0 %v9451_v1 }
0x2b68   : > { %v4434_v27 = vpop.f32.mrf.mxu0 }
0x2b69   : > { %v4438_v28 = vmul.f32 0.35355338, %v4434_v27 }
0x2b6a   : > { %v8870_v29 = vpop.f32.mrf.mxu0 }
0x2b6b   : > { %v4439_v31 = vadd.f32 %v10027_v30, %v4438_v28 }
0x2b6d   : > { %v4440_v33 = vsel %vm497_vm6, %v4439_v31, -inf }
0x2b6e   : > { %4441 = vmax.xlane.f32.xlu0 %v4440_v33 }
0x2bdb   : > { %v4601_v34 = vpop.f32.mrf.mxu0 }
0x2bdc   : > { %v4605_v35 = vmul.f32 0.35355338, %v4601_v34 }
0x2bdd   : > { %v8880_v43 = vpop.f32.mrf.mxu0 }
0x2bde   : > { %v4606_v37 = vadd.f32 %v10027_v30, %v4605_v35 }
0x2be0   : > { %v4607_v38 = vsel %vm497_vm6, %v4606_v37, -inf }
0x2be1   : > { %4608 = vmax.xlane.f32.xlu1 %v4607_v38 }
0x2bf2   : > { %4618 = vrot.lane.b32.xlu1 %v10006_v21, %s9454_s6 }
0x2bf6   : > { %4840 = vrot.lane.b32.xlu1 %v10013_v24, %s9458_s10 }
0x2bf7   : > { %v4442_v39 = vpop.xlane.xlu0 %4441 }
0x2bf8   : > { %v4443_v18 = vsub.f32 %v4439_v31, %v4442_v39 }
0x2bfa   : > { %v4444_v41 = vmul.f32 1.442695, %v4443_v18 }
0x2bfc   : > { %9283 = vpow2.f32 %v4444_v41  ;;  %v4361_v41 = vld [vmem:[#allocation2 + $0x198] sm:$0xff] }
0x2c09   : > { %v9284_v44 = vpop.eup %9283 }
0x2c0a   : > { %v4446_v32 = vsel %vm497_vm6, %v9284_v44, 0.0 }
0x2c0b   : > { %4447 = vadd.xlane.f32.xlu0 %v4446_v32 }
0x2c6a   : > { %v4609_v45 = vpop.xlane.xlu1 %4608 }
0x2c6b   : > { %v4610_v46 = vsub.f32 %v4606_v37, %v4609_v45 }
0x2c6d   : > { %v4611_v47 = vmul.f32 1.442695, %v4610_v46 }
0x2c6e   : > { %v4619_v53 = vpop.permute.xlu1 %4618 }
0x2c6f   : > { %9285 = vpow2.f32 %v4611_v47 }
0x2c72   : > { %v4841_v5 = vpop.permute.xlu1 %4840 }
0x2c7c   : > { %v9286_v49 = vpop.eup %9285 }
0x2c7d   : > { %v4613_v50 = vsel %vm497_vm6, %v9286_v49, 0.0 }
0x2c7e   : > { %4614 = vadd.xlane.f32.xlu0 %v4613_v50 }
0x2c94   : > { %4451 = vrot.lane.b32.xlu0 %v10006_v21, %s9453_s23  ;;  %v4448_v51 = vpop.xlane.xlu0 %4447 }
0x2c95   : > { %9287 = vrcp.f32 %v4448_v51 }
0x2c98   : > { %4842 = vrot.lane.b32.xlu0 %v10006_v21, %s9458_s10 }
0x2ca2   : > { %v9288_v54 = vpop.eup %9287 }
0x2ca3   : > { %v4450_v56 = vmul.f32 %v9288_v54, %v9284_v44 }
0x2d07   : > { %v4615_v52 = vpop.xlane.xlu0 %4614 }
0x2d08   : > { %9289 = vrcp.f32 %v4615_v52  ;;  %v8248_v52 = vld [vmem:[#allocation2 + $0x1a0] ss:$0 sm:$0xff] }
0x2d0b   : > { %v4452_v55 = vpop.permute.xlu0 %4451 }
0x2d0c   : > { %8872 = vmatpush3.msra.mxu1 %v4452_v55 }
0x2d0d   : > { %8874 = vmatmul.mubr.msk.f32.vlgmr.msra.gmra.mxu1 %vm497_vm6, %v4450_v56  ;;  %8881 = vmatprep.subr.mxu1 %v9451_v1 }
0x2d0e   : > { %8882 = vmatpush3.msra.mxu1 %v4619_v53  ;;  %8883 = vmatprep.mubr.msk.f32.mxu1 %vm9452_vm0, %v9451_v1 }
0x2d0f   : > { %8891 = vmatprep.subr.mxu1 %v9451_v1  ;;  %v4843_v0 = vpop.permute.xlu0 %4842 }
0x2d15   : > { %v9290_v57 = vpop.eup %9289 }
0x2d16   : > { %v4617_v58 = vmul.f32 %v9290_v57, %v9286_v49 }
0x2d18   : > { %8884 = vmatmul.mubr.msk.f32.vlgmr.msra.gmra.mxu1 %vm497_vm6, %v4617_v58 }
0x2d19   : > { %8893 = vmatprep.mubr.msk.f32.mxu1 %vm9452_vm0, %v9451_v1  ;;  %8892 = vmatpush3.msra.mxu1 %v4358_v59 }
0x2d1a   : > { %8901 = vmatprep.subr.mxu1 %v9451_v1 }
0x2dcd   : > { %v4523_v61 = vpop.f32.mrf.mxu1 }
0x2dce   : > { %8894 = vmatmul.mubr.msk.f32.vlgmr.msra.gmra.mxu1 %vm497_vm6, %v4523_v61 }
0x2dcf   : > { %v8875_v62 = vpop.f32.mrf.mxu1  ;;  %8903 = vmatprep.mubr.msk.f32.mxu1 %vm9452_vm0, %v9451_v1 }
0x2dd8   : > { %v4690_v63 = vpop.f32.mrf.mxu1 }
0x2dd9   : > { %8889 = vmatmul.mubr.msk.f32.vlgmr.msra.gmra.mxu0 %vm497_vm6, %v4690_v63  ;;  %v5364_v63 = vld [vmem:[#allocation2 + $0x1c0] sm:$0xff] }
0x2dda   : > { %8897 = vmatpush3.xpose.msk.msra.mxu0 %vm497_vm6, %v4843_v0  ;;  %v8885_v4 = vpop.f32.mrf.mxu1  ;;  %8898 = vmatprep.mubr.msk.f32.mxu0 %vm9452_vm0, %v9451_v1  ;;  %v5363_v0 = vld [vmem:[#allocation2 + $0x1b8] sm:$0xff] }
0x2ddb   : > { %8906 = vmatprep.subr.mxu0 %v9451_v1  ;;  %v5362_v4 = vld [vmem:[#allocation2 + $0x1b0] sm:$0xff] }
0x2ddd   : > { %8899 = vmatmul.mubr.msk.f32.vlgmr.msra.gmra.mxu0 %vm497_vm6, %v4841_v5  ;;  %v5451_v5 = vld [vmem:[#allocation2 + $0x208] sm:$0xff] }
0x2dde   : > { %8908 = vmatprep.mubr.msk.f32.mxu0 %vm9452_vm0, %v9451_v1  ;;  %8907 = vmatpush3.msra.mxu0 %v4360_v40  ;;  %v8251_v40 = vld [vmem:[#allocation2 + $0x1c8] ss:$0 sm:$0xff] }
0x2ddf   : > { %8916 = vmatprep.subr.mxu0 %v9451_v1 }
0x2e8e   : > { %v4836_v7 = vpop.f32.mrf.mxu1 }
0x2e90   : > { %v8895_v8 = vpop.f32.mrf.mxu1 }
0x2e91   : > { %v5449_v8 = vld [vmem:[#allocation2 + $0x1f8] sm:$0xff] }
0x2e99   : > { %v4763_v9 = vpop.f32.mrf.mxu0 }
0x2e9a   : > { %v4837_v10 = vadd.f32 %v4836_v7, %v4763_v9  ;;  %v5450_v7 = vld [vmem:[#allocation2 + $0x200] sm:$0xff]  ;;  %v5448_v9 = vld [vmem:[#allocation2 + $0x1f0] sm:$0xff] }
0x2e9b   : > { %v8890_v11 = vpop.f32.mrf.mxu0 }
0x2e9d   : > { %v4914_v12 = vpop.f32.mrf.mxu0 }
0x2e9e   : > { %v4918_v14 = vmul.f32 0.35355338, %v4914_v12 }
0x2e9f   : > { %v8900_v15 = vpop.f32.mrf.mxu0 }
0x2ea0   : > { %v4919_v16 = vadd.f32 %v10027_v30, %v4918_v14 }
0x2ea2   : > { %v4920_v17 = vsel %vm497_vm6, %v4919_v16, -inf }
0x2ea3   : > { %4921 = vmax.xlane.f32.xlu0 %v4920_v17 }
0x2eb9   : > { %4931 = vrot.lane.b32.xlu0 %v10006_v21, %s9459_s11 }
0x2ebd   : > { %5081 = vrot.lane.b32.xlu0 %v10013_v24, %s9461_s13 }
0x2f2c   : > { %v4922_v19 = vpop.xlane.xlu0 %4921 }
0x2f2d   : > { %v4923_v13 = vsub.f32 %v4919_v16, %v4922_v19 }
0x2f2f   : > { %v4924_v20 = vmul.f32 1.442695, %v4923_v13 }
0x2f30   : > { %v4932_v6 = vpop.permute.xlu0 %4931 }
0x2f31   : > { %9291 = vpow2.f32 %v4924_v20  ;;  %8902 = vmatpush3.msra.mxu1 %v4932_v6  ;;  %v8249_v20 = vld [vmem:[#allocation2 + $0x238] ss:$0 sm:$0xff] }
0x2f32   : > { %8911 = vmatprep.subr.mxu1 %v9451_v1 }
0x2f34   : > { %v5082_v25 = vpop.permute.xlu0 %5081 }
0x2f3e   : > { %v9292_v42 = vpop.eup %9291 }
0x2f3f   : > { %v4926_v3 = vsel %vm497_vm6, %v9292_v42, 0.0 }
0x2f40   : > { %4927 = vadd.xlane.f32.xlu1 %v4926_v3  ;;  %v8250_v3 = vld [vmem:[#allocation2 + $0x240] ss:$0 sm:$0xff] }
0x2f51   : > { %5083 = vrot.lane.b32.xlu1 %v10006_v21, %s9461_s13 }
0x2fc9   : > { %v4928_v48 = vpop.xlane.xlu1 %4927 }
0x2fca   : > { %9293 = vrcp.f32 %v4928_v48 }
0x2fcd   : > { %v5084_v24 = vpop.permute.xlu1 %5083 }
0x2fd7   : > { %v9294_v22 = vpop.eup %9293 }
0x2fd8   : > { %v4930_v23 = vmul.f32 %v9294_v22, %v9292_v42 }
0x2fda   : > { %8904 = vmatmul.mubr.msk.f32.vlgmr.msra.gmra.mxu1 %vm497_vm6, %v4930_v23  ;;  %v5446_v23 = vld [vmem:[#allocation2 + $0x1e0] sm:$0xff] }
0x2fdb   : > { %8912 = vmatpush3.xpose.msk.msra.mxu1 %vm497_vm6, %v5084_v24  ;;  %8913 = vmatprep.mubr.msk.f32.mxu1 %vm9452_vm0, %v9451_v1  ;;  %v5445_v24 = vld [vmem:[#allocation2 + $0x1d8] sm:$0xff] }
0x2fdc   : > { %8921 = vmatprep.subr.mxu1 %v9451_v1 }
0x2fde   : > { %8914 = vmatmul.mubr.msk.f32.vlgmr.msra.gmra.mxu1 %vm497_vm6, %v5082_v25  ;;  %v5444_v25 = vld [vmem:[#allocation2 + $0x1d0] sm:$0xff] }
0x2fdf   : > { %8923 = vmatprep.mubr.msk.f32.mxu1 %vm9452_vm0, %v9451_v1  ;;  %8922 = vmatpush3.msra.mxu1 %v4361_v41 }
0x2fe0   : > { %8937 = vmatprep.subr.mxu1 %v9451_v1 }
0x309a   : > { %v5003_v26 = vpop.f32.mrf.mxu1 }
0x309b   : > { %8909 = vmatmul.mubr.msk.f32.vlgmr.msra.gmra.mxu0 %vm497_vm6, %v5003_v26 }
0x309c   : > { %v8905_v27 = vpop.f32.mrf.mxu1  ;;  %8918 = vmatprep.mubr.msk.f32.mxu0 %vm9452_vm0, %v9451_v1 }
0x309e   : > { %v5155_v28 = vpop.f32.mrf.mxu1 }
0x309f   : > { %v5159_v29 = vmul.f32 0.35355338, %v5155_v28 }
0x30a0   : > { %v8915_v31 = vpop.f32.mrf.mxu1 }
0x30a1   : > { %v5160_v33 = vadd.f32 %v10027_v30, %v5159_v29  ;;  %v8253_v31 = vld [vmem:[#allocation2 + $0x210] ss:$0 sm:$0xff] }
0x30a3   : > { %v5161_v34 = vsel %vm497_vm6, %v5160_v33, -inf }
0x30a4   : > { %5162 = vmax.xlane.f32.xlu1 %v5161_v34 }
0x312d   : > { %v5163_v35 = vpop.xlane.xlu1 %5162 }
0x312e   : > { %v5164_v43 = vsub.f32 %v5160_v33, %v5163_v35 }
0x3130   : > { %v5165_v37 = vmul.f32 1.442695, %v5164_v43 }
0x3132   : > { %9295 = vpow2.f32 %v5165_v37 }
0x313f   : > { %v9296_v38 = vpop.eup %9295 }
0x3140   : > { %v5167_v39 = vsel %vm497_vm6, %v9296_v38, 0.0 }
0x3141   : > { %5168 = vadd.xlane.f32.xlu0 %v5167_v39 }
0x3157   : > { %5172 = vrot.lane.b32.xlu0 %v10006_v21, %s9462_s15 }
0x315b   : > { %v5076_v18 = vpop.f32.mrf.mxu0 }
0x315c   : > { %v5080_v44 = vadd.f32 %v5076_v18, %v4837_v10  ;;  %v5447_v10 = vld [vmem:[#allocation2 + $0x1e8] sm:$0xff] }
0x315d   : > { %v8910_v32 = vpop.f32.mrf.mxu0 }
0x315e   : > { %v5566_v32 = vld [vmem:[#allocation2 + $0x340] sm:$0xff] }
0x31ca   : > { %v5169_v45 = vpop.xlane.xlu0 %5168 }
0x31cb   : > { %9297 = vrcp.f32 %v5169_v45  ;;  %v5565_v45 = vld [vmem:[#allocation2 + $0x338] sm:$0xff] }
0x31ce   : > { %v5173_v46 = vpop.permute.xlu0 %5172 }
0x31cf   : > { %8917 = vmatpush3.msra.mxu0 %v5173_v46  ;;  %v5564_v46 = vld [vmem:[#allocation2 + $0x330] sm:$0xff] }
0x31d0   : > { %8926 = vmatprep.subr.mxu0 %v9451_v1 }
0x31d8   : > { %v9298_v47 = vpop.eup %9297 }
0x31d9   : > { %v5171_v49 = vmul.f32 %v9298_v47, %v9296_v38  ;;  %v5563_v47 = vld [vmem:[#allocation2 + $0x328] sm:$0xff] }
0x31db   : > { %8919 = vmatmul.mubr.msk.f32.vlgmr.msra.gmra.mxu0 %vm497_vm6, %v5171_v49 }
0x31dc   : > { %8934 = vmatprep.mubr.msk.f32.mxu0 %vm9452_vm0, %v9451_v1  ;;  %8927 = vmatpush3.msra.mxu0 %v5364_v63 }
0x31dd   : > { %8928 = vmatprep.subr.mxu0 %v9451_v1 }
0x31de   : > { %8929 = vmatpush3.msra.mxu0 %v5363_v0 }
0x31df   : > { %8930 = vmatprep.subr.mxu0 %v9451_v1 }
0x31e0   : > { %8931 = vmatpush3.msra.mxu0 %v5362_v4 }
0x31e1   : > { %8932 = vmatprep.subr.mxu0 %v9451_v1 }
0x329b   : > { %v5244_v21 = vpop.f32.mrf.mxu0 }
0x329c   : > { %8924 = vmatmul.mubr.msk.f32.vlgmr.msra.gmra.mxu1 %vm497_vm6, %v5244_v21 }
0x329d   : > { %v8920_v50 = vpop.f32.mrf.mxu0  ;;  %8953 = vmatprep.mubr.msk.f32.mxu1 %vm9452_vm0, %v9451_v1  ;;  %8938 = vmatpush3.msra.mxu1 %v5451_v5 }
0x329e   : > { %8939 = vmatprep.subr.mxu1 %v9451_v1 }
0x329f   : > { %8940 = vmatpush3.msra.mxu1 %v5450_v7 }
0x32a0   : > { %8941 = vmatprep.subr.mxu1 %v9451_v1 }
0x32a1   : > { %8942 = vmatpush3.msra.mxu1 %v5449_v8 }
0x32a2   : > { %8943 = vmatprep.subr.mxu1 %v9451_v1 }
0x32a3   : > { %8944 = vmatpush3.msra.mxu1 %v5448_v9 }
0x32a4   : > { %8945 = vmatprep.subr.mxu1 %v9451_v1 }
0x32a5   : > { %8946 = vmatpush3.msra.mxu1 %v5447_v10 }
0x32a6   : > { %8947 = vmatprep.subr.mxu1 %v9451_v1 }
0x32a7   : > { %8948 = vmatpush3.msra.mxu1 %v5446_v23 }
0x32a8   : > { %8949 = vmatprep.subr.mxu1 %v9451_v1 }
0x32a9   : > { %8950 = vmatpush3.msra.mxu1 %v5445_v24 }
0x32aa   : > { %8951 = vmatprep.subr.mxu1 %v9451_v1 }
0x32ab   : > { %8952 = vmatpush3.msra.mxu1 %v5444_v25 }
0x32ac   : > { %8972 = vmatprep.subr.mxu1 %v9451_v1 }
0x335c   : > { %v5317_v51 = vpop.f32.mrf.mxu1 }
0x335d   : > { %v5321_v54 = vadd.f32 %v5317_v51, %v5080_v44 }
0x335e   : > { %v8925_v55 = vpop.f32.mrf.mxu1 }
0x335f   : > { %v5327_v56 = vadd.f32 %v8248_v52, %v5321_v54 }
0x3361   : > { %v10100_v53 = vadd.f32 %v5327_v56, %v9982_v36  ;;  %v5361_v36 = vld [vmem:[#allocation2 + $0x1a8] sm:$0xff] }
0x3362   : > { %8933 = vmatpush3.msra.mxu0 %v5361_v36 }
0x3363   : > { %v5329_v57 = vsel %vm373_vm3, %v10100_v53, 0.0  ;;  %8956 = vmatprep.subr.mxu0 %v9451_v1 }
0x3364   : > { %5330 = vadd.xlane.f32.xlu1 %v5329_v57 }
0x33ed   : > { %v5331_v58 = vpop.xlane.xlu1 %5330 }
0x33ee   : > { %v5332_v59 = vmul.f32 0.03125, %v5331_v58 }
0x33f0   : > { %v5333_v60 = vsub.f32 %v10100_v53, %v5332_v59  ;;  %v8256_v59 = vld [vmem:[#allocation2 + $0x468] ss:$0 sm:$0xff] }
0x33f2   : > { %v5334_v61 = vmul.f32 %v5333_v60, %v5333_v60  ;;  %v5344_v6 = vmul.f32 %v8249_v20, %v5333_v60 }
0x33f4   : > { %v5335_v62 = vsel %vm373_vm3, %v5334_v61, 0.0 }
0x33f5   : > { %5336 = vadd.xlane.f32.xlu1 %v5335_v62  ;;  %v8257_v62 = vld [vmem:[#allocation2 + $0x348] ss:$0 sm:$0xff] }
0x347e   : > { %v5337_v11 = vpop.xlane.xlu1 %5336 }
0x347f   : > { %v5338_v12 = vmul.f32 0.032258064, %v5337_v11  ;;  %v10158_v11 = vld [vmem:[%s9903_s26] sm:$0xff] }
0x3481   : > { %9299 = vrsqrt.f32 %v5338_v12  ;;  %vm5347_vm8 = vcmp.eq.f32.partialorder %v5338_v12, inf  ;;  %v5350_v16 = vand.u32 2147483648, %v5338_v12  ;;  %vm5349_vm10 = vcmp.eq.f32.partialorder %v5338_v12, 0.0 }
0x348e   : > { %v9300_v14 = vpop.eup %9299 }
0x348f   : > { %v5346_v15 = vmul.f32 %v9300_v14, %v5338_v12 }
0x3491   : > { %v5348_v17 = vsel %vm5347_vm8, %v5338_v12, %v5346_v15 }
0x3492   : > { %v5351_v19 = vsel %vm5349_vm10, %v5350_v16, %v5348_v17 }
0x3493   : > { %v5352_v13 = vadd.f32 1e-06, %v5351_v19 }
0x3495   : > { %9301 = vrcp.f32 %v5352_v13 }
0x34a2   : > { %v9302_v42 = vpop.eup %9301 }
0x34a3   : > { %v5354_v48 = vmul.f32 %v9302_v42, %v5344_v6 }
0x34a5   : > { %v5360_v22 = vadd.f32 %v8250_v3, %v5354_v48 }
0x34a7   : > { %8935 = vmatmul.mubr.msk.f32.vlgmr.msra.gmra.mxu0 %vm373_vm3, %v5360_v22 }
0x34a8   : > { %8964 = vmatprep.mubr.msk.f32.mxu0 %vm9452_vm0, %v9451_v1  ;;  %8957 = vmatpush3.msra.mxu0 %v5566_v32 }
0x34a9   : > { %8958 = vmatprep.subr.mxu0 %v9451_v1 }
0x34aa   : > { %8959 = vmatpush3.msra.mxu0 %v5565_v45 }
0x34ab   : > { %8960 = vmatprep.subr.mxu0 %v9451_v1 }
0x34ac   : > { %8961 = vmatpush3.msra.mxu0 %v5564_v46 }
0x34ad   : > { %8962 = vmatprep.subr.mxu0 %v9451_v1 }
0x34ae   : > { %8963 = vmatpush3.msra.mxu0 %v5563_v47 }
0x34af   : > { %8967 = vmatprep.subr.mxu0 %v9451_v1 }
0x3567   : > { %v5439_v26 = vpop.f32.mrf.mxu0 }
0x3568   : > { %v5440_v27 = vadd.f32 %v8251_v40, %v5439_v26 }
0x3569   : > { %v8936_v28 = vpop.f32.mrf.mxu0 }
0x356a   : > { %v5443_v29 = vmax.f32 %v5440_v27, 0.0 }
0x356c   : > { %8954 = vmatmul.mubr.msk.f32.vlgmr.msra.gmra.mxu1 %vm1597_vm9, %v5443_v29 }
0x356d   : > { %8974 = vmatprep.mubr.msk.f32.mxu1 %vm9452_vm0, %v9451_v1 }
0x362c   : > { %v5526_v33 = vpop.f32.mrf.mxu1 }
0x362d   : > { %v5527_v34 = vadd.f32 %v8253_v31, %v5526_v33 }
0x362e   : > { %v8955_v35 = vpop.f32.mrf.mxu1 }
0x362f   : > { %v10125_v43 = vadd.f32 %v5527_v34, %v10100_v53  ;;  %v8255_v53 = vld [vmem:[#allocation2 + $0x460] ss:$0 sm:$0xff] }
0x3631   : > { %v5531_v37 = vsel %vm373_vm3, %v10125_v43, 0.0 }
0x3632   : > { %5532 = vadd.xlane.f32.xlu1 %v5531_v37  ;;  %v5645_v37 = vld [vmem:[#allocation2 + $0x350] sm:$0xff] }
0x36bb   : > { %v5533_v38 = vpop.xlane.xlu1 %5532 }
0x36bc   : > { %v5534_v39 = vmul.f32 0.03125, %v5533_v38  ;;  %v5646_v38 = vld [vmem:[#allocation2 + $0x358] sm:$0xff] }
0x36be   : > { %v5535_v18 = vsub.f32 %v10125_v43, %v5534_v39 }
0x36c0   : > { %v5536_v41 = vmul.f32 %v5535_v18, %v5535_v18  ;;  %v5546_v57 = vmul.f32 %v8255_v53, %v5535_v18 }
0x36c2   : > { %v5537_v44 = vsel %vm373_vm3, %v5536_v41, 0.0 }
0x36c3   : > { %5538 = vadd.xlane.f32.xlu1 %v5537_v44 }
0x374c   : > { %v5539_v49 = vpop.xlane.xlu1 %5538 }
0x374d   : > { %v5540_v21 = vmul.f32 0.032258064, %v5539_v49 }
0x374f   : > { %9303 = vrsqrt.f32 %v5540_v21  ;;  %vm5549_vm11 = vcmp.eq.f32.partialorder %v5540_v21, inf  ;;  %v5552_v52 = vand.u32 2147483648, %v5540_v21  ;;  %vm5551_vm12 = vcmp.eq.f32.partialorder %v5540_v21, 0.0 }
0x375c   : > { %v9304_v50 = vpop.eup %9303 }
0x375d   : > { %v5548_v51 = vmul.f32 %v9304_v50, %v5540_v21 }
0x375f   : > { %v5550_v54 = vsel %vm5549_vm11, %v5540_v21, %v5548_v51 }
0x3760   : > { %v5553_v55 = vsel %vm5551_vm12, %v5552_v52, %v5550_v54 }
0x3761   : > { %v5554_v56 = vadd.f32 1e-06, %v5553_v55 }
0x3763   : > { %9305 = vrcp.f32 %v5554_v56 }
0x3770   : > { %v9306_v58 = vpop.eup %9305 }
0x3771   : > { %v5556_v60 = vmul.f32 %v9306_v58, %v5546_v57 }
0x3773   : > { %v5562_v61 = vadd.f32 %v8256_v59, %v5556_v60 }
0x3775   : > { %8965 = vmatmul.mubr.msk.f32.vlgmr.msra.gmra.mxu0 %vm373_vm3, %v5562_v61 }
0x3776   : > { %8969 = vmatprep.mubr.msk.f32.mxu0 %vm9452_vm0, %v9451_v1 }
0x3835   : > { %v5641_v63 = vpop.f32.mrf.mxu0 }
0x3836   : > { %v10138_v0 = vadd.f32 %v8257_v62, %v5641_v63 }
0x3837   : > { %v8966_v4 = vpop.f32.mrf.mxu0 }
0x3838   : > { %5817 = vrot.lane.b32.xlu0 %v10138_v0, %s9454_s6  ;;  %5650 = vrot.lane.b32.xlu1 %v10138_v0, %s9453_s23 }
0x383c   : > { %5815 = vrot.lane.b32.xlu0 %v10138_v0, %s9456_s8 }
0x38aa   : > { %v5651_v36 = vpop.permute.xlu1 %5650  ;;  %v5818_v5 = vpop.permute.xlu0 %5817 }
0x38ab   : > { %8968 = vmatpush3.xpose.msk.msra.mxu0 %vm497_vm6, %v5651_v36 }
0x38ac   : > { %8977 = vmatprep.subr.mxu0 %v9451_v1 }
0x38ae   : > { %8970 = vmatmul.mubr.msk.f32.vlgmr.msra.gmra.mxu0 %vm497_vm6, %v10138_v0  ;;  %v5816_v7 = vpop.permute.xlu0 %5815 }
0x38af   : > { %8978 = vmatpush3.xpose.msk.msra.mxu0 %vm497_vm6, %v5818_v5  ;;  %8979 = vmatprep.mubr.msk.f32.mxu0 %vm9452_vm0, %v9451_v1 }
0x38b0   : > { %8987 = vmatprep.subr.mxu0 %v9451_v1 }
0x38b2   : > { %8980 = vmatmul.mubr.msk.f32.vlgmr.msra.gmra.mxu0 %vm497_vm6, %v5816_v7  ;;  %v5647_v7 = vld [vmem:[#allocation2 + $0x360] sm:$0xff] }
0x38b3   : > { %8989 = vmatprep.mubr.msk.f32.mxu0 %vm9452_vm0, %v9451_v1  ;;  %8988 = vmatpush3.msra.mxu0 %v5646_v38 }
0x38b4   : > { %8997 = vmatprep.subr.mxu0 %v9451_v1 }
0x396e   : > { %v5722_v8 = vpop.f32.mrf.mxu0 }
0x396f   : > { %v5726_v9 = vmul.f32 0.35355338, %v5722_v8 }
0x3970   : > { %v8971_v10 = vpop.f32.mrf.mxu0 }
0x3971   : > { %v5727_v12 = vadd.f32 %v10158_v11, %v5726_v9 }
0x3972   : > { %v5889_v14 = vpop.f32.mrf.mxu0 }
0x3973   : > { %v5893_v15 = vmul.f32 0.35355338, %v5889_v14  ;;  %v5728_v16 = vsel %vm497_vm6, %v5727_v12, -inf }
0x3974   : > { %5729 = vmax.xlane.f32.xlu0 %v5728_v16  ;;  %v8981_v17 = vpop.f32.mrf.mxu0 }
0x3975   : > { %v5894_v19 = vadd.f32 %v10158_v11, %v5893_v15 }
0x3977   : > { %v5895_v13 = vsel %vm497_vm6, %v5894_v19, -inf }
0x3978   : > { %5896 = vmax.xlane.f32.xlu1 %v5895_v13 }
0x3989   : > { %5906 = vrot.lane.b32.xlu1 %v10138_v0, %s9457_s9 }
0x398d   : > { %6130 = vrot.lane.b32.xlu1 %v10138_v0, %s9459_s11 }
0x39fd   : > { %v5730_v20 = vpop.xlane.xlu0 %5729 }
0x39fe   : > { %v5731_v6 = vsub.f32 %v5727_v12, %v5730_v20 }
0x3a00   : > { %v5732_v42 = vmul.f32 1.442695, %v5731_v6 }
0x3a01   : > { %v5897_v3 = vpop.xlane.xlu1 %5896 }
0x3a02   : > { %9307 = vpow2.f32 %v5732_v42  ;;  %v5898_v48 = vsub.f32 %v5894_v19, %v5897_v3 }
0x3a04   : > { %v5899_v22 = vmul.f32 1.442695, %v5898_v48 }
0x3a05   : > { %v5907_v33 = vpop.permute.xlu1 %5906 }
0x3a06   : > { %9309 = vpow2.f32 %v5899_v22 }
0x3a09   : > { %v6131_v44 = vpop.permute.xlu1 %6130 }
0x3a0f   : > { %v9308_v23 = vpop.eup %9307 }
0x3a10   : > { %v5734_v24 = vsel %vm497_vm6, %v9308_v23, 0.0 }
0x3a11   : > { %5735 = vadd.xlane.f32.xlu0 %v5734_v24 }
0x3a13   : > { %v9310_v25 = vpop.eup %9309 }
0x3a14   : > { %v5901_v40 = vsel %vm497_vm6, %v9310_v25, 0.0 }
0x3a15   : > { %5902 = vadd.xlane.f32.xlu0 %v5901_v40 }
0x3a2b   : > { %5739 = vrot.lane.b32.xlu0 %v10138_v0, %s9455_s7 }
0x3a2f   : > { %6128 = vrot.lane.b32.xlu0 %v10138_v0, %s9458_s10 }
0x3a9a   : > { %v5736_v26 = vpop.xlane.xlu0 %5735 }
0x3a9b   : > { %9311 = vrcp.f32 %v5736_v26  ;;  %v6733_v26 = vld [vmem:[#allocation2 + $0x3b0] sm:$0xff] }
0x3a9e   : > { %v5903_v27 = vpop.xlane.xlu0 %5902 }
0x3a9f   : > { %9313 = vrcp.f32 %v5903_v27 }
0x3aa2   : > { %v5740_v28 = vpop.permute.xlu0 %5739 }
0x3aa3   : > { %8973 = vmatpush3.msra.mxu1 %v5740_v28  ;;  %v6732_v28 = vld [vmem:[#allocation2 + $0x3a8] sm:$0xff] }
0x3aa4   : > { %8982 = vmatprep.subr.mxu1 %v9451_v1 }
0x3aa6   : > { %v6129_v45 = vpop.permute.xlu0 %6128 }
0x3aa8   : > { %v9312_v29 = vpop.eup %9311 }
0x3aa9   : > { %v5738_v31 = vmul.f32 %v9312_v29, %v9308_v23  ;;  %v6731_v29 = vld [vmem:[#allocation2 + $0x3a0] sm:$0xff] }
0x3aab   : > { %8975 = vmatmul.mubr.msk.f32.vlgmr.msra.gmra.mxu1 %vm497_vm6, %v5738_v31 }
0x3aac   : > { %v9314_v34 = vpop.eup %9313  ;;  %8983 = vmatpush3.msra.mxu1 %v5907_v33  ;;  %8984 = vmatprep.mubr.msk.f32.mxu1 %vm9452_vm0, %v9451_v1  ;;  %v8275_v33 = vld [vmem:[#allocation2 + $0x370] ss:$0 sm:$0xff] }
0x3aad   : > { %v5905_v35 = vmul.f32 %v9314_v34, %v9310_v25  ;;  %8992 = vmatprep.subr.mxu1 %v9451_v1  ;;  %v6734_v25 = vld [vmem:[#allocation2 + $0x3b8] sm:$0xff] }
0x3aaf   : > { %8985 = vmatmul.mubr.msk.f32.vlgmr.msra.gmra.mxu1 %vm497_vm6, %v5905_v35 }
0x3ab0   : > { %8994 = vmatprep.mubr.msk.f32.mxu1 %vm9452_vm0, %v9451_v1  ;;  %8993 = vmatpush3.msra.mxu1 %v5645_v37 }
0x3ab1   : > { %9002 = vmatprep.subr.mxu1 %v9451_v1 }
0x3b6b   : > { %v5811_v39 = vpop.f32.mrf.mxu1 }
0x3b6c   : > { %8995 = vmatmul.mubr.msk.f32.vlgmr.msra.gmra.mxu1 %vm497_vm6, %v5811_v39 }
0x3b6d   : > { %v8976_v18 = vpop.f32.mrf.mxu1  ;;  %9004 = vmatprep.mubr.msk.f32.mxu1 %vm9452_vm0, %v9451_v1 }
0x3b6f   : > { %v5978_v41 = vpop.f32.mrf.mxu1 }
0x3b70   : > { %8990 = vmatmul.mubr.msk.f32.vlgmr.msra.gmra.mxu0 %vm497_vm6, %v5978_v41 }
0x3b71   : > { %8998 = vmatpush3.xpose.msk.msra.mxu0 %vm497_vm6, %v6131_v44  ;;  %v8986_v32 = vpop.f32.mrf.mxu1  ;;  %8999 = vmatprep.mubr.msk.f32.mxu0 %vm9452_vm0, %v9451_v1 }
0x3b72   : > { %9007 = vmatprep.subr.mxu0 %v9451_v1 }
0x3b74   : > { %9000 = vmatmul.mubr.msk.f32.vlgmr.msra.gmra.mxu0 %vm497_vm6, %v6129_v45 }
0x3b75   : > { %9009 = vmatprep.mubr.msk.f32.mxu0 %vm9452_vm0, %v9451_v1  ;;  %9008 = vmatpush3.msra.mxu0 %v5647_v7 }
0x3b76   : > { %9017 = vmatprep.subr.mxu0 %v9451_v1 }
0x3c2c   : > { %v6124_v46 = vpop.f32.mrf.mxu1 }
0x3c2e   : > { %v8996_v47 = vpop.f32.mrf.mxu1 }
0x3c2f   : > { %v8280_v47 = vld [vmem:[#allocation2 + $0x3c0] ss:$0 sm:$0xff] }
0x3c30   : > { %v6051_v49 = vpop.f32.mrf.mxu0 }
0x3c31   : > { %v6125_v21 = vadd.f32 %v6124_v46, %v6051_v49 }
0x3c32   : > { %v8991_v50 = vpop.f32.mrf.mxu0 }
0x3c33   : > { %v6650_v50 = vld [vmem:[#allocation2 + $0x380] sm:$0xff] }
0x3c34   : > { %v6202_v51 = vpop.f32.mrf.mxu0 }
0x3c35   : > { %v6206_v52 = vmul.f32 0.35355338, %v6202_v51  ;;  %v6649_v51 = vld [vmem:[#allocation2 + $0x378] sm:$0xff] }
0x3c36   : > { %v9001_v54 = vpop.f32.mrf.mxu0 }
0x3c37   : > { %v6207_v55 = vadd.f32 %v10158_v11, %v6206_v52 }
0x3c39   : > { %v6208_v56 = vsel %vm497_vm6, %v6207_v55, -inf }
0x3c3a   : > { %6209 = vmax.xlane.f32.xlu1 %v6208_v56 }
0x3c4b   : > { %6371 = vrot.lane.b32.xlu1 %v10138_v0, %s9462_s15 }
0x3c4f   : > { %6369 = vrot.lane.b32.xlu1 %v10138_v0, %s9461_s13 }
0x3cc3   : > { %v6210_v53 = vpop.xlane.xlu1 %6209 }
0x3cc4   : > { %v6211_v57 = vsub.f32 %v6207_v55, %v6210_v53 }
0x3cc6   : > { %v6212_v58 = vmul.f32 1.442695, %v6211_v57 }
0x3cc7   : > { %v6372_v4 = vpop.permute.xlu1 %6371 }
0x3cc8   : > { %9315 = vpow2.f32 %v6212_v58 }
0x3ccb   : > { %v6370_v5 = vpop.permute.xlu1 %6369 }
0x3cd5   : > { %v9316_v59 = vpop.eup %9315 }
0x3cd6   : > { %v6214_v60 = vsel %vm497_vm6, %v9316_v59, 0.0 }
0x3cd7   : > { %6215 = vadd.xlane.f32.xlu0 %v6214_v60  ;;  %v8276_v60 = vld [vmem:[#allocation2 + $0x470] ss:$0 sm:$0xff] }
0x3ced   : > { %6219 = vrot.lane.b32.xlu0 %v10138_v0, %s9460_s12 }
0x3d60   : > { %v6216_v61 = vpop.xlane.xlu0 %6215 }
0x3d61   : > { %9317 = vrcp.f32 %v6216_v61 }
0x3d64   : > { %v6220_v62 = vpop.permute.xlu0 %6219 }
0x3d65   : > { %9003 = vmatpush3.msra.mxu1 %v6220_v62 }
0x3d66   : > { %9012 = vmatprep.subr.mxu1 %v9451_v1 }
0x3d6e   : > { %v9318_v63 = vpop.eup %9317 }
0x3d6f   : > { %v6218_v36 = vmul.f32 %v9318_v63, %v9316_v59  ;;  %v8277_v63 = vld [vmem:[#allocation2 + $0x478] ss:$0 sm:$0xff] }
0x3d71   : > { %9005 = vmatmul.mubr.msk.f32.vlgmr.msra.gmra.mxu1 %vm497_vm6, %v6218_v36 }
0x3d72   : > { %9013 = vmatpush3.xpose.msk.msra.mxu1 %vm497_vm6, %v6372_v4  ;;  %9014 = vmatprep.mubr.msk.f32.mxu1 %vm9452_vm0, %v9451_v1 }
0x3d73   : > { %9022 = vmatprep.subr.mxu1 %v9451_v1 }
0x3d75   : > { %9015 = vmatmul.mubr.msk.f32.vlgmr.msra.gmra.mxu1 %vm497_vm6, %v6370_v5  ;;  %v8278_v5 = vld [vmem:[#allocation2 + $0x398] ss:$0 sm:$0xff] }
0x3d76   : > { %9024 = vmatprep.mubr.msk.f32.mxu1 %vm9452_vm0, %v9451_v1 }
0x3e31   : > { %v6291_v8 = vpop.f32.mrf.mxu1 }
0x3e32   : > { %9010 = vmatmul.mubr.msk.f32.vlgmr.msra.gmra.mxu0 %vm497_vm6, %v6291_v8 }
0x3e33   : > { %v9006_v9 = vpop.f32.mrf.mxu1  ;;  %9019 = vmatprep.mubr.msk.f32.mxu0 %vm9452_vm0, %v9451_v1 }
0x3e35   : > { %v6443_v10 = vpop.f32.mrf.mxu1 }
0x3e36   : > { %v6447_v12 = vmul.f32 0.35355338, %v6443_v10 }
0x3e37   : > { %v9016_v14 = vpop.f32.mrf.mxu1 }
0x3e38   : > { %v6448_v15 = vadd.f32 %v10158_v11, %v6447_v12  ;;  %v5648_v11 = vld [vmem:[#allocation2 + $0x368] sm:$0xff] }
0x3e39   : > { %9023 = vmatpush3.msra.mxu1 %v5648_v11 }
0x3e3a   : > { %v6449_v16 = vsel %vm497_vm6, %v6448_v15, -inf  ;;  %9038 = vmatprep.subr.mxu1 %v9451_v1 }
0x3e3b   : > { %6450 = vmax.xlane.f32.xlu0 %v6449_v16 }
0x3e51   : > { %6460 = vrot.lane.b32.xlu0 %v10138_v0, %s9463_s16 }
0x3ec4   : > { %v6451_v17 = vpop.xlane.xlu0 %6450 }
0x3ec5   : > { %v6452_v19 = vsub.f32 %v6448_v15, %v6451_v17 }
0x3ec7   : > { %v6453_v13 = vmul.f32 1.442695, %v6452_v19 }
0x3ec8   : > { %v6461_v20 = vpop.permute.xlu0 %6460 }
0x3ec9   : > { %9319 = vpow2.f32 %v6453_v13  ;;  %9018 = vmatpush3.msra.mxu0 %v6461_v20 }
0x3eca   : > { %9027 = vmatprep.subr.mxu0 %v9451_v1 }
0x3ed6   : > { %v9320_v6 = vpop.eup %9319 }
0x3ed7   : > { %v6455_v42 = vsel %vm497_vm6, %v9320_v6, 0.0 }
0x3ed8   : > { %6456 = vadd.xlane.f32.xlu1 %v6455_v42  ;;  %v10275_v42 = vld [vmem:[%s9614_s30] ss:$0 sm:$0xff]  ;;  %s8308_s30 = sshll.u32 %s9516_s22, 7 }
0x3ef2   : > { %v6364_v3 = vpop.f32.mrf.mxu0 }
0x3ef3   : > { %v6368_v48 = vadd.f32 %v6364_v3, %v6125_v21  ;;  %v6651_v21 = vld [vmem:[#allocation2 + $0x388] sm:$0xff] }
0x3ef4   : > { %v9011_v22 = vpop.f32.mrf.mxu0 }
0x3f61   : > { %v6457_v0 = vpop.xlane.xlu1 %6456 }
0x3f62   : > { %9321 = vrcp.f32 %v6457_v0 }
0x3f6f   : > { %v9322_v23 = vpop.eup %9321 }
0x3f70   : > { %v6459_v24 = vmul.f32 %v9322_v23, %v9320_v6 }
0x3f72   : > { %9020 = vmatmul.mubr.msk.f32.vlgmr.msra.gmra.mxu0 %vm497_vm6, %v6459_v24 }
0x3f73   : > { %9035 = vmatprep.mubr.msk.f32.mxu0 %vm9452_vm0, %v9451_v1 }
0x4032   : > { %v6532_v40 = vpop.f32.mrf.mxu0 }
0x4033   : > { %9025 = vmatmul.mubr.msk.f32.vlgmr.msra.gmra.mxu1 %vm497_vm6, %v6532_v40 }
0x4034   : > { %9039 = vmatpush3.msra.mxu1 %v6734_v25  ;;  %v9021_v27 = vpop.f32.mrf.mxu0  ;;  %9046 = vmatprep.mubr.msk.f32.mxu1 %vm9452_vm0, %v9451_v1 }
0x4035   : > { %9040 = vmatprep.subr.mxu1 %v9451_v1 }
0x4036   : > { %9041 = vmatpush3.msra.mxu1 %v6733_v26 }
0x4037   : > { %9042 = vmatprep.subr.mxu1 %v9451_v1 }
0x4038   : > { %9043 = vmatpush3.msra.mxu1 %v6732_v28 }
0x4039   : > { %9044 = vmatprep.subr.mxu1 %v9451_v1 }
0x403a   : > { %9045 = vmatpush3.msra.mxu1 %v6731_v29 }
0x403b   : > { %9047 = vmatmul.mubr.msk.f32.vlgmr.msra.gmra.mxu1 %vm373_vm3, %v9993_v2  ;;  %9054 = vmatprep.subr.mxu1 %v9451_v1 }
0x403c   : > { %9056 = vmatprep.mubr.msk.f32.mxu1 %vm9452_vm0, %v9451_v1 }
0x40f3   : > { %v6605_v31 = vpop.f32.mrf.mxu1 }
0x40f4   : > { %v6609_v34 = vadd.f32 %v6605_v31, %v6368_v48 }
0x40f5   : > { %v9026_v35 = vpop.f32.mrf.mxu1 }
0x40f6   : > { %v6615_v37 = vadd.f32 %v8275_v33, %v6609_v34 }
0x40f8   : > { %v10239_v38 = vadd.f32 %v6615_v37, %v10125_v43  ;;  %v6652_v43 = vld [vmem:[#allocation2 + $0x390] sm:$0xff] }
0x40f9   : > { %9028 = vmatpush3.msra.mxu0 %v6652_v43 }
0x40fa   : > { %v6617_v39 = vsel %vm373_vm3, %v10239_v38, 0.0  ;;  %9029 = vmatprep.subr.mxu0 %v9451_v1 }
0x40fb   : > { %v6806_v18 = vpop.f32.mrf.mxu1  ;;  %6618 = vadd.xlane.f32.xlu1 %v6617_v39  ;;  %9030 = vmatpush3.msra.mxu0 %v6651_v21 }
0x40fc   : > { %v10245_v49 = vadd.f32 %v8280_v47, %v6806_v18  ;;  %9031 = vmatprep.subr.mxu0 %v9451_v1  ;;  %v6810_v18 = vld [vmem:[#allocation2 + $0x3c8] sm:$0xff] }
0x40fd   : > { %v9048_v41 = vpop.f32.mrf.mxu1  ;;  %9032 = vmatpush3.msra.mxu0 %v6650_v50 }
0x40fe   : > { %9033 = vmatprep.subr.mxu0 %v9451_v1  ;;  %v6811_v41 = vld [vmem:[#allocation2 + $0x3d0] sm:$0xff] }
0x40ff   : > { %9034 = vmatpush3.msra.mxu0 %v6649_v51 }
0x4100   : > { %9049 = vmatprep.subr.mxu0 %v9451_v1 }
0x4184   : > { %v6619_v2 = vpop.xlane.xlu1 %6618 }
0x4185   : > { %v6620_v44 = vmul.f32 0.03125, %v6619_v2 }
0x4187   : > { %v6621_v32 = vsub.f32 %v10239_v38, %v6620_v44 }
0x4189   : > { %v6622_v45 = vmul.f32 %v6621_v32, %v6621_v32  ;;  %v6632_v61 = vmul.f32 %v8276_v60, %v6621_v32 }
0x418b   : > { %v6623_v46 = vsel %vm373_vm3, %v6622_v45, 0.0 }
0x418c   : > { %6624 = vadd.xlane.f32.xlu1 %v6623_v46 }
0x419d   : > { %6981 = vrot.lane.b32.xlu1 %v10245_v49, %s9456_s8 }
0x4215   : > { %v6625_v52 = vpop.xlane.xlu1 %6624 }
0x4216   : > { %v6626_v54 = vmul.f32 0.032258064, %v6625_v52 }
0x4218   : > { %9323 = vrsqrt.f32 %v6626_v54  ;;  %vm6635_vm13 = vcmp.eq.f32.partialorder %v6626_v54, inf  ;;  %v6638_v53 = vand.u32 2147483648, %v6626_v54  ;;  %vm6637_vm14 = vcmp.eq.f32.partialorder %v6626_v54, 0.0 }
0x4219   : > { %v6982_v10 = vpop.permute.xlu1 %6981 }
0x4225   : > { %v9324_v55 = vpop.eup %9323 }
0x4226   : > { %v6634_v56 = vmul.f32 %v9324_v55, %v6626_v54 }
0x4228   : > { %v6636_v57 = vsel %vm6635_vm13, %v6626_v54, %v6634_v56 }
0x4229   : > { %v6639_v58 = vsel %vm6637_vm14, %v6638_v53, %v6636_v57 }
0x422a   : > { %v6640_v59 = vadd.f32 1e-06, %v6639_v58 }
0x422c   : > { %9325 = vrcp.f32 %v6640_v59 }
0x4239   : > { %v9326_v62 = vpop.eup %9325 }
0x423a   : > { %v6642_v4 = vmul.f32 %v9326_v62, %v6632_v61 }
0x423c   : > { %v6648_v36 = vadd.f32 %v8277_v63, %v6642_v4 }
0x423e   : > { %9036 = vmatmul.mubr.msk.f32.vlgmr.msra.gmra.mxu0 %vm373_vm3, %v6648_v36 }
0x423f   : > { %9050 = vmatpush3.xpose.msk.msra.mxu0 %vm497_vm6, %v10245_v49  ;;  %9051 = vmatprep.mubr.msk.f32.mxu0 %vm9452_vm0, %v9451_v1 }
0x4240   : > { %9059 = vmatprep.subr.mxu0 %v9451_v1 }
0x42fe   : > { %v6727_v7 = vpop.f32.mrf.mxu0 }
0x42ff   : > { %v10259_v8 = vadd.f32 %v8278_v5, %v6727_v7 }
0x4300   : > { %v9037_v9 = vpop.f32.mrf.mxu0 }
0x4301   : > { %6979 = vrot.lane.b32.xlu0 %v10259_v8, %s9456_s8  ;;  %9052 = vmatmul.mubr.msk.f32.vlgmr.msra.gmra.mxu0 %vm497_vm6, %v10259_v8  ;;  %v6812_v9 = vld [vmem:[#allocation2 + $0x3d8] sm:$0xff] }
0x4302   : > { %9060 = vmatpush3.xpose.msk.msra.mxu0 %vm497_vm6, %v6982_v10  ;;  %9061 = vmatprep.mubr.msk.f32.mxu0 %vm9452_vm0, %v9451_v1 }
0x4303   : > { %9069 = vmatprep.subr.mxu0 %v9451_v1 }
0x4373   : > { %v6980_v12 = vpop.permute.xlu0 %6979 }
0x4374   : > { %9062 = vmatmul.mubr.msk.f32.vlgmr.msra.gmra.mxu0 %vm497_vm6, %v6980_v12 }
0x4375   : > { %9071 = vmatprep.mubr.msk.f32.mxu0 %vm9452_vm0, %v9451_v1  ;;  %9070 = vmatpush3.msra.mxu0 %v6811_v41 }
0x4376   : > { %9079 = vmatprep.subr.mxu0 %v9451_v1 }
0x43c1   : > { %v6886_v14 = vpop.f32.mrf.mxu0 }
0x43c2   : > { %v6890_v15 = vmul.f32 0.35355338, %v6886_v14 }
0x43c3   : > { %v9053_v16 = vpop.f32.mrf.mxu0 }
0x43c4   : > { %v6891_v17 = vadd.f32 %v10027_v30, %v6890_v15 }
0x43c6   : > { %v6892_v19 = vsel %vm497_vm6, %v6891_v17, -inf }
0x43c7   : > { %6893 = vmax.xlane.f32.xlu0 %v6892_v19 }
0x4434   : > { %v7053_v13 = vpop.f32.mrf.mxu0 }
0x4435   : > { %v7057_v20 = vmul.f32 0.35355338, %v7053_v13 }
0x4436   : > { %v9063_v6 = vpop.f32.mrf.mxu0 }
0x4437   : > { %v7058_v3 = vadd.f32 %v10275_v42, %v7057_v20 }
0x4439   : > { %v7059_v11 = vsel %vm497_vm6, %v7058_v3, -inf }
0x443a   : > { %7060 = vmax.xlane.f32.xlu1 %v7059_v11 }
0x444b   : > { %7070 = vrot.lane.b32.xlu1 %v10245_v49, %s9454_s6 }
0x444f   : > { %7294 = vrot.lane.b32.xlu1 %v10245_v49, %s9458_s10 }
0x4450   : > { %v6894_v30 = vpop.xlane.xlu0 %6893 }
0x4451   : > { %v6895_v48 = vsub.f32 %v6891_v17, %v6894_v30 }
0x4453   : > { %v6896_v22 = vmul.f32 1.442695, %v6895_v48 }
0x4455   : > { %9327 = vpow2.f32 %v6896_v22 }
0x4462   : > { %v9328_v0 = vpop.eup %9327 }
0x4463   : > { %v6898_v23 = vsel %vm497_vm6, %v9328_v0, 0.0 }
0x4464   : > { %6899 = vadd.xlane.f32.xlu0 %v6898_v23 }
0x44c3   : > { %v7061_v24 = vpop.xlane.xlu1 %7060 }
0x44c4   : > { %v7062_v25 = vsub.f32 %v7058_v3, %v7061_v24 }
0x44c6   : > { %v7063_v40 = vmul.f32 1.442695, %v7062_v25 }
0x44c7   : > { %v7071_v35 = vpop.permute.xlu1 %7070 }
0x44c8   : > { %9329 = vpow2.f32 %v7063_v40 }
0x44cb   : > { %v7295_v45 = vpop.permute.xlu1 %7294 }
0x44d5   : > { %v9330_v26 = vpop.eup %9329 }
0x44d6   : > { %v7065_v27 = vsel %vm497_vm6, %v9330_v26, 0.0 }
0x44d7   : > { %7066 = vadd.xlane.f32.xlu0 %v7065_v27  ;;  %v8298_v27 = vld [vmem:[#allocation2 + $0x3e8] ss:$0 sm:$0xff] }
0x44ed   : > { %6903 = vrot.lane.b32.xlu0 %v10245_v49, %s9453_s23  ;;  %v6900_v28 = vpop.xlane.xlu0 %6899  ;;  %s8140_s23 = sshll.u32 %s265_s14, 3 }
0x44ee   : > { %9331 = vrcp.f32 %v6900_v28  ;;  %s267_s6 = scalar_lea.vmem [#allocation5], %s8140_s23 }
0x44ef   : > { %s8030_s7 = sshll.u32 %s267_s6, 4  ;;  %s8031_s7 = int_to_ptr.vmem [resolvable:$true] %s8030_s7 }
0x44f0   : > { %s9381_s12 = scalar_lea.vmem %s8031_s7, 128 }
0x44f1   : > { %7292 = vrot.lane.b32.xlu0 %v10259_v8, %s9458_s10  ;;  %s8028_s10 = scalar_lea.hbm %s10407_s5, %s8308_s30  ;;  %p9382_p6 = scmp.ne.s32.totalorder %s8031_s7, %s9381_s12 }
0x44f3   : > { %p9383_p9 = pnand %p9382_p6, %p9533_p5 }
0x44f5   : > { %p9384_p10 = pneg %p9383_p9 }
0x44fb   : > { %v9332_v31 = vpop.eup %9331 }
0x44fc   : > { %v6902_v34 = vmul.f32 %v9332_v31, %v9328_v0 }
0x4560   : > { %v7067_v29 = vpop.xlane.xlu0 %7066 }
0x4561   : > { %9333 = vrcp.f32 %v7067_v29 }
0x4564   : > { %v6904_v33 = vpop.permute.xlu0 %6903 }
0x4565   : > { %9055 = vmatpush3.msra.mxu1 %v6904_v33 }
0x4566   : > { %9057 = vmatmul.mubr.msk.f32.vlgmr.msra.gmra.mxu1 %vm497_vm6, %v6902_v34  ;;  %9064 = vmatprep.subr.mxu1 %v9451_v1 }
0x4567   : > { %9065 = vmatpush3.msra.mxu1 %v7071_v35  ;;  %9066 = vmatprep.mubr.msk.f32.mxu1 %vm9452_vm0, %v9451_v1 }
0x4568   : > { %9074 = vmatprep.subr.mxu1 %v9451_v1  ;;  %v7293_v47 = vpop.permute.xlu0 %7292 }
0x456e   : > { %v9334_v37 = vpop.eup %9333 }
0x456f   : > { %v7069_v39 = vmul.f32 %v9334_v37, %v9330_v26 }
0x4571   : > { %9067 = vmatmul.mubr.msk.f32.vlgmr.msra.gmra.mxu1 %vm497_vm6, %v7069_v39 }
0x4572   : > { %9076 = vmatprep.mubr.msk.f32.mxu1 %vm9452_vm0, %v9451_v1  ;;  %9075 = vmatpush3.msra.mxu1 %v6810_v18 }
0x4573   : > { %9084 = vmatprep.subr.mxu1 %v9451_v1 }
0x4626   : > { %v6975_v2 = vpop.f32.mrf.mxu1 }
0x4627   : > { %9077 = vmatmul.mubr.msk.f32.vlgmr.msra.gmra.mxu1 %vm497_vm6, %v6975_v2  ;;  %v7816_v2 = vld [vmem:[#allocation2 + $0x408] sm:$0xff] }
0x4628   : > { %v9058_v44 = vpop.f32.mrf.mxu1  ;;  %9086 = vmatprep.mubr.msk.f32.mxu1 %vm9452_vm0, %v9451_v1 }
0x4629   : > { %v7815_v44 = vld [vmem:[#allocation2 + $0x400] sm:$0xff] }
0x4631   : > { %v7142_v32 = vpop.f32.mrf.mxu1 }
0x4632   : > { %9072 = vmatmul.mubr.msk.f32.vlgmr.msra.gmra.mxu0 %vm497_vm6, %v7142_v32  ;;  %v7814_v32 = vld [vmem:[#allocation2 + $0x3f8] sm:$0xff] }
0x4633   : > { %9080 = vmatpush3.xpose.msk.msra.mxu0 %vm497_vm6, %v7295_v45  ;;  %v9068_v46 = vpop.f32.mrf.mxu1  ;;  %9081 = vmatprep.mubr.msk.f32.mxu0 %vm9452_vm0, %v9451_v1  ;;  %v7903_v45 = vld [vmem:[#allocation2 + $0x450] sm:$0xff] }
0x4634   : > { %9089 = vmatprep.subr.mxu0 %v9451_v1  ;;  %v7902_v46 = vld [vmem:[#allocation2 + $0x448] sm:$0xff] }
0x4636   : > { %9082 = vmatmul.mubr.msk.f32.vlgmr.msra.gmra.mxu0 %vm497_vm6, %v7293_v47  ;;  %v7901_v47 = vld [vmem:[#allocation2 + $0x440] sm:$0xff] }
0x4637   : > { %9091 = vmatprep.mubr.msk.f32.mxu0 %vm9452_vm0, %v9451_v1  ;;  %9090 = vmatpush3.msra.mxu0 %v6812_v9 }
0x4638   : > { %9099 = vmatprep.subr.mxu0 %v9451_v1 }
0x46e7   : > { %v7288_v43 = vpop.f32.mrf.mxu1 }
0x46e9   : > { %v9078_v21 = vpop.f32.mrf.mxu1 }
0x46ea   : > { %v7899_v21 = vld [vmem:[#allocation2 + $0x430] sm:$0xff] }
0x46f2   : > { %v7215_v50 = vpop.f32.mrf.mxu0 }
0x46f3   : > { %v7289_v51 = vadd.f32 %v7288_v43, %v7215_v50  ;;  %v7900_v43 = vld [vmem:[#allocation2 + $0x438] sm:$0xff] }
0x46f4   : > { %v9073_v52 = vpop.f32.mrf.mxu0 }
0x46f6   : > { %v7366_v54 = vpop.f32.mrf.mxu0 }
0x46f7   : > { %v7370_v55 = vmul.f32 0.35355338, %v7366_v54 }
0x46f8   : > { %v9083_v56 = vpop.f32.mrf.mxu0 }
0x46f9   : > { %v7371_v53 = vadd.f32 %v10275_v42, %v7370_v55 }
0x46fb   : > { %v7372_v57 = vsel %vm497_vm6, %v7371_v53, -inf }
0x46fc   : > { %7373 = vmax.xlane.f32.xlu1 %v7372_v57 }
0x470d   : > { %7535 = vrot.lane.b32.xlu1 %v10245_v49, %s9461_s13 }
0x4711   : > { %7533 = vrot.lane.b32.xlu1 %v10259_v8, %s9461_s13  ;;  %s9464_s13 = smov [#allocation5]  }
0x4785   : > { %v7374_v58 = vpop.xlane.xlu1 %7373 }
0x4786   : > { %v7375_v59 = vsub.f32 %v7371_v53, %v7374_v58  ;;  %v8299_v58 = vld [vmem:[#allocation2 + $0x480] ss:$0 sm:$0xff] }
0x4788   : > { %v7376_v60 = vmul.f32 1.442695, %v7375_v59 }
0x4789   : > { %v7536_v5 = vpop.permute.xlu1 %7535 }
0x478a   : > { %9335 = vpow2.f32 %v7376_v60 }
0x478d   : > { %v7534_v8 = vpop.permute.xlu1 %7533 }
0x4797   : > { %v9336_v61 = vpop.eup %9335 }
0x4798   : > { %v7378_v62 = vsel %vm497_vm6, %v9336_v61, 0.0 }
0x4799   : > { %7379 = vadd.xlane.f32.xlu0 %v7378_v62 }
0x47af   : > { %7383 = vrot.lane.b32.xlu0 %v10245_v49, %s9459_s11  ;;  %s8017_s11 = scalar_lea.sflag [#allocation4], %s265_s14 }
0x4822   : > { %v7380_v63 = vpop.xlane.xlu0 %7379 }
0x4823   : > { %9337 = vrcp.f32 %v7380_v63 }
0x4826   : > { %v7384_v4 = vpop.permute.xlu0 %7383 }
0x4827   : > { %9085 = vmatpush3.msra.mxu1 %v7384_v4  ;;  %v7898_v4 = vld [vmem:[#allocation2 + $0x428] sm:$0xff] }
0x4828   : > { %9094 = vmatprep.subr.mxu1 %v9451_v1 }
0x4830   : > { %v9338_v36 = vpop.eup %9337 }
0x4831   : > { %v7382_v7 = vmul.f32 %v9338_v36, %v9336_v61  ;;  %v8300_v61 = vld [vmem:[#allocation2 + $0x488] ss:$0 sm:$0xff]  ;;  %v7897_v36 = vld [vmem:[#allocation2 + $0x420] sm:$0xff] }
0x4833   : > { %9087 = vmatmul.mubr.msk.f32.vlgmr.msra.gmra.mxu1 %vm497_vm6, %v7382_v7  ;;  %v8301_v7 = vld [vmem:[#allocation2 + $0x410] ss:$0 sm:$0xff] }
0x4834   : > { %9095 = vmatpush3.xpose.msk.msra.mxu1 %vm497_vm6, %v7536_v5  ;;  %9096 = vmatprep.mubr.msk.f32.mxu1 %vm9452_vm0, %v9451_v1  ;;  %v7896_v5 = vld [vmem:[#allocation2 + $0x418] sm:$0xff] }
0x4835   : > { %9104 = vmatprep.subr.mxu1 %v9451_v1 }
0x4837   : > { %9097 = vmatmul.mubr.msk.f32.vlgmr.msra.gmra.mxu1 %vm497_vm6, %v7534_v8 }
0x4838   : > { %9106 = vmatprep.mubr.msk.f32.mxu1 %vm9452_vm0, %v9451_v1 }
0x48f3   : > { %v7455_v10 = vpop.f32.mrf.mxu1 }
0x48f4   : > { %9092 = vmatmul.mubr.msk.f32.vlgmr.msra.gmra.mxu0 %vm497_vm6, %v7455_v10 }
0x48f5   : > { %v9088_v12 = vpop.f32.mrf.mxu1  ;;  %9101 = vmatprep.mubr.msk.f32.mxu0 %vm9452_vm0, %v9451_v1 }
0x48f7   : > { %v7607_v14 = vpop.f32.mrf.mxu1 }
0x48f8   : > { %v7611_v15 = vmul.f32 0.35355338, %v7607_v14  ;;  %v8303_v14 = vld [vmem:[#allocation2 + $0x458] ss:$0 sm:$0xff] }
0x48f9   : > { %v9098_v16 = vpop.f32.mrf.mxu1 }
0x48fa   : > { %v7612_v17 = vadd.f32 %v10275_v42, %v7611_v15  ;;  %v6813_v42 = vld [vmem:[#allocation2 + $0x3e0] sm:$0xff] }
0x48fb   : > { %9105 = vmatpush3.msra.mxu1 %v6813_v42 }
0x48fc   : > { %v7613_v19 = vsel %vm497_vm6, %v7612_v17, -inf  ;;  %9120 = vmatprep.subr.mxu1 %v9451_v1 }
0x48fd   : > { %7614 = vmax.xlane.f32.xlu0 %v7613_v19 }
0x4913   : > { %7624 = vrot.lane.b32.xlu0 %v10245_v49, %s9462_s15  ;;  %s9385_s15 = sshll.u32 %s9464_s13, 4  ;;  %s9386_s15 = int_to_ptr.vmem [resolvable:$false] %s9385_s15 }
0x4914   : > { %s9387_s22 = scalar_lea.vmem %s9386_s15, 256  ;;  %p9388_p11 = scmp.lt.s32.totalorder %s8031_s7, %s9386_s15 }
0x4915   : > { %p9389_p12 = scmp.lt.s32.totalorder %s9387_s22, %s9381_s12 }
0x4917   : > { %p9390_p13 = por %p9389_p12, %p9388_p11 }
0x4919   : > { %p9391_p0 = pnand %p9390_p13, %p9384_p10 }
0x4986   : > { %v7615_v13 = vpop.xlane.xlu0 %7614 }
0x4987   : > { %v7616_v20 = vsub.f32 %v7612_v17, %v7615_v13 }
0x4989   : > { %v7617_v6 = vmul.f32 1.442695, %v7616_v20 }
0x498a   : > { %v7625_v3 = vpop.permute.xlu0 %7624 }
0x498b   : > { %9339 = vpow2.f32 %v7617_v6  ;;  %9100 = vmatpush3.msra.mxu0 %v7625_v3 }
0x498c   : > { %9109 = vmatprep.subr.mxu0 %v9451_v1 }
0x4998   : > { %v9340_v11 = vpop.eup %9339 }
0x4999   : > { %v7619_v30 = vsel %vm497_vm6, %v9340_v11, 0.0 }
0x499a   : > { %7620 = vadd.xlane.f32.xlu1 %v7619_v30 }
0x49b4   : > { %v7528_v48 = vpop.f32.mrf.mxu0 }
0x49b5   : > { %v7532_v22 = vadd.f32 %v7528_v48, %v7289_v51 }
0x49b6   : > { %v9093_v0 = vpop.f32.mrf.mxu0 }
0x4a23   : > { %v7621_v49 = vpop.xlane.xlu1 %7620 }
0x4a24   : > { %9341 = vrcp.f32 %v7621_v49 }
0x4a31   : > { %v9342_v23 = vpop.eup %9341 }
0x4a32   : > { %v7623_v24 = vmul.f32 %v9342_v23, %v9340_v11 }
0x4a34   : > { %9102 = vmatmul.mubr.msk.f32.vlgmr.msra.gmra.mxu0 %vm497_vm6, %v7623_v24 }
0x4a35   : > { %9117 = vmatprep.mubr.msk.f32.mxu0 %vm9452_vm0, %v9451_v1  ;;  %9110 = vmatpush3.msra.mxu0 %v7816_v2 }
0x4a36   : > { %9111 = vmatprep.subr.mxu0 %v9451_v1 }
0x4a37   : > { %9112 = vmatpush3.msra.mxu0 %v7815_v44 }
0x4a38   : > { %9113 = vmatprep.subr.mxu0 %v9451_v1 }
0x4a39   : > { %9114 = vmatpush3.msra.mxu0 %v7814_v32 }
0x4a3a   : > { %9115 = vmatprep.subr.mxu0 %v9451_v1 }
0x4af4   : > { %v7696_v25 = vpop.f32.mrf.mxu0 }
0x4af5   : > { %9107 = vmatmul.mubr.msk.f32.vlgmr.msra.gmra.mxu1 %vm497_vm6, %v7696_v25  ;;  %v8305_v25 = vld [vmem:[#allocation2 + $0x4a0] ss:$0 sm:$0xff] }
0x4af6   : > { %v9103_v40 = vpop.f32.mrf.mxu0  ;;  %9136 = vmatprep.mubr.msk.f32.mxu1 %vm9452_vm0, %v9451_v1  ;;  %9121 = vmatpush3.msra.mxu1 %v7903_v45 }
0x4af7   : > { %9122 = vmatprep.subr.mxu1 %v9451_v1 }
0x4af8   : > { %9123 = vmatpush3.msra.mxu1 %v7902_v46 }
0x4af9   : > { %9124 = vmatprep.subr.mxu1 %v9451_v1 }
0x4afa   : > { %9125 = vmatpush3.msra.mxu1 %v7901_v47 }
0x4afb   : > { %9126 = vmatprep.subr.mxu1 %v9451_v1 }
0x4afc   : > { %9127 = vmatpush3.msra.mxu1 %v7900_v43 }
0x4afd   : > { %9128 = vmatprep.subr.mxu1 %v9451_v1 }
0x4afe   : > { %9129 = vmatpush3.msra.mxu1 %v7899_v21 }
0x4aff   : > { %9130 = vmatprep.subr.mxu1 %v9451_v1 }
0x4b00   : > { %9131 = vmatpush3.msra.mxu1 %v7898_v4 }
0x4b01   : > { %9132 = vmatprep.subr.mxu1 %v9451_v1 }
0x4b02   : > { %9133 = vmatpush3.msra.mxu1 %v7897_v36 }
0x4b03   : > { %9134 = vmatprep.subr.mxu1 %v9451_v1 }
0x4b04   : > { %9135 = vmatpush3.msra.mxu1 %v7896_v5 }
0x4bb5   : > { %v7769_v26 = vpop.f32.mrf.mxu1 }
0x4bb6   : > { %v7773_v28 = vadd.f32 %v7769_v26, %v7532_v22 }
0x4bb7   : > { %v9108_v29 = vpop.f32.mrf.mxu1 }
0x4bb8   : > { %v7779_v31 = vadd.f32 %v8298_v27, %v7773_v28  ;;  %v8306_v27 = vld [vmem:[#allocation2 + $0x4a8] ss:$0 sm:$0xff] }
0x4bba   : > { %v10346_v33 = vadd.f32 %v7779_v31, %v10239_v38  ;;  %v7813_v38 = vld [vmem:[#allocation2 + $0x3f0] sm:$0xff] }
0x4bbb   : > { %9116 = vmatpush3.msra.mxu0 %v7813_v38 }
0x4bbc   : > { %v7781_v34 = vsel %vm373_vm3, %v10346_v33, 0.0 }
0x4bbd   : > { %7782 = vadd.xlane.f32.xlu1 %v7781_v34 }
0x4c46   : > { %v7783_v35 = vpop.xlane.xlu1 %7782 }
0x4c47   : > { %v7784_v37 = vmul.f32 0.03125, %v7783_v35 }
0x4c49   : > { %v7785_v39 = vsub.f32 %v10346_v33, %v7784_v37 }
0x4c4b   : > { %v7786_v18 = vmul.f32 %v7785_v39, %v7785_v39  ;;  %v7796_v59 = vmul.f32 %v8299_v58, %v7785_v39 }
0x4c4d   : > { %v7787_v41 = vsel %vm373_vm3, %v7786_v18, 0.0 }
0x4c4e   : > { %7788 = vadd.xlane.f32.xlu1 %v7787_v41 }
0x4cd7   : > { %v7789_v50 = vpop.xlane.xlu1 %7788 }
0x4cd8   : > { %v7790_v51 = vmul.f32 0.032258064, %v7789_v50 }
0x4cda   : > { %9343 = vrsqrt.f32 %v7790_v51  ;;  %vm7799_vm0 = vcmp.eq.f32.partialorder %v7790_v51, inf  ;;  %v7802_v55 = vand.u32 2147483648, %v7790_v51  ;;  %vm7801_vm6 = vcmp.eq.f32.partialorder %v7790_v51, 0.0 }
0x4ce7   : > { %v9344_v52 = vpop.eup %9343 }
0x4ce8   : > { %v7798_v54 = vmul.f32 %v9344_v52, %v7790_v51 }
0x4cea   : > { %v7800_v56 = vsel %vm7799_vm0, %v7790_v51, %v7798_v54 }
0x4ceb   : > { %v7803_v53 = vsel %vm7801_vm6, %v7802_v55, %v7800_v56 }
0x4cec   : > { %v7804_v57 = vadd.f32 1e-06, %v7803_v53 }
0x4cee   : > { %9345 = vrcp.f32 %v7804_v57 }
0x4cfb   : > { %v9346_v60 = vpop.eup %9345 }
0x4cfc   : > { %v7806_v62 = vmul.f32 %v9346_v60, %v7796_v59 }
0x4cfe   : > { %v7812_v63 = vadd.f32 %v8300_v61, %v7806_v62 }
0x4d00   : > { %9118 = vmatmul.mubr.msk.f32.vlgmr.msra.gmra.mxu0 %vm373_vm3, %v7812_v63 }
0x4dc0   : > { %v7891_v8 = vpop.f32.mrf.mxu0 }
0x4dc1   : > { %v7892_v9 = vadd.f32 %v8301_v7, %v7891_v8 }
0x4dc2   : > { %v9119_v10 = vpop.f32.mrf.mxu0 }
0x4dc3   : > { %v7895_v12 = vmax.f32 %v7892_v9, 0.0 }
0x4dc5   : > { %9137 = vmatmul.mubr.msk.f32.vlgmr.msra.gmra.mxu1 %vm1597_vm9, %v7895_v12 }
0x4e85   : > { %v7978_v15 = vpop.f32.mrf.mxu1 }
0x4e86   : > { %v7979_v16 = vadd.f32 %v8303_v14, %v7978_v15 }
0x4e87   : > { %v9138_v17 = vpop.f32.mrf.mxu1 }
0x4e88   : > { %v7982_v19 = vadd.f32 %v7979_v16, %v10346_v33 }
0x4e8a   : > { %v7983_v13 = vsel %vm373_vm3, %v7982_v19, 0.0 }
0x4e8b   : > { %7984 = vadd.xlane.f32.xlu1 %v7983_v13 }
0x4f14   : > { %v7985_v20 = vpop.xlane.xlu1 %7984 }
0x4f15   : > { %v7986_v6 = vmul.f32 0.03125, %v7985_v20 }
0x4f17   : > { %v7987_v1 = vsub.f32 %v7982_v19, %v7986_v6 }
0x4f19   : > { %v7988_v3 = vmul.f32 %v7987_v1, %v7987_v1  ;;  %v7998_v40 = vmul.f32 %v8305_v25, %v7987_v1 }
0x4f1b   : > { %v7989_v11 = vsel %vm373_vm3, %v7988_v3, 0.0 }
0x4f1c   : > { %7990 = vadd.xlane.f32.xlu1 %v7989_v11 }
0x4fa5   : > { %v7991_v30 = vpop.xlane.xlu1 %7990 }
0x4fa6   : > { %v7992_v48 = vmul.f32 0.032258064, %v7991_v30 }
0x4fa8   : > { %9347 = vrsqrt.f32 %v7992_v48  ;;  %vm8001_vm9 = vcmp.eq.f32.partialorder %v7992_v48, inf  ;;  %v8004_v0 = vand.u32 2147483648, %v7992_v48  ;;  %vm8003_vm15 = vcmp.eq.f32.partialorder %v7992_v48, 0.0 }
0x4fb5   : > { %v9348_v42 = vpop.eup %9347 }
0x4fb6   : > { %v8000_v22 = vmul.f32 %v9348_v42, %v7992_v48 }
0x4fb8   : > { %v8002_v49 = vsel %vm8001_vm9, %v7992_v48, %v8000_v22 }
0x4fb9   : > { %v8005_v23 = vsel %vm8003_vm15, %v8004_v0, %v8002_v49 }
0x4fba   : > { %v8006_v24 = vadd.f32 1e-06, %v8005_v23 }
0x4fbc   : > { %9349 = vrcp.f32 %v8006_v24 }
0x4fc9   : > { %v9350_v26 = vpop.eup %9349 }
0x4fca   : > { %v8008_v28 = vmul.f32 %v9350_v26, %v7998_v40 }
0x4fcc   : > { %v8014_v29 = vadd.f32 %v8306_v27, %v8008_v28 }
0x4fce   : > { %8015 = vst.msk [vmem:[%s267_s6] sm:$0xff] %vm373_vm3, %v8014_v29 }
0x4fcf   : > { %9394 = shalt.err (!%p9391_p0)
}
0x4fd0   : > { %s9395_s16 = scalar_lea.hbm %s8028_s10, 128  ;;  %s9399_s26 = scalar_lea.hbm %s10407_s5, 256 }
0x4fd1   : > { %p9396_p1 = scmp.ne.s32.totalorder %s8028_s10, %s9395_s16  ;;  %p9400_p4 = scmp.lt.s32.totalorder %s8028_s10, %s10407_s5 }
0x4fd2   : > { %p9401_p7 = scmp.lt.s32.totalorder %s9399_s26, %s9395_s16 }
0x4fd3   : > { %p9397_p2 = pnand %p9396_p1, %p9533_p5 }
0x4fd4   : > { %p9402_p8 = por %p9401_p7, %p9400_p4 }
0x4fd5   : > { %p9398_p3 = pneg %p9397_p2 }
0x4fd7   : > { %p9403_p6 = pnand %p9402_p8, %p9398_p3 }
0x4fd9   : > { %9406 = shalt.err (!%p9403_p6)
}
0x4fda   : > { %9143 = dma.vmem_to_hbm [thread:$0]  (%p9533_p5), %s8031_s7, 128, %s8028_s10, %s8017_s11  }
0x4fdb PF: > { %p9155_p9 = scmp.ge.s32.totalorder %s9445_s21, 2  ;;  %s8042_s30 = sand.u32 1, %s9433_s18  }
0x4fdc   : > { %p10411_p10 = scmp.ne.s32.totalorder %s10409_s29, 0  ;;  %s8043_s6 = scalar_lea.sflag [#allocation4], %s8042_s30 }
0x4fde   : > { %p9150_p11 = pnand %p9155_p9, %p10411_p10 }
0x4fe0   : > { %p9151_p12 = pneg %p9150_p11 }
0x4fe2   : > { %9428 = dma.done.wait (%p9151_p12), %s8043_s6, 128  }
0x4fe3   : > { %9430 = vsyncadd (%p9151_p12), %s8043_s6, 4294967168  ;;  %p16_p13 = scmp.ge.s32.totalorder %s9520_s24, 4   ;;  %s10412_s18 = smov %s9437_s19 }
0x4fe4   : > { %s10413_s19 = smov %s9441_s20  ;;  %s10414_s20 = smov %s9531_s27 }
0x4fe5   : > { %s10415_s21 = smov %s9520_s24  ;;  %18 = sbr.rel (!%p16_p13) target bundleno = 4 (0x4), region = 89 }
0x4fea   :  { %8048 = vsyncpa [#allocation3], 1 }
0x4feb   :  { %8050 = vsyncpa [#allocation3 + $0x1], 1 }
0x4fec   :  { %8051 = vsyncpa [#allocation4], 1 }
0x4fed   :  { %8053 = vsyncpa [#allocation4 + $0x1], 1 }

</bundles_post_ra>
